<compile_context>
chip_gen: v7x
topology: tpu7x:2x2x1
jax: 0.10.0
libtpu: 0.0.40
codegen_flags: <defaults>
</compile_context>

<pallas_src>
import functools

import jax
import jax.numpy as jnp
import numpy as np
from jax.experimental import pallas as pl
from jax.experimental.pallas import tpu as pltpu


def _bottleneck_kernel(x_ref, w1_ref, b1_ref, w2_ref, b2_ref, w3_ref, b3_ref,
                       out_ref, pad_ref, *, Bt, H, W, Cin, Wp, Cout):
    f32 = jnp.float32
    M = Bt * H * W
    pdt = pad_ref.dtype

    # ---- zero only the 1-pixel halo of the padded scratch ------------------
    # (interior is fully overwritten below; halo must be zeroed each step
    #  because VMEM scratch is per-core and not zero-initialised, and with
    #  "parallel" semantics no single step is guaranteed to run first).
    pad_ref[:, 0:1, :, :] = jnp.zeros((Bt, 1, W + 2, Wp), pdt)
    pad_ref[:, H + 1:H + 2, :, :] = jnp.zeros((Bt, 1, W + 2, Wp), pdt)
    pad_ref[:, 1:H + 1, 0:1, :] = jnp.zeros((Bt, H, 1, Wp), pdt)
    pad_ref[:, 1:H + 1, W + 1:W + 2, :] = jnp.zeros((Bt, H, 1, Wp), pdt)

    # ---- conv1 (1x1, BN scale pre-folded) + bias + relu ---------------------
    # Written straight into the interior of the padded VMEM scratch.
    x = x_ref[...].reshape(M, Cin)                              # bf16 operands
    y1 = jnp.dot(x, w1_ref[...], preferred_element_type=f32)    # f32 accum
    y1 = jnp.maximum(y1 + b1_ref[...], 0.0)
    pad_ref[:, 1:H + 1, 1:W + 1, :] = y1.reshape(Bt, H, W, Wp).astype(pdt)

    # ---- conv2 (3x3, pad=1, stride=1) + bias + relu --------------------------
    # One im2col slab (kh-major, kw-minor taps along the channel axis) and a
    # single K = 9*Wp matmul; no zeros-init accumulator.
    slab = jnp.concatenate(
        [pad_ref[:, kh:kh + H, kw:kw + W, :]
         for kh in range(3) for kw in range(3)], axis=-1)
    y2 = jnp.dot(slab.reshape(M, 9 * Wp), w2_ref[...],
                 preferred_element_type=f32)
    y2 = jnp.maximum(y2 + b2_ref[...], 0.0)

    # ---- conv3 (1x1) + bias --------------------------------------------------
    y3 = jnp.dot(y2.astype(jnp.bfloat16), w3_ref[...],
                 preferred_element_type=f32)
    y3 = y3 + b3_ref[...]

    # ---- residual add + relu -------------------------------------------------
    idt = x_ref[...].astype(f32).reshape(M, Cout)               # Cin == Cout
    out_ref[...] = jnp.maximum(y3 + idt, 0.0).reshape(
        Bt, H, W, Cout).astype(out_ref.dtype)


def bottleneck_pallas(x_nchw, params):
    """x_nchw: (N, Cin, H, W) float32. Returns (N, Cout, H, W) float32."""
    N, Cin, H, W = x_nchw.shape
    w1, (s1, b1), w2, (s2, b2), w3, (s3, b3) = params
    width = w1.shape[1]
    Cout = w3.shape[1]
    assert Cout == Cin, "no downsample => identity must match out channels"

    f32, bf16 = jnp.float32, jnp.bfloat16

    # ---- fold BN scales into conv weight columns, pad width to 128 ----------
    Wp = -(-width // 128) * 128
    dw = Wp - width
    w1f = w1 * s1                                   # (Cin, width)
    w2f = w2 * s2.reshape(1, 1, width)              # (9, width, width)
    w3f = w3 * s3                                   # (width, Cout)
    w1b = jnp.pad(w1f, ((0, 0), (0, dw))).astype(bf16)                # (Cin, Wp)
    w2b = jnp.pad(w2f, ((0, 0), (0, dw), (0, dw))
                  ).reshape(9 * Wp, Wp).astype(bf16)                  # (9*Wp, Wp)
    w3b = jnp.pad(w3f, ((0, dw), (0, 0))).astype(bf16)                # (Wp, Cout)
    b1p = jnp.pad(b1, ((0, 0), (0, dw)))                              # (1, Wp)
    b2p = jnp.pad(b2, ((0, 0), (0, dw)))                              # (1, Wp)
    # (padded channels: bias 0 -> relu(0)=0, and their w2/w3 rows are 0.)

    # ---- cast first, then layout transpose (halves that HBM round-trip) -----
    x_nhwc = jnp.transpose(x_nchw.astype(bf16), (0, 2, 3, 1))         # NHWC

    # ---- generation-aware VMEM budget and images-per-step (Bt) --------------
    try:
        vmem_cap = int(pltpu.get_tpu_info().vmem_capacity_bytes)
    except Exception:                               # pragma: no cover
        vmem_cap = 64 * 1024 * 1024                 # conservative fallback
    budget = (vmem_cap * 3) // 4                    # 48 MiB v7x / 96 MiB v5e,v6e

    weight_bytes = 2 * 2 * (Cin * Wp + 9 * Wp * Wp + Wp * Cout)   # dbl-buffered
    per_img = (2 * H * W * Cin * 2                  # x tile (bf16, dbl-buffered)
               + 2 * H * W * Cout * 4               # out tile (f32, dbl-buffered)
               + (H + 2) * (W + 2) * Wp * 2         # padded scratch
               + H * W * 9 * Wp * 2                 # im2col slab temp
               + H * W * (2 * Wp + Cout) * 4)       # f32 intermediates (rough)
    avail = budget - weight_bytes
    assert avail >= per_img, "Bottleneck tile does not fit in the VMEM budget"
    cap_half = max(1, -(-N // 2))                   # keep >=2 grid steps (v7x)
    Bt = int(max(1, min(avail // per_img, 8, cap_half)))

    G = -(-N // Bt)                                 # grid steps
    Np = G * Bt
    if Np != N:
        x_nhwc = jnp.pad(x_nhwc, ((0, Np - N), (0, 0), (0, 0), (0, 0)))

    kernel = functools.partial(_bottleneck_kernel, Bt=Bt, H=H, W=W,
                               Cin=Cin, Wp=Wp, Cout=Cout)

    flops = 2 * Np * H * W * (Cin * Wp + 9 * Wp * Wp + Wp * Cout)
    bytes_accessed = (Np * H * W * Cin * 2 + Np * H * W * Cout * 4
                      + weight_bytes // 2 + (2 * Wp + Cout) * 4)

    out_nhwc = pl.pallas_call(
        kernel,
        out_shape=jax.ShapeDtypeStruct((Np, H, W, Cout), jnp.float32),
        grid_spec=pltpu.PrefetchScalarGridSpec(
            num_scalar_prefetch=0,
            grid=(G,),
            in_specs=[
                pl.BlockSpec((Bt, H, W, Cin), lambda g: (g, 0, 0, 0)),
                pl.BlockSpec((Cin, Wp), lambda g: (0, 0)),
                pl.BlockSpec((1, Wp), lambda g: (0, 0)),
                pl.BlockSpec((9 * Wp, Wp), lambda g: (0, 0)),
                pl.BlockSpec((1, Wp), lambda g: (0, 0)),
                pl.BlockSpec((Wp, Cout), lambda g: (0, 0)),
                pl.BlockSpec((1, Cout), lambda g: (0, 0)),
            ],
            out_specs=pl.BlockSpec((Bt, H, W, Cout), lambda g: (g, 0, 0, 0)),
            scratch_shapes=[pltpu.VMEM((Bt, H + 2, W + 2, Wp), bf16)],
        ),
        compiler_params=pltpu.CompilerParams(
            dimension_semantics=("parallel",),
            vmem_limit_bytes=int(budget)),
        cost_estimate=pl.CostEstimate(flops=flops, transcendentals=0,
                                      bytes_accessed=bytes_accessed),
    )(x_nhwc, w1b, b1p, w2b, b2p, w3b, b3)

    if Np != N:
        out_nhwc = out_nhwc[:N]
    return jnp.transpose(out_nhwc, (0, 3, 1, 2))                 # NHWC -> NCHW


# ----------------------------------------------------------------------------
# Deterministic parameter construction (matches Bottleneck.__init__ shapes).
# ----------------------------------------------------------------------------
def make_params(key, inplanes, planes, base_width=64, groups=1):
    expansion = 4
    width = int(planes * (base_width / 64.0)) * groups
    cout = planes * expansion

    def bn_fold(key, c):
        k1, k2, k3, k4 = jax.random.split(key, 4)
        gamma = 1.0 + 0.1 * jax.random.normal(k1, (c,), jnp.float32)
        beta = 0.1 * jax.random.normal(k2, (c,), jnp.float32)
        mean = 0.1 * jax.random.normal(k3, (c,), jnp.float32)
        var = 1.0 + 0.2 * jax.random.uniform(k4, (c,), jnp.float32)
        eps = 1e-5
        scale = gamma / jnp.sqrt(var + eps)
        bias = beta - mean * scale
        return scale.reshape(1, c), bias.reshape(1, c)

    ks = jax.random.split(key, 6)
    # conv weights stored "matmul-ready":
    #   conv1x1: (Cin, Cout);  conv3x3: (9, Cin, Cout) indexed by kh*3+kw
    w1 = 0.1 * jax.random.normal(ks[0], (inplanes, width), jnp.float32)
    w2 = 0.1 * jax.random.normal(ks[1], (9, width, width), jnp.float32)
    w3 = 0.1 * jax.random.normal(ks[2], (width, cout), jnp.float32)
    bn1 = bn_fold(ks[3], width)
    bn2 = bn_fold(ks[4], width)
    bn3 = bn_fold(ks[5], cout)
    return (w1, bn1, w2, bn2, w3, bn3)


# ----------------------------------------------------------------------------
# Pure-JAX reference (same math: eval-mode BN folded into the bf16 conv
# weights, bf16 matmul operands with f32 accumulation) for correctness.
# ----------------------------------------------------------------------------
def bottleneck_ref(x_nchw, params):
    w1, (s1, b1), w2, (s2, b2), w3, (s3, b3) = params
    f32, bf16 = jnp.float32, jnp.bfloat16
    x = jnp.transpose(x_nchw.astype(bf16), (0, 2, 3, 1))
    N, H, W, _ = x.shape
    width = w1.shape[1]
    w1b = (w1 * s1).astype(bf16)
    w2b = (w2 * s2.reshape(1, 1, width)).astype(bf16)
    w3b = (w3 * s3).astype(bf16)

    y1 = jnp.einsum('nhwc,cd->nhwd', x, w1b, preferred_element_type=f32)
    y1 = jnp.maximum(y1 + b1, 0.0)
    y1p = jnp.pad(y1.astype(bf16), ((0, 0), (1, 1), (1, 1), (0, 0)))
    acc = jnp.zeros((N, H, W, width), f32)
    for kh in range(3):
        for kw in range(3):
            acc = acc + jnp.einsum('nhwc,cd->nhwd',
                                   y1p[:, kh:kh + H, kw:kw + W, :],
                                   w2b[kh * 3 + kw],
                                   preferred_element_type=f32)
    y2 = jnp.maximum(acc + b2, 0.0)
    y3 = jnp.einsum('nhwc,cd->nhwd', y2.astype(bf16), w3b,
                    preferred_element_type=f32)
    y3 = y3 + b3
    out = jnp.maximum(y3 + x.astype(f32), 0.0)
    return jnp.transpose(out, (0, 3, 1, 2))


if __name__ == "__main__":
    key = jax.random.PRNGKey(0)
    kx, kp = jax.random.split(key)

    # Small shapes consistent with the module: inplanes = planes * expansion
    # so the residual add works without a downsample branch.
    N, planes, H, W = 2, 32, 16, 16
    inplanes = planes * 4                       # 128
    x = jax.random.normal(kx, (N, inplanes, H, W), jnp.float32)

    params = make_params(kp, inplanes, planes)

    out = jax.block_until_ready(bottleneck_pallas(x, params))
    ref = bottleneck_ref(x, params)
    np.testing.assert_allclose(np.asarray(out), np.asarray(ref),
                               rtol=1e-2, atol=1e-2)

    print("KERNEL_OK")
</pallas_src>

<mosaic_0001>
module attributes {stable_mosaic.version = 11 : i64} {
  func.func @_bottleneck_kernel(%arg0: i32, %arg1: memref<1x16x16x128xbf16, #tpu.memory_space<vmem>>, %arg2: memref<128x128xbf16, #tpu.memory_space<vmem>>, %arg3: memref<1x128xf32, #tpu.memory_space<vmem>>, %arg4: memref<1152x128xbf16, #tpu.memory_space<vmem>>, %arg5: memref<1x128xf32, #tpu.memory_space<vmem>>, %arg6: memref<128x128xbf16, #tpu.memory_space<vmem>>, %arg7: memref<1x128xf32, #tpu.memory_space<vmem>>, %arg8: memref<1x16x16x128xf32, #tpu.memory_space<vmem>>, %arg9: memref<1x18x18x128xbf16, #tpu.memory_space<vmem>>) attributes {dimension_semantics = [#tpu.dimension_semantics<parallel>], iteration_bounds = array<i64: 2>, scalar_prefetch = 0 : i64, scratch_operands = 1 : i64, tpu.core_type = #tpu.core_type<tc>, window_params = [{transform_indices = @transform_0, window_bounds = array<i64: 1, 16, 16, 128>}, {pipeline_mode = #tpu.pipeline_mode<synchronous>, transform_indices = @transform_1, window_bounds = array<i64: 128, 128>}, {pipeline_mode = #tpu.pipeline_mode<synchronous>, transform_indices = @transform_2, window_bounds = array<i64: 1, 128>}, {pipeline_mode = #tpu.pipeline_mode<synchronous>, transform_indices = @transform_3, window_bounds = array<i64: 1152, 128>}, {pipeline_mode = #tpu.pipeline_mode<synchronous>, transform_indices = @transform_4, window_bounds = array<i64: 1, 128>}, {pipeline_mode = #tpu.pipeline_mode<synchronous>, transform_indices = @transform_5, window_bounds = array<i64: 128, 128>}, {pipeline_mode = #tpu.pipeline_mode<synchronous>, transform_indices = @transform_6, window_bounds = array<i64: 1, 128>}, {transform_indices = @transform_7, window_bounds = array<i64: 1, 16, 16, 128>}]} {
    %cst = arith.constant 0.000000e+00 : bf16
    %0 = vector.broadcast %cst : bf16 to vector<1x1x18x128xbf16>
    %c0 = arith.constant 0 : index
    %c0_0 = arith.constant 0 : index
    %c0_1 = arith.constant 0 : index
    %c0_2 = arith.constant 0 : index
    %1 = vector.load %arg9[%c0, %c0_0, %c0_1, %c0_2] : memref<1x18x18x128xbf16, #tpu.memory_space<vmem>>, vector<1x1x18x128xbf16>
    tpu.vector_store %arg9[%c0, %c0_0, %c0_1, %c0_2], %0 {strides = array<i32>} : memref<1x18x18x128xbf16, #tpu.memory_space<vmem>>, vector<1x1x18x128xbf16>,
    %cst_3 = arith.constant 0.000000e+00 : bf16
    %2 = vector.broadcast %cst_3 : bf16 to vector<1x1x18x128xbf16>
    %c0_4 = arith.constant 0 : index
    %c17 = arith.constant 17 : index
    %c0_5 = arith.constant 0 : index
    %c0_6 = arith.constant 0 : index
    %3 = vector.load %arg9[%c0_4, %c17, %c0_5, %c0_6] : memref<1x18x18x128xbf16, #tpu.memory_space<vmem>>, vector<1x1x18x128xbf16>
    tpu.vector_store %arg9[%c0_4, %c17, %c0_5, %c0_6], %2 {strides = array<i32>} : memref<1x18x18x128xbf16, #tpu.memory_space<vmem>>, vector<1x1x18x128xbf16>,
    %cst_7 = arith.constant 0.000000e+00 : bf16
    %4 = vector.broadcast %cst_7 : bf16 to vector<1x16x1x128xbf16>
    %c0_8 = arith.constant 0 : index
    %c1 = arith.constant 1 : index
    %c0_9 = arith.constant 0 : index
    %c0_10 = arith.constant 0 : index
    %5 = vector.load %arg9[%c0_8, %c1, %c0_9, %c0_10] : memref<1x18x18x128xbf16, #tpu.memory_space<vmem>>, vector<1x16x1x128xbf16>
    tpu.vector_store %arg9[%c0_8, %c1, %c0_9, %c0_10], %4 {strides = array<i32>} : memref<1x18x18x128xbf16, #tpu.memory_space<vmem>>, vector<1x16x1x128xbf16>,
    %cst_11 = arith.constant 0.000000e+00 : bf16
    %6 = vector.broadcast %cst_11 : bf16 to vector<1x16x1x128xbf16>
    %c0_12 = arith.constant 0 : index
    %c1_13 = arith.constant 1 : index
    %c17_14 = arith.constant 17 : index
    %c0_15 = arith.constant 0 : index
    %7 = vector.load %arg9[%c0_12, %c1_13, %c17_14, %c0_15] : memref<1x18x18x128xbf16, #tpu.memory_space<vmem>>, vector<1x16x1x128xbf16>
    tpu.vector_store %arg9[%c0_12, %c1_13, %c17_14, %c0_15], %6 {strides = array<i32>} : memref<1x18x18x128xbf16, #tpu.memory_space<vmem>>, vector<1x16x1x128xbf16>,
    %c0_16 = arith.constant 0 : index
    %c0_17 = arith.constant 0 : index
    %c0_18 = arith.constant 0 : index
    %c0_19 = arith.constant 0 : index
    %8 = vector.load %arg1[%c0_16, %c0_17, %c0_18, %c0_19] : memref<1x16x16x128xbf16, #tpu.memory_space<vmem>>, vector<1x16x16x128xbf16>
    %9 = vector.shape_cast %8 : vector<1x16x16x128xbf16> to vector<256x128xbf16>
    %c0_20 = arith.constant 0 : index
    %c0_21 = arith.constant 0 : index
    %10 = vector.load %arg2[%c0_20, %c0_21] : memref<128x128xbf16, #tpu.memory_space<vmem>>, vector<128x128xbf16>
    %cst_22 = arith.constant dense<0.000000e+00> : vector<256x128xf32>
    %11 = tpu.matmul %9, %10, %cst_22 {dimension_numbers = #tpu.dot_dimension_numbers<[1], [0], [0], [1], [0, 0, 1, 1], [], []>} : vector<256x128xbf16>, vector<128x128xbf16>, vector<256x128xf32> -> vector<256x128xf32>
    %c0_23 = arith.constant 0 : index
    %c0_24 = arith.constant 0 : index
    %12 = vector.load %arg3[%c0_23, %c0_24] : memref<1x128xf32, #tpu.memory_space<vmem>>, vector<1x128xf32>
    %13 = vector.broadcast %12 : vector<1x128xf32> to vector<256x128xf32>
    %14 = arith.addf %11, %13 : vector<256x128xf32>
    %cst_25 = arith.constant 0.000000e+00 : f32
    %15 = vector.broadcast %cst_25 : f32 to vector<256x128xf32>
    %16 = arith.maximumf %14, %15 : vector<256x128xf32>
    %17 = vector.shape_cast %16 : vector<256x128xf32> to vector<1x16x16x128xf32>
    %18 = arith.truncf %17 : vector<1x16x16x128xf32> to vector<1x16x16x128xbf16>
    %c0_26 = arith.constant 0 : index
    %c1_27 = arith.constant 1 : index
    %c1_28 = arith.constant 1 : index
    %c0_29 = arith.constant 0 : index
    %19 = vector.load %arg9[%c0_26, %c1_27, %c1_28, %c0_29] : memref<1x18x18x128xbf16, #tpu.memory_space<vmem>>, vector<1x16x16x128xbf16>
    tpu.vector_store %arg9[%c0_26, %c1_27, %c1_28, %c0_29], %18 {strides = array<i32>} : memref<1x18x18x128xbf16, #tpu.memory_space<vmem>>, vector<1x16x16x128xbf16>,
    %c0_30 = arith.constant 0 : index
    %c0_31 = arith.constant 0 : index
    %c0_32 = arith.constant 0 : index
    %c0_33 = arith.constant 0 : index
    %20 = vector.load %arg9[%c0_30, %c0_31, %c0_32, %c0_33] : memref<1x18x18x128xbf16, #tpu.memory_space<vmem>>, vector<1x16x16x128xbf16>
    %c0_34 = arith.constant 0 : index
    %c0_35 = arith.constant 0 : index
    %c1_36 = arith.constant 1 : index
    %c0_37 = arith.constant 0 : index
    %21 = vector.load %arg9[%c0_34, %c0_35, %c1_36, %c0_37] : memref<1x18x18x128xbf16, #tpu.memory_space<vmem>>, vector<1x16x16x128xbf16>
    %c0_38 = arith.constant 0 : index
    %c0_39 = arith.constant 0 : index
    %c2 = arith.constant 2 : index
    %c0_40 = arith.constant 0 : index
    %22 = vector.load %arg9[%c0_38, %c0_39, %c2, %c0_40] : memref<1x18x18x128xbf16, #tpu.memory_space<vmem>>, vector<1x16x16x128xbf16>
    %c0_41 = arith.constant 0 : index
    %c1_42 = arith.constant 1 : index
    %c0_43 = arith.constant 0 : index
    %c0_44 = arith.constant 0 : index
    %23 = vector.load %arg9[%c0_41, %c1_42, %c0_43, %c0_44] : memref<1x18x18x128xbf16, #tpu.memory_space<vmem>>, vector<1x16x16x128xbf16>
    %c0_45 = arith.constant 0 : index
    %c1_46 = arith.constant 1 : index
    %c1_47 = arith.constant 1 : index
    %c0_48 = arith.constant 0 : index
    %24 = vector.load %arg9[%c0_45, %c1_46, %c1_47, %c0_48] : memref<1x18x18x128xbf16, #tpu.memory_space<vmem>>, vector<1x16x16x128xbf16>
    %c0_49 = arith.constant 0 : index
    %c1_50 = arith.constant 1 : index
    %c2_51 = arith.constant 2 : index
    %c0_52 = arith.constant 0 : index
    %25 = vector.load %arg9[%c0_49, %c1_50, %c2_51, %c0_52] : memref<1x18x18x128xbf16, #tpu.memory_space<vmem>>, vector<1x16x16x128xbf16>
    %c0_53 = arith.constant 0 : index
    %c2_54 = arith.constant 2 : index
    %c0_55 = arith.constant 0 : index
    %c0_56 = arith.constant 0 : index
    %26 = vector.load %arg9[%c0_53, %c2_54, %c0_55, %c0_56] : memref<1x18x18x128xbf16, #tpu.memory_space<vmem>>, vector<1x16x16x128xbf16>
    %c0_57 = arith.constant 0 : index
    %c2_58 = arith.constant 2 : index
    %c1_59 = arith.constant 1 : index
    %c0_60 = arith.constant 0 : index
    %27 = vector.load %arg9[%c0_57, %c2_58, %c1_59, %c0_60] : memref<1x18x18x128xbf16, #tpu.memory_space<vmem>>, vector<1x16x16x128xbf16>
    %c0_61 = arith.constant 0 : index
    %c2_62 = arith.constant 2 : index
    %c2_63 = arith.constant 2 : index
    %c0_64 = arith.constant 0 : index
    %28 = vector.load %arg9[%c0_61, %c2_62, %c2_63, %c0_64] : memref<1x18x18x128xbf16, #tpu.memory_space<vmem>>, vector<1x16x16x128xbf16>
    %29 = tpu.concatenate %20, %21, %22, %23, %24, %25, %26, %27, %28 in 3 : vector<1x16x16x128xbf16>, vector<1x16x16x128xbf16>, vector<1x16x16x128xbf16>, vector<1x16x16x128xbf16>, vector<1x16x16x128xbf16>, vector<1x16x16x128xbf16>, vector<1x16x16x128xbf16>, vector<1x16x16x128xbf16>, vector<1x16x16x128xbf16> -> vector<1x16x16x1152xbf16>
    %30 = vector.shape_cast %29 : vector<1x16x16x1152xbf16> to vector<256x1152xbf16>
    %c0_65 = arith.constant 0 : index
    %c0_66 = arith.constant 0 : index
    %31 = vector.load %arg4[%c0_65, %c0_66] : memref<1152x128xbf16, #tpu.memory_space<vmem>>, vector<1152x128xbf16>
    %cst_67 = arith.constant dense<0.000000e+00> : vector<256x128xf32>
    %32 = tpu.matmul %30, %31, %cst_67 {dimension_numbers = #tpu.dot_dimension_numbers<[1], [0], [0], [1], [0, 0, 1, 1], [], []>} : vector<256x1152xbf16>, vector<1152x128xbf16>, vector<256x128xf32> -> vector<256x128xf32>
    %c0_68 = arith.constant 0 : index
    %c0_69 = arith.constant 0 : index
    %33 = vector.load %arg5[%c0_68, %c0_69] : memref<1x128xf32, #tpu.memory_space<vmem>>, vector<1x128xf32>
    %34 = vector.broadcast %33 : vector<1x128xf32> to vector<256x128xf32>
    %35 = arith.addf %32, %34 : vector<256x128xf32>
    %cst_70 = arith.constant 0.000000e+00 : f32
    %36 = vector.broadcast %cst_70 : f32 to vector<256x128xf32>
    %37 = arith.maximumf %35, %36 : vector<256x128xf32>
    %38 = arith.truncf %37 : vector<256x128xf32> to vector<256x128xbf16>
    %c0_71 = arith.constant 0 : index
    %c0_72 = arith.constant 0 : index
    %39 = vector.load %arg6[%c0_71, %c0_72] : memref<128x128xbf16, #tpu.memory_space<vmem>>, vector<128x128xbf16>
    %cst_73 = arith.constant dense<0.000000e+00> : vector<256x128xf32>
    %40 = tpu.matmul %38, %39, %cst_73 {dimension_numbers = #tpu.dot_dimension_numbers<[1], [0], [0], [1], [0, 0, 1, 1], [], []>} : vector<256x128xbf16>, vector<128x128xbf16>, vector<256x128xf32> -> vector<256x128xf32>
    %c0_74 = arith.constant 0 : index
    %c0_75 = arith.constant 0 : index
    %41 = vector.load %arg7[%c0_74, %c0_75] : memref<1x128xf32, #tpu.memory_space<vmem>>, vector<1x128xf32>
    %42 = vector.broadcast %41 : vector<1x128xf32> to vector<256x128xf32>
    %43 = arith.addf %40, %42 : vector<256x128xf32>
    %c0_76 = arith.constant 0 : index
    %c0_77 = arith.constant 0 : index
    %c0_78 = arith.constant 0 : index
    %c0_79 = arith.constant 0 : index
    %44 = vector.load %arg1[%c0_76, %c0_77, %c0_78, %c0_79] : memref<1x16x16x128xbf16, #tpu.memory_space<vmem>>, vector<1x16x16x128xbf16>
    %45 = arith.extf %44 : vector<1x16x16x128xbf16> to vector<1x16x16x128xf32>
    %46 = vector.shape_cast %45 : vector<1x16x16x128xf32> to vector<256x128xf32>
    %47 = arith.addf %43, %46 : vector<256x128xf32>
    %cst_80 = arith.constant 0.000000e+00 : f32
    %48 = vector.broadcast %cst_80 : f32 to vector<256x128xf32>
    %49 = arith.maximumf %47, %48 : vector<256x128xf32>
    %50 = vector.shape_cast %49 : vector<256x128xf32> to vector<1x16x16x128xf32>
    %c0_81 = arith.constant 0 : index
    %c0_82 = arith.constant 0 : index
    %c0_83 = arith.constant 0 : index
    %c0_84 = arith.constant 0 : index
    %51 = vector.load %arg8[%c0_81, %c0_82, %c0_83, %c0_84] : memref<1x16x16x128xf32, #tpu.memory_space<vmem>>, vector<1x16x16x128xf32>
    tpu.vector_store %arg8[%c0_81, %c0_82, %c0_83, %c0_84], %50 {strides = array<i32>} : memref<1x16x16x128xf32, #tpu.memory_space<vmem>>, vector<1x16x16x128xf32>,
    return
  }
  func.func @transform_0(%arg0: i32) -> (i32, i32, i32, i32) {
    %c0_i32 = arith.constant 0 : i32
    %c0_i32_0 = arith.constant 0 : i32
    %c0_i32_1 = arith.constant 0 : i32
    %c0_i32_2 = arith.constant 0 : i32
    return %arg0, %c0_i32, %c0_i32_0, %c0_i32_1 : i32, i32, i32, i32
  }
  func.func @transform_1(%arg0: i32) -> (i32, i32) {
    %c0_i32 = arith.constant 0 : i32
    %c0_i32_0 = arith.constant 0 : i32
    %c0_i32_1 = arith.constant 0 : i32
    return %c0_i32, %c0_i32_0 : i32, i32
  }
  func.func @transform_2(%arg0: i32) -> (i32, i32) {
    %c0_i32 = arith.constant 0 : i32
    %c0_i32_0 = arith.constant 0 : i32
    %c0_i32_1 = arith.constant 0 : i32
    return %c0_i32, %c0_i32_0 : i32, i32
  }
  func.func @transform_3(%arg0: i32) -> (i32, i32) {
    %c0_i32 = arith.constant 0 : i32
    %c0_i32_0 = arith.constant 0 : i32
    %c0_i32_1 = arith.constant 0 : i32
    return %c0_i32, %c0_i32_0 : i32, i32
  }
  func.func @transform_4(%arg0: i32) -> (i32, i32) {
    %c0_i32 = arith.constant 0 : i32
    %c0_i32_0 = arith.constant 0 : i32
    %c0_i32_1 = arith.constant 0 : i32
    return %c0_i32, %c0_i32_0 : i32, i32
  }
  func.func @transform_5(%arg0: i32) -> (i32, i32) {
    %c0_i32 = arith.constant 0 : i32
    %c0_i32_0 = arith.constant 0 : i32
    %c0_i32_1 = arith.constant 0 : i32
    return %c0_i32, %c0_i32_0 : i32, i32
  }
  func.func @transform_6(%arg0: i32) -> (i32, i32) {
    %c0_i32 = arith.constant 0 : i32
    %c0_i32_0 = arith.constant 0 : i32
    %c0_i32_1 = arith.constant 0 : i32
    return %c0_i32, %c0_i32_0 : i32, i32
  }
  func.func @transform_7(%arg0: i32) -> (i32, i32, i32, i32) {
    %c0_i32 = arith.constant 0 : i32
    %c0_i32_0 = arith.constant 0 : i32
    %c0_i32_1 = arith.constant 0 : i32
    %c0_i32_2 = arith.constant 0 : i32
    return %arg0, %c0_i32, %c0_i32_0, %c0_i32_1 : i32, i32, i32, i32
  }
}

</mosaic_0001>

<bundles_post_ra>
// kernel: tpu_custom_call.1
= control target key start
LH: loop header
LB: loop body
LE: loop exit
PB: predicated region body
PF: predicated region fallthrough
CT: control target
= control target key end

     0   :  { %12 = vsyncpa [#allocation4], 0  ;;  %s8181_s0 = inlined_call_operand.hbm [shape: bf16[2,16,16,128], index: 0, kind: input, shape index: {}]   ;;  %s8182_s1 = inlined_call_operand.hbm [shape: bf16[128,128], index: 1, kind: input, shape index: {}]   ;;  %s8183_s2 = inlined_call_operand.vmem [shape: f32[1,128], index: 2, kind: input, shape index: {}]   ;;  %s8184_s3 = inlined_call_operand.hbm [shape: bf16[1152,128], index: 3, kind: input, shape index: {}]   ;;  %s8185_s4 = inlined_call_operand.vmem [shape: f32[1,128], index: 4, kind: input, shape index: {}]   ;;  %s8186_s5 = inlined_call_operand.hbm [shape: bf16[128,128], index: 5, kind: input, shape index: {}]   ;;  %s8187_s6 = inlined_call_operand.vmem [shape: f32[1,128], index: 6, kind: input, shape index: {}]   ;;  %s8188_s7 = inlined_call_operand.hbm [shape: f32[2,16,16,128], index: 7, kind: output, shape index: {}]  }
   0x1   :  { %14 = vsyncpa [#allocation4 + $0x1], 0 }
   0x2   :  { %15 = vsyncpa [#allocation7], 0 }
   0x3   :  { %16 = vsyncpa [#allocation10], 0 }
   0x4   :  { %17 = vsyncpa [#allocation5], 0 }
   0x5   :  { %19 = vsyncpa [#allocation5 + $0x1], 0  ;;  %s6593_s24 = smov 0   ;;  %s6595_s25 = smov 0  }
   0x6   :  { %s6597_s26 = smov 0   ;;  %s6599_s27 = smov 0  }
   0x7 LB: > { %s6614_s28 = sadd.s32 4294967295, %s6541_s27   ;;  %s4906_s29 = sadd.s32 4294967294, %s6541_s27   ;;  %s6541_s27 = sphi %s6599_s27, %s8223_s27   ;;  %s6537_s26 = sphi %s6597_s26, %s8222_s26   ;;  %s6533_s25 = sphi %s6595_s25, %s8221_s25   ;;  %s6529_s24 = sphi %s6593_s24, %s8220_s24  }
   0x8   : > { %p45_p0 = scmp.ne.s32.totalorder %s6533_s25, %s6529_s24  ;;  %p8189_p1 = scmp.eq.s32.totalorder %s6614_s28, 0 }
   0x9   : > { %p201_p3 = scmp.eq.s32.totalorder %s4906_s29, 1  ;;  %p4907_p5 = scmp.ge.s32.totalorder %s6541_s27, 1 }
   0xa   : > { %p6623_p4 = por %p8189_p1, %p45_p0  ;;  %p208_p7 = scmp.lt.s32.totalorder %s6541_s27, 3 }
   0xb   : > { %p6628_p6 = por %p201_p3, %p45_p0  ;;  %s6543_s10 = smov [#allocation6]  }
   0xc   : > { %s8193_s30 = scalar_select %p6623_p4, 1, 0 }
   0xd   : > { %s8194_s8 = scalar_select %p6628_p6, 1, 0 }
   0xe   : > { %p6633_p8 = pnand %p4907_p5, %p208_p7  ;;  %s220_s11 = sshll.u32 %s6543_s10, 4  ;;  %s6637_s11 = int_to_ptr.vmem [resolvable:$true] %s220_s11 }
   0xf   : > { %8195 = sst [smem:[#allocation16_spill]] %s8194_s8  ;;  %s6544_s13 = smov [#allocation8]  }
  0x10   : > { %s8196_s9 = scalar_select %p6633_p8, 1, 0 }
  0x11   : > { %p6018_p9 = pneg %p6633_p8  ;;  %s236_s14 = sshll.u32 %s6544_s13, 4  ;;  %s6648_s14 = int_to_ptr.vmem [resolvable:$true] %s236_s14 }
  0x12   : > { %s6545_s15 = smov [#allocation9]   ;;  %s6353_s19 = scalar_lea.hbm %s8182_s1, 1024 }
  0x13   : > { %p6644_p11 = pnand %p6018_p9, %p8189_p1  ;;  %s6650_s16 = sshll.u32 %s6545_s15, 4  ;;  %s253_s16 = int_to_ptr.vmem [resolvable:$true] %s6650_s16 }
  0x14   : > { %p6354_p12 = scmp.ne.s32.totalorder %s8182_s1, %s6353_s19  ;;  %p6360_p5 = scmp.lt.u32.totalorder %s6353_s19, %s8182_s1 }
  0x15   : > { %p6660_p13 = pneg %p6644_p11 }
  0x17   : > { %p6356_p0 = pnand %p6660_p13, %p6354_p12 }
  0x19   : > { %p6357_p3 = pneg %p6356_p0 }
  0x1b   : > { %p6362_p7 = pnand %p6360_p5, %p6357_p3 }
  0x1d   : > { %6365 = shalt.err (!%p6362_p7)
}
  0x1e   : > { %s6366_s10 = scalar_lea.vmem %s6637_s11, 1024  ;;  %p6374_p2 = scmp.lt.s32.totalorder %s6637_s11, %s6637_s11 }
  0x1f   : > { %p6367_p9 = scmp.ne.s32.totalorder %s6637_s11, %s6366_s10  ;;  %p6375_p6 = scmp.lt.s32.totalorder %s6366_s10, %s6366_s10 }
  0x21   : > { %p6369_p10 = pnand %p6367_p9, %p6660_p13  ;;  %p6376_p12 = por %p6375_p6, %p6374_p2 }
  0x23   : > { %p6370_p1 = pneg %p6369_p10 }
  0x25   : > { %p6377_p0 = pnand %p6376_p12, %p6370_p1 }
  0x27   : > { %6380 = shalt.err (!%p6377_p0)
}
  0x28   : > { %s6546_s13 = smov 64   ;;  %s6547_s15 = smov 4  }
  0x29   : > { %6021 = dma.hbm_to_vmem [thread:$0]  (!%p6644_p11), %s8182_s1, 1024, %s6637_s11, [#allocation7], %s6546_s13, %s6546_s13, %s6547_s15  }
  0x2a   : > { %s6381_s21 = scalar_lea.hbm %s8184_s3, 9216 }
  0x2b   : > { %p6382_p1 = scmp.ne.s32.totalorder %s8184_s3, %s6381_s21  ;;  %p6388_p10 = scmp.lt.u32.totalorder %s6381_s21, %s8184_s3 }
  0x2d   : > { %p6384_p2 = pnand %p6382_p1, %p6660_p13 }
  0x2f   : > { %p6385_p6 = pneg %p6384_p2 }
  0x31   : > { %p6390_p3 = pnand %p6388_p10, %p6385_p6 }
  0x33   : > { %6393 = shalt.err (!%p6390_p3)
}
  0x34   : > { %s6394_s11 = scalar_lea.vmem %s6648_s14, 9216  ;;  %p6402_p12 = scmp.lt.s32.totalorder %s6648_s14, %s6648_s14 }
  0x35   : > { %p6395_p5 = scmp.ne.s32.totalorder %s6648_s14, %s6394_s11  ;;  %p6403_p0 = scmp.lt.s32.totalorder %s6394_s11, %s6394_s11 }
  0x37   : > { %p6397_p7 = pnand %p6395_p5, %p6660_p13  ;;  %p6404_p1 = por %p6403_p0, %p6402_p12 }
  0x39   : > { %p6398_p9 = pneg %p6397_p7 }
  0x3b   : > { %p6405_p2 = pnand %p6404_p1, %p6398_p9 }
  0x3d   : > { %6408 = shalt.err (!%p6405_p2)
}
  0x3e   : > { %6024 = dma.hbm_to_vmem [thread:$0]  (!%p6644_p11), %s8184_s3, 9216, %s6648_s14, [#allocation7], %s6546_s13, %s6546_s13, %s6547_s15  }
  0x3f   : > { %s6409_s20 = scalar_lea.hbm %s8186_s5, 1024 }
  0x40   : > { %p6410_p6 = scmp.ne.s32.totalorder %s8186_s5, %s6409_s20  ;;  %p6416_p5 = scmp.lt.u32.totalorder %s6409_s20, %s8186_s5 }
  0x42   : > { %p6412_p10 = pnand %p6410_p6, %p6660_p13 }
  0x44   : > { %p6413_p3 = pneg %p6412_p10 }
  0x46   : > { %p6418_p7 = pnand %p6416_p5, %p6413_p3 }
  0x48   : > { %6421 = shalt.err (!%p6418_p7)
}
  0x49   : > { %s6422_s11 = scalar_lea.vmem %s253_s16, 1024  ;;  %p6430_p1 = scmp.lt.s32.totalorder %s253_s16, %s253_s16 }
  0x4a   : > { %p6423_p9 = scmp.ne.s32.totalorder %s253_s16, %s6422_s11  ;;  %p6431_p2 = scmp.lt.s32.totalorder %s6422_s11, %s6422_s11 }
  0x4c   : > { %p6425_p12 = pnand %p6423_p9, %p6660_p13  ;;  %p6432_p4 = por %p6431_p2, %p6430_p1 }
  0x4e   : > { %p6426_p0 = pneg %p6425_p12 }
  0x50   : > { %p6433_p8 = pnand %p6432_p4, %p6426_p0 }
  0x52   : > { %6436 = shalt.err (!%p6433_p8)
}
  0x53   : > { %6027 = dma.hbm_to_vmem [thread:$0]  (!%p6644_p11), %s8186_s5, 1024, %s253_s16, [#allocation10], %s6546_s13, %s6546_s13, %s6547_s15  }
  0x54   : > { %s6733_s22 = sadd.s32 1, %s6541_s27   ;;  %s32_s17 = sadd.s32 1, %s6537_s26 }
  0x55   : > { %s29_s12 = ssub.s32 %s6541_s27, %s6733_s22  ;;  %p39_p8 = scmp.ne.s32.totalorder %s6537_s26, %s6533_s25 }
  0x56   : > { %p30_p4 = scmp.eq.s32.totalorder %s29_s12, 0  ;;  %p40_p13 = scmp.eq.s32.totalorder %s6541_s27, 0 }
  0x57   : > { %p6039_p6 = scmp.lt.s32.totalorder %s6541_s27, 2  ;;  %p8199_p3 = scmp.eq.s32.totalorder %s6614_s28, 1 }
  0x58   : > { %s6743_s18 = scalar_select %p30_p4, %s6537_s26, %s32_s17  }
  0x59   : > { %p41_p10 = por %p40_p13, %p39_p8  ;;  %p6747_p5 = por %p8199_p3, %p39_p8 }
  0x5a   : > { %s269_s20 = sand.u32 1, %s6537_s26   ;;  %s5209_s21 = sshll.u32 %s6541_s27, 11 }
  0x5b   : > { %s4912_s16 = sshll.u32 %s269_s20, 7  ;;  %s6756_s10 = scalar_lea.hbm %s8181_s0, %s5209_s21 }
  0x5c   : > { %s273_s11 = scalar_lea.vmem [#allocation3], %s4912_s16  ;;  %p6758_p11 = pnand %p6039_p6, %p41_p10 }
  0x5d   : > { %s280_s14 = sshll.u32 %s273_s11, 4  ;;  %s6764_s12 = scalar_lea.sflag [#allocation4], %s269_s20  ;;  %s6762_s14 = int_to_ptr.vmem [resolvable:$true] %s280_s14 }
  0x5e   : > { %s6437_s17 = scalar_lea.hbm %s6756_s10, 2048  ;;  %p6439_p9 = pneg %p6758_p11 }
  0x5f   : > { %p6438_p7 = scmp.ne.s32.totalorder %s6756_s10, %s6437_s17  ;;  %s6442_s23 = scalar_lea.hbm %s8181_s0, 4096 }
  0x60   : > { %p6443_p1 = scmp.lt.u32.totalorder %s6756_s10, %s8181_s0  ;;  %p6444_p2 = scmp.lt.u32.totalorder %s6442_s23, %s6437_s17 }
  0x61   : > { %p6440_p12 = pnand %p6439_p9, %p6438_p7  ;;  %p6446_p8 = scmp.lt.u32.totalorder %s6437_s17, %s6756_s10 }
  0x62   : > { %p6445_p4 = por %p6444_p2, %p6443_p1 }
  0x63   : > { %p6441_p0 = pneg %p6440_p12 }
  0x64   : > { %p6447_p13 = por %p6446_p8, %p6445_p4 }
  0x66   : > { %p6448_p6 = pnand %p6447_p13, %p6441_p0 }
  0x68   : > { %6451 = shalt.err (!%p6448_p6)
}
  0x69   : > { %s6452_s20 = scalar_lea.vmem %s6762_s14, 2048  ;;  %s6548_s21 = smov [#allocation3]  }
  0x6a   : > { %p6453_p10 = scmp.ne.s32.totalorder %s6762_s14, %s6452_s20  ;;  %s6457_s16 = sshll.u32 %s6548_s21, 4  ;;  %s6458_s16 = int_to_ptr.vmem [resolvable:$false] %s6457_s16 }
  0x6b   : > { %s6459_s29 = scalar_lea.vmem %s6458_s16, 4096  ;;  %p6460_p12 = scmp.lt.s32.totalorder %s6762_s14, %s6458_s16 }
  0x6c   : > { %p6455_p3 = pnand %p6453_p10, %p6439_p9  ;;  %p6461_p1 = scmp.lt.s32.totalorder %s6459_s29, %s6452_s20 }
  0x6e   : > { %p6456_p7 = pneg %p6455_p3  ;;  %p6462_p2 = por %p6461_p1, %p6460_p12 }
  0x70   : > { %p6463_p4 = pnand %p6462_p2, %p6456_p7 }
  0x72   : > { %6466 = shalt.err (!%p6463_p4)
}
  0x73   : > { %6031 = dma.hbm_to_vmem [thread:$0]  (!%p6758_p11), %s6756_s10, 2048, %s6762_s14, %s6764_s12, %s6546_s13, %s6546_s13, %s6547_s15  }
  0x74   : > { %p8202_p9 = scmp.ne.s32.totalorder %s8196_s9, 0 }
  0x75   : > { %s6798_s17 = sand.u32 (!%p8202_p9), 1, %s6533_s25   ;;  %p8203_p0 = scmp.ne.s32.totalorder (!%p8202_p9), %s8193_s30, 0 }
  0x76   : > { %292 = sbr.rel (%p8202_p9) target bundleno = 1182 (0x49e), region = 48  ;;  %s4916_s23 = sshll.u32 (!%p8202_p9), %s6798_s17, 7 }
  0x77   : > { %s295_s11 = scalar_lea.sflag (!%p8202_p9), [#allocation4], %s6798_s17  ;;  %s6802_s20 = scalar_lea.vmem (!%p8202_p9), [#allocation3], %s4916_s23 }
  0x7d   : > { %6512 = dma.done.wait (%p8203_p0), %s295_s11, 2048  }
  0x7e   : > { %6514 = vsyncadd (%p8203_p0), %s295_s11, 4294965248  ;;  %p8204_p11 = scmp.eq.s32.totalorder %s6614_s28, 0 }
  0x80   : > { %6516 = dma.done.wait (%p8204_p11), [#allocation7], 10240   ;;  %p8205_p8 = pmov %p8204_p11 }
  0x82   : > { %6518 = vsyncadd (%p8205_p8), [#allocation7], 4294957056  ;;  %p8206_p13 = pmov %p8205_p8 }
  0x83   : > { %p8207_p6 = pmov %p8205_p8 }
  0x84   : > { %6520 = dma.done.wait (%p8206_p13), [#allocation10], 1024  }
  0x85   : > { %6522 = vsyncadd (%p8207_p6), [#allocation10], 4294966272  ;;  %v6084_v0 = vld [vmem:[#allocation6] sm:$0xff]   ;;  %v6085_v1 = vld [vmem:[#allocation6 + $0x8] sm:$0xff]   ;;  %vm350_vm0 = vcmask 1040384   ;;  %v6549_v52 = vmov 0  }
  0x86   : > { %5842 = vmatprep.subr.bf16.mxu0 %v6084_v0  ;;  %5986 = vmatprep.subr.bf16.mxu1 %v6084_v0  ;;  %v6086_v2 = vld [vmem:[#allocation6 + $0x10] sm:$0xff]   ;;  %v6087_v3 = vld [vmem:[#allocation6 + $0x18] sm:$0xff]   ;;  %v6092_v4 = vld [vmem:[%s6802_s20] sm:$0xff]   ;;  %vm351_vm1 = vsmask.f32 256  ;;  %vm1969_vm6 = vcmask 1046528  }
  0x87   : > { %5843 = vmatpush3.bf16.msra.mxu0 %v6084_v0  ;;  %5994 = vmatpush3.bf16.msra.mxu1 %v6084_v0  ;;  %v6088_v5 = vld [vmem:[#allocation6 + $0x20] sm:$0xff]   ;;  %v6089_v6 = vld [vmem:[#allocation6 + $0x28] sm:$0xff]   ;;  %v6090_v8 = vld [vmem:[#allocation6 + $0x30] sm:$0xff]   ;;  %vm401_vm3 = vsmask.f32 7938  ;;  %vm1261_vm7 = vcmask 1043456  }
  0x88   : > { %5844 = vmatprep.subr.bf16.mxu0 %v6085_v1  ;;  %5987 = vmatprep.subr.bf16.mxu1 %v6085_v1  ;;  %v6100_v7 = vld [vmem:[%s6802_s20 + $0x40] sm:$0xff]   ;;  %v6091_v9 = vld [vmem:[#allocation6 + $0x38] sm:$0xff]   ;;  %vm6820_vm2 = vmand %vm350_vm0, %vm351_vm1  ;;  %342 = vst [vmem:[#allocation2] sm:$0xf] %v6549_v52  ;;  %vm1712_vm5 = vsmask.f32 7424 }
  0x89   : > { %5858 = vmatprep.mubr.bf16.mxu0 %v6092_v4  ;;  %5874 = vmatprep.mubr.bf16.mxu1 %v6100_v7  ;;  %v6108_v11 = vld [vmem:[#allocation8 + $0x40] sm:$0xff]   ;;  %v6093_v12 = vld [vmem:[%s6802_s20 + $0x8] sm:$0xff]   ;;  %v6094_v15 = vld [vmem:[%s6802_s20 + $0x10] sm:$0xff]   ;;  %343 = vst [vmem:[#allocation2 + $0x4] sm:$0xf] %v6549_v52  ;;  %s4920_s21 = sshll.u32 %s6798_s17, 8 }
  0x8a   : > { %v6101_v13 = vld [vmem:[%s6802_s20 + $0x48] sm:$0xff]   ;;  %v6111_v14 = vld [vmem:[#allocation8 + $0xc0] sm:$0xff]   ;;  %v6102_v16 = vld [vmem:[%s6802_s20 + $0x50] sm:$0xff]   ;;  %344 = vst [vmem:[#allocation2 + $0x8] sm:$0x1] %v6549_v52  ;;  %s8056_s16 = scalar_lea.vmem [#allocation11], %s4920_s21 }
  0x8b   : > { %5845 = vmatpush3.bf16.msra.mxu0 %v6085_v1  ;;  %5995 = vmatpush3.bf16.msra.mxu1 %v6085_v1  ;;  %v6109_v17 = vld [vmem:[#allocation8] sm:$0xff]   ;;  %v6110_v19 = vld [vmem:[#allocation8 + $0x48] sm:$0xff]   ;;  %v6095_v23 = vld [vmem:[%s6802_s20 + $0x18] sm:$0xff]   ;;  %346 = vst [vmem:[#allocation2 + $0xcc] sm:$0xf] %v6549_v52  ;;  %s5242_s29 = sshll.u32 %s6614_s28, 12 }
  0x8c   : > { %5846 = vmatprep.subr.bf16.mxu0 %v6086_v2  ;;  %5988 = vmatprep.subr.bf16.mxu1 %v6086_v2  ;;  %v356_v18 = vld [vmem:[#allocation2 + $0x18] sm:$0x1]  ;;  %v6112_v22 = vld [vmem:[#allocation8 + $0x8] sm:$0xff]   ;;  %v6103_v24 = vld [vmem:[%s6802_s20 + $0x58] sm:$0xff]   ;;  %347 = vst [vmem:[#allocation2 + $0xd0] sm:$0xf] %v6549_v52  ;;  %s8132_s30 = scalar_lea.hbm %s8188_s7, %s5242_s29 }
  0x8d   : > { %v6113_v20 = vld [vmem:[#allocation8 + $0x80] sm:$0xff]   ;;  %v357_v21 = vsel %vm6820_vm2, 0, %v356_v18  ;;  %v6097_v27 = vld [vmem:[%s6802_s20 + $0x28] sm:$0xff]   ;;  %v6098_v29 = vld [vmem:[%s6802_s20 + $0x30] sm:$0xff]   ;;  %348 = vst [vmem:[#allocation2 + $0xd4] sm:$0x1] %v6549_v52 }
  0x8e   : > { %358 = vst [vmem:[#allocation2 + $0x18] sm:$0x1] %v357_v21  ;;  %v6096_v25 = vld [vmem:[%s6802_s20 + $0x20] sm:$0xff]   ;;  %v6105_v28 = vld [vmem:[%s6802_s20 + $0x68] sm:$0xff]   ;;  %v6106_v30 = vld [vmem:[%s6802_s20 + $0x70] sm:$0xff]   ;;  %s4804_s23 = sshll.u32 %s8056_s16, 4  ;;  %s8134_s23 = int_to_ptr.vmem [resolvable:$true] %s4804_s23 }
  0x8f   : > { %5847 = vmatpush3.bf16.msra.mxu0 %v6086_v2  ;;  %5996 = vmatpush3.bf16.msra.mxu1 %v6086_v2  ;;  %v6104_v26 = vld [vmem:[%s6802_s20 + $0x60] sm:$0xff]   ;;  %v6099_v31 = vld [vmem:[%s6802_s20 + $0x38] sm:$0xff]   ;;  %v6114_v33 = vld [vmem:[#allocation8 + $0x50] sm:$0xff]   ;;  %vm939_vm8 = vsmask.f32 4368  ;;  %s4791_s28 = scalar_lea.sflag [#allocation5], %s6798_s17 }
  0x90   : > { %5848 = vmatprep.subr.bf16.mxu0 %v6087_v3  ;;  %5989 = vmatprep.subr.bf16.mxu1 %v6087_v3  ;;  %v6107_v32 = vld [vmem:[%s6802_s20 + $0x78] sm:$0xff]   ;;  %v6115_v34 = vld [vmem:[#allocation8 + $0xc8] sm:$0xff]   ;;  %v6116_v35 = vld [vmem:[#allocation8 + $0x10] sm:$0xff]   ;;  %s6467_s9 = scalar_lea.vmem %s8134_s23, 4096  ;;  %s6550_s13 = smov [#allocation11]  }
  0x91   : > { %v6117_v36 = vld [vmem:[#allocation8 + $0x88] sm:$0xff]   ;;  %v6118_v37 = vld [vmem:[#allocation8 + $0x58] sm:$0xff]   ;;  %v6119_v38 = vld [vmem:[#allocation8 + $0xd0] sm:$0xff]   ;;  %p6468_p10 = scmp.ne.s32.totalorder %s8134_s23, %s6467_s9  ;;  %s6471_s15 = sshll.u32 %s6550_s13, 4  ;;  %s6472_s15 = int_to_ptr.vmem [resolvable:$false] %s6471_s15 }
  0x92   : > { %vm6842_vm4 = vmand %vm350_vm0, %vm401_vm3  ;;  %v6120_v40 = vld [vmem:[#allocation8 + $0x18] sm:$0xff]   ;;  %v6121_v41 = vld [vmem:[#allocation8 + $0x90] sm:$0xff]   ;;  %s6473_s10 = scalar_lea.vmem %s6472_s15, 8192  ;;  %p6474_p12 = scmp.lt.s32.totalorder %s8134_s23, %s6472_s15 }
  0x93   : > { %5849 = vmatpush3.bf16.msra.mxu0 %v6087_v3  ;;  %5997 = vmatpush3.bf16.msra.mxu1 %v6087_v3  ;;  %v353_v42 = vld [vmem:[#allocation2 + $0xc] sm:$0x1]  ;;  %v406_v44 = vld [vmem:[#allocation2 + $0x20] sm:$0x1]  ;;  %v403_v46 = vld [vmem:[#allocation2 + $0x14] sm:$0x1]  ;;  %p6469_p3 = pnand %p6468_p10, %p6747_p5  ;;  %p6475_p1 = scmp.lt.s32.totalorder %s6473_s10, %s6467_s9 }
  0x94   : > { %5850 = vmatprep.subr.bf16.mxu0 %v6088_v5  ;;  %5990 = vmatprep.subr.bf16.mxu1 %v6088_v5  ;;  %v354_v43 = vsel %vm6820_vm2, 0, %v353_v42  ;;  %v407_v45 = vsel %vm6842_vm4, 0, %v406_v44  ;;  %v6122_v47 = vld [vmem:[#allocation8 + $0x60] sm:$0xff]   ;;  %v6123_v48 = vld [vmem:[#allocation8 + $0xd8] sm:$0xff]   ;;  %v404_v49 = vsel %vm6842_vm4, 0, %v403_v46  ;;  %v6126_v53 = vld [vmem:[#allocation8 + $0x68] sm:$0xff]  }
  0x95   : > { %355 = vst [vmem:[#allocation2 + $0xc] sm:$0x1] %v354_v43  ;;  %408 = vst [vmem:[#allocation2 + $0x20] sm:$0x1] %v407_v45  ;;  %v6124_v50 = vld [vmem:[#allocation8 + $0x20] sm:$0xff]   ;;  %v6125_v51 = vld [vmem:[#allocation8 + $0x98] sm:$0xff]   ;;  %p6470_p7 = pneg %p6469_p3  ;;  %p6476_p2 = por %p6475_p1, %p6474_p12 }
  0x96   : > { %405 = vst [vmem:[#allocation2 + $0x14] sm:$0x1] %v404_v49  ;;  %v362_v54 = vld [vmem:[#allocation2 + $0x30] sm:$0x1]  ;;  %v359_v55 = vld [vmem:[#allocation2 + $0x24] sm:$0x1]  ;;  %vm6941_vm9 = vmand %vm1261_vm7, %vm401_vm3 }
  0x97   : > { %5851 = vmatpush3.bf16.msra.mxu0 %v6088_v5  ;;  %5998 = vmatpush3.bf16.msra.mxu1 %v6088_v5  ;;  %v363_v56 = vsel %vm6820_vm2, 0, %v362_v54  ;;  %v360_v57 = vsel %vm6820_vm2, 0, %v359_v55  ;;  %v6127_v58 = vld [vmem:[#allocation8 + $0xe0] sm:$0xff]   ;;  %v6128_v59 = vld [vmem:[#allocation8 + $0x28] sm:$0xff]   ;;  %v6130_v0 = vld [vmem:[#allocation8 + $0x70] sm:$0xff]   ;;  %p6477_p4 = pnand %p6476_p2, %p6470_p7 }
  0x98   : > { %5852 = vmatprep.subr.bf16.mxu0 %v6089_v6  ;;  %5991 = vmatprep.subr.bf16.mxu1 %v6089_v6  ;;  %v6129_v60 = vld [vmem:[#allocation8 + $0xa0] sm:$0xff]   ;;  %364 = vst [vmem:[#allocation2 + $0x30] sm:$0x1] %v363_v56  ;;  %361 = vst [vmem:[#allocation2 + $0x24] sm:$0x1] %v360_v57  ;;  %v6131_v1 = vld [vmem:[#allocation8 + $0xe8] sm:$0xff]  }
  0x99   : > { %v1375_v61 = vld [vmem:[#allocation2] sm:$0xf]  ;;  %v1376_v62 = vld [vmem:[#allocation2 + $0x4] sm:$0xf]  ;;  %v412_v63 = vld [vmem:[#allocation2 + $0x38] sm:$0x1] }
  0x9a   : > { %v4978_v2 = vcombine.low %v1375_v61, %v1376_v62  ;;  %v413_v3 = vsel %vm6842_vm4, 0, %v412_v63  ;;  %v6132_v4 = vld [vmem:[#allocation8 + $0x30] sm:$0xff]   ;;  %v6133_v5 = vld [vmem:[#allocation8 + $0xa8] sm:$0xff]   ;;  %v380_v49 = vld [vmem:[#allocation2 + $0x78] sm:$0x1] }
  0x9b   : > { %5853 = vmatpush3.bf16.msra.mxu0 %v6089_v6  ;;  %5999 = vmatpush3.bf16.msra.mxu1 %v6089_v6  ;;  %414 = vst [vmem:[#allocation2 + $0x38] sm:$0x1] %v413_v3  ;;  %v6139_v6 = vld [vmem:[#allocation2 + $0x8] ss:$0 sps:$4 sm:$0x11]   ;;  %v6156_v43 = vld [vmem:[#allocation8 + $0x148] sm:$0xff]   ;;  %vm6952_vm10 = vmor %vm351_vm1, %vm939_vm8 }
  0x9c   : > { %5854 = vmatprep.subr.bf16.mxu0 %v6090_v8  ;;  %5992 = vmatprep.subr.bf16.mxu1 %v6090_v8  ;;  %v1716_v7 = vshll.u32 %v4978_v2, 16  ;;  %v1423_v21 = vld [vmem:[#allocation2] sm:$0xe]  ;;  %v424_v44 = vld [vmem:[#allocation2 + $0x68] sm:$0x1]  ;;  %v6180_v63 = vld [vmem:[#allocation8 + $0x158] sm:$0xff]  }
  0x9d   : > { %v6157_v45 = vld [vmem:[#allocation8 + $0x108] sm:$0xff]   ;;  %v425_v46 = vsel %vm6842_vm4, 0, %v424_v44  ;;  %v6169_v56 = vld [vmem:[#allocation8 + $0x110] sm:$0xff]   ;;  %v427_v57 = vld [vmem:[#allocation2 + $0x74] sm:$0x1] }
  0x9e   : > { %426 = vst [vmem:[#allocation2 + $0x68] sm:$0x1] %v425_v46  ;;  %v430_v54 = vld [vmem:[#allocation2 + $0x80] sm:$0x1]  ;;  %v383_v61 = vld [vmem:[#allocation2 + $0x84] sm:$0x1] }
  0x9f   : > { %5855 = vmatpush3.bf16.msra.mxu0 %v6090_v8  ;;  %6000 = vmatpush3.bf16.msra.mxu1 %v6090_v8  ;;  %v409_v8 = vld [vmem:[#allocation2 + $0x2c] sm:$0x1]  ;;  %v431_v55 = vsel %vm6842_vm4, 0, %v430_v54 }
  0xa0   : > { %5856 = vmatprep.subr.bf16.mxu0 %v6091_v9  ;;  %5993 = vmatprep.subr.bf16.mxu1 %v6091_v9  ;;  %432 = vst [vmem:[#allocation2 + $0x80] sm:$0x1] %v431_v55  ;;  %v433_v3 = vld [vmem:[#allocation2 + $0x8c] sm:$0x1] }
  0xa3   : > { %5857 = vmatpush3.bf16.msra.mxu0 %v6091_v9  ;;  %6001 = vmatpush3.bf16.msra.mxu1 %v6091_v9  ;;  %v6134_v9 = vld [vmem:[#allocation8 + $0x78] sm:$0xff]  }
  0xa4   : > { %5346 = vmatprep.subr.bf16.mxu1 %v6108_v11  ;;  %5458 = vmatprep.subr.bf16.mxu0 %v6111_v14  ;;  %v6135_v11 = vld [vmem:[#allocation8 + $0xf0] sm:$0xff]   ;;  %v410_v14 = vsel %vm6842_vm4, 0, %v409_v8  ;;  %v389_v8 = vld [vmem:[#allocation2 + $0x9c] sm:$0x1] }
  0xa5   : > { %411 = vst [vmem:[#allocation2 + $0x2c] sm:$0x1] %v410_v14  ;;  %v6195_v14 = vld [vmem:[#allocation8 + $0x120] sm:$0xff]  }
  0xa6   : > { %5859 = vmatmul.mubr.bf16.vlgmr.msra.gmra.mrb[0].mxu0 %v6093_v12  ;;  %5875 = vmatmul.mubr.bf16.vlgmr.msra.gmra.mrb[0].mxu1 %v6101_v13  ;;  %v1714_v12 = vshrl.u32 %v4978_v2, 16  ;;  %v1718_v13 = vrot.slane %v1716_v7, 1 }
  0xa7   : > { %5862 = vmatprep.mubr.bf16.mxu0 %v6094_v15  ;;  %5878 = vmatprep.mubr.bf16.mxu1 %v6102_v16  ;;  %v6136_v15 = vld [vmem:[#allocation8 + $0x38] sm:$0xff]   ;;  %v6137_v16 = vld [vmem:[#allocation8 + $0xb0] sm:$0xff]  }
  0xa8   : > { %5347 = vmatpush3.bf16.msra.mxu1 %v6109_v17  ;;  %5459 = vmatpush3.bf16.msra.mxu0 %v6113_v20  ;;  %v1721_v17 = vshll.u32 %v6139_v6, 16  ;;  %v1719_v18 = vor.u32 %v1718_v13, %v1714_v12  ;;  %v6140_v20 = vld [vmem:[#allocation8 + $0xf8] sm:$0xff]   ;;  %v390_v12 = vsel %vm6820_vm2, 0, %v389_v8 }
  0xa9   : > { %5348 = vmatprep.subr.bf16.mxu1 %v6110_v19  ;;  %5460 = vmatprep.subr.bf16.mxu0 %v6115_v34  ;;  %391 = vst [vmem:[#allocation2 + $0x9c] sm:$0x1] %v390_v12 }
  0xaa   : > { %v1723_v19 = vrot.slane %v1721_v17, 1  ;;  %v398_v17 = vld [vmem:[#allocation2 + $0xc0] sm:$0x1] }
  0xac   : > { %5349 = vmatpush3.bf16.msra.mxu1 %v6112_v22  ;;  %5461 = vmatpush3.bf16.msra.mxu0 %v6117_v36  ;;  %v1724_v22 = vsel %vm1712_vm5, %v1719_v18, %v1723_v19  ;;  %v6145_v36 = vld [vmem:[#allocation8 + $0x100] sm:$0xff]   ;;  %v399_v18 = vsel %vm6820_vm2, 0, %v398_v17  ;;  %v395_v19 = vld [vmem:[#allocation2 + $0xb4] sm:$0x1] }
  0xad   : > { %5350 = vmatprep.subr.bf16.mxu1 %v6114_v33  ;;  %5462 = vmatprep.subr.bf16.mxu0 %v6119_v38  ;;  %v418_v33 = vld [vmem:[#allocation2 + $0x50] sm:$0x1]  ;;  %v374_v38 = vld [vmem:[#allocation2 + $0x60] sm:$0x1]  ;;  %400 = vst [vmem:[#allocation2 + $0xc0] sm:$0x1] %v399_v18 }
  0xae   : > { %5863 = vmatmul.mubr.bf16.gmra.mrb[4].mxu0 %v6095_v23  ;;  %5879 = vmatmul.mubr.bf16.gmra.mrb[4].mxu1 %v6103_v24  ;;  %v6141_v23 = vld [vmem:[#allocation8 + $0xb8] sm:$0xff]   ;;  %v5010_v24 = vcombine.low %v1423_v21, %v1376_v62  ;;  %v419_v34 = vsel %vm6842_vm4, 0, %v418_v33  ;;  %v384_v62 = vsel %vm6820_vm2, 0, %v383_v61  ;;  %v6208_v21 = vld [vmem:[#allocation8 + $0x168] sm:$0xff]  }
  0xaf   : > { %5866 = vmatprep.mubr.bf16.mxu0 %v6096_v25  ;;  %5882 = vmatprep.mubr.bf16.mxu1 %v6104_v26  ;;  %v1971_v26 = vrot.slane %v6139_v6, 1  ;;  %420 = vst [vmem:[#allocation2 + $0x50] sm:$0x1] %v419_v34  ;;  %385 = vst [vmem:[#allocation2 + $0x84] sm:$0x1] %v384_v62  ;;  %v6222_v34 = vld [vmem:[#allocation8 + $0x170] sm:$0xff]  }
  0xb0   : > { %5351 = vmatpush3.bf16.msra.mxu1 %v6116_v35  ;;  %5463 = vmatpush3.bf16.msra.mxu0 %v6121_v41  ;;  %v1970_v25 = vrot.slane %v5010_v24, 1  ;;  %v415_v35 = vld [vmem:[#allocation2 + $0x44] sm:$0x1]  ;;  %v371_v41 = vld [vmem:[#allocation2 + $0x54] sm:$0x1] }
  0xb1   : > { %5352 = vmatprep.subr.bf16.mxu1 %v6118_v37  ;;  %5464 = vmatprep.subr.bf16.mxu0 %v6123_v48  ;;  %v416_v37 = vsel %vm6842_vm4, 0, %v415_v35  ;;  %v372_v42 = vsel %vm6820_vm2, 0, %v371_v41  ;;  %v392_v6 = vld [vmem:[#allocation2 + $0xa8] sm:$0x1] }
  0xb2   : > { %417 = vst [vmem:[#allocation2 + $0x44] sm:$0x1] %v416_v37  ;;  %373 = vst [vmem:[#allocation2 + $0x54] sm:$0x1] %v372_v42  ;;  %v393_v7 = vsel %vm6820_vm2, 0, %v392_v6 }
  0xb3   : > { %394 = vst [vmem:[#allocation2 + $0xa8] sm:$0x1] %v393_v7 }
  0xb4   : > { %5353 = vmatpush3.bf16.msra.mxu1 %v6120_v40  ;;  %5465 = vmatpush3.bf16.msra.mxu0 %v6125_v51  ;;  %v375_v40 = vsel %vm6820_vm2, 0, %v374_v38  ;;  %v381_v51 = vsel %vm6820_vm2, 0, %v380_v49  ;;  %v6223_v38 = vld [vmem:[#allocation8 + $0x130] sm:$0xff]  }
  0xb5   : > { %5354 = vmatprep.subr.bf16.mxu1 %v6122_v47  ;;  %5466 = vmatprep.subr.bf16.mxu0 %v6127_v58  ;;  %376 = vst [vmem:[#allocation2 + $0x60] sm:$0x1] %v375_v40  ;;  %v421_v47 = vld [vmem:[#allocation2 + $0x5c] sm:$0x1]  ;;  %382 = vst [vmem:[#allocation2 + $0x78] sm:$0x1] %v381_v51 }
  0xb6   : > { %5867 = vmatmul.mubr.bf16.gmra.mrb[8].mxu0 %v6097_v27  ;;  %5883 = vmatmul.mubr.bf16.gmra.mrb[8].mxu1 %v6105_v28  ;;  %v368_v27 = vld [vmem:[#allocation2 + $0x48] sm:$0x1]  ;;  %v422_v48 = vsel %vm6842_vm4, 0, %v421_v47  ;;  %v428_v58 = vsel %vm6842_vm4, 0, %v427_v57  ;;  %v1270_v57 = vld [vmem:[#allocation2 + $0x18] sm:$0xf] }
  0xb7   : > { %5870 = vmatprep.mubr.bf16.mxu0 %v6098_v29  ;;  %5886 = vmatprep.mubr.bf16.mxu1 %v6106_v30  ;;  %v369_v28 = vsel %vm6820_vm2, 0, %v368_v27  ;;  %v365_v29 = vld [vmem:[#allocation2 + $0x3c] sm:$0x1]  ;;  %423 = vst [vmem:[#allocation2 + $0x5c] sm:$0x1] %v422_v48 }
  0xb8   : > { %5355 = vmatpush3.bf16.msra.mxu1 %v6124_v50  ;;  %5467 = vmatpush3.bf16.msra.mxu0 %v6129_v60  ;;  %v6142_v30 = vld [vmem:[#allocation8 + $0x140] sm:$0xff]   ;;  %370 = vst [vmem:[#allocation2 + $0x48] sm:$0x1] %v369_v28  ;;  %v377_v50 = vld [vmem:[#allocation2 + $0x6c] sm:$0x1] }
  0xb9   : > { %5356 = vmatprep.subr.bf16.mxu1 %v6126_v53  ;;  %5468 = vmatprep.subr.bf16.mxu0 %v6131_v1  ;;  %v378_v52 = vsel %vm6820_vm2, 0, %v377_v50  ;;  %v6168_v53 = vld [vmem:[#allocation8 + $0x150] sm:$0xff]   ;;  %429 = vst [vmem:[#allocation2 + $0x74] sm:$0x1] %v428_v58  ;;  %v6181_v1 = vld [vmem:[#allocation8 + $0x118] sm:$0xff]  }
  0xba   : > { %379 = vst [vmem:[#allocation2 + $0x6c] sm:$0x1] %v378_v52  ;;  %v6915_v27 = vld [vmem:[%s8183_s2] ss:$0 sm:$0xff] }
  0xbc   : > { %5357 = vmatpush3.bf16.msra.mxu1 %v6128_v59  ;;  %5469 = vmatpush3.bf16.msra.mxu0 %v6133_v5  ;;  %v386_v59 = vld [vmem:[#allocation2 + $0x90] sm:$0x1]  ;;  %v6192_v5 = vld [vmem:[#allocation8 + $0x1c0] sm:$0xff]  }
  0xbd   : > { %5358 = vmatprep.subr.bf16.mxu1 %v6130_v0  ;;  %5470 = vmatprep.subr.bf16.mxu0 %v6135_v11  ;;  %v387_v60 = vsel %vm6820_vm2, 0, %v386_v59  ;;  %v436_v0 = vld [vmem:[#allocation2 + $0x98] sm:$0x1]  ;;  %v442_v11 = vld [vmem:[#allocation2 + $0xb0] sm:$0x1] }
  0xbe   : > { %5871 = vmatmul.mubr.bf16.gmra.mrb[12].mxu0 %v6099_v31  ;;  %5887 = vmatmul.mubr.bf16.gmra.mrb[12].mxu1 %v6107_v32  ;;  %v6864_v31 = vsel %vm1969_vm6, %v1970_v25, %v1971_v26  ;;  %v366_v32 = vsel %vm6820_vm2, 0, %v365_v29  ;;  %388 = vst [vmem:[#allocation2 + $0x90] sm:$0x1] %v387_v60  ;;  %v443_v13 = vsel %vm6842_vm4, 0, %v442_v11  ;;  %v445_v25 = vld [vmem:[#allocation2 + $0xbc] sm:$0x1] }
  0xbf   : > { %3577 = vmatprep.mubr.bf16.mxu1 %v1724_v22  ;;  %367 = vst [vmem:[#allocation2 + $0x3c] sm:$0x1] %v366_v32  ;;  %444 = vst [vmem:[#allocation2 + $0xb0] sm:$0x1] %v443_v13  ;;  %v448_v22 = vld [vmem:[#allocation2 + $0xc8] sm:$0x1] }
  0xc0   : > { %5359 = vmatpush3.bf16.msra.mxu1 %v6132_v4  ;;  %5471 = vmatpush3.bf16.msra.mxu0 %v6137_v16  ;;  %v434_v4 = vsel %vm6842_vm4, 0, %v433_v3  ;;  %v449_v24 = vsel %vm6842_vm4, 0, %v448_v22  ;;  %v446_v26 = vsel %vm6842_vm4, 0, %v445_v25 }
  0xc1   : > { %5360 = vmatprep.subr.bf16.mxu1 %v6134_v9  ;;  %5472 = vmatprep.subr.bf16.mxu0 %v6140_v20  ;;  %435 = vst [vmem:[#allocation2 + $0x8c] sm:$0x1] %v434_v4  ;;  %v6194_v9 = vld [vmem:[#allocation8 + $0x160] sm:$0xff]   ;;  %v396_v20 = vsel %vm6820_vm2, 0, %v395_v19  ;;  %450 = vst [vmem:[#allocation2 + $0xc8] sm:$0x1] %v449_v24 }
  0xc2   : > { %397 = vst [vmem:[#allocation2 + $0xb4] sm:$0x1] %v396_v20  ;;  %447 = vst [vmem:[#allocation2 + $0xbc] sm:$0x1] %v446_v26 }
  0xc4   : > { %5361 = vmatpush3.bf16.msra.mxu1 %v6136_v15  ;;  %5473 = vmatpush3.bf16.msra.mxu0 %v6141_v23  ;;  %v439_v15 = vld [vmem:[#allocation2 + $0xa4] sm:$0x1] }
  0xc5   : > { %5570 = vmatprep.subr.bf16.mxu1 %v6142_v30  ;;  %5682 = vmatprep.subr.bf16.mxu0 %v6192_v5  ;;  %v440_v16 = vsel %vm6842_vm4, 0, %v439_v15  ;;  %v6209_v23 = vld [vmem:[#allocation8 + $0x128] sm:$0xff]  }
  0xc6   : > { %441 = vst [vmem:[#allocation2 + $0xa4] sm:$0x1] %v440_v16 }
  0xc7   : > { %3578 = vmatmul.mubr.bf16.vlgmr.msra.gmra.mrb[16].mxu1 %v4978_v2  ;;  %v437_v2 = vsel %vm6842_vm4, 0, %v436_v0  ;;  %v1263_v0 = vld [vmem:[#allocation2 + $0xc] sm:$0xf] }
  0xc8   : > { %5571 = vmatpush3.bf16.msra.mxu1 %v6145_v36  ;;  %438 = vst [vmem:[#allocation2 + $0x98] sm:$0x1] %v437_v2 }
  0xc9   : > { %5572 = vmatprep.subr.bf16.mxu1 %v6156_v43 }
  0xcc   : > { %5573 = vmatpush3.bf16.msra.mxu1 %v6157_v45 }
  0xcd   : > { %5574 = vmatprep.subr.bf16.mxu1 %v6168_v53 }
  0xd0   : > { %5575 = vmatpush3.bf16.msra.mxu1 %v6169_v56 }
  0xd1   : > { %5576 = vmatprep.subr.bf16.mxu1 %v6180_v63 }
  0xd4   : > { %5577 = vmatpush3.bf16.msra.mxu1 %v6181_v1 }
  0xd5   : > { %5578 = vmatprep.subr.bf16.mxu1 %v6194_v9 }
  0xd8   : > { %5579 = vmatpush3.bf16.msra.mxu1 %v6195_v14 }
  0xd9   : > { %5580 = vmatprep.subr.bf16.mxu1 %v6208_v21 }
  0xdc   : > { %5581 = vmatpush3.bf16.msra.mxu1 %v6209_v23  ;;  %v1274_v23 = vld [vmem:[#allocation2 + $0x20] sm:$0x1] }
  0xdd   : > { %5582 = vmatprep.subr.bf16.mxu1 %v6222_v34 }
  0xe0   : > { %5583 = vmatpush3.bf16.msra.mxu1 %v6223_v38 }
 0x179   : > { %v5860_v28 = vpop.f32.mrb[0].mxu0  ;;  %v5876_v29 = vpop.f32.mrb[0].mxu1 }
 0x17a   : > { %v693_v30 = vadd.f32 %v5860_v28, %v6915_v27  ;;  %v684_v32 = vpop.f32.mrb[1].mxu0  ;;  %v748_v33 = vpop.f32.mrb[1].mxu1  ;;  %v6920_v39 = vadd.f32 %v5876_v29, %v6915_v27 }
 0x17b   : > { %v685_v35 = vadd.f32 %v6915_v27, %v684_v32  ;;  %v5861_v36 = vpop.f32.mrb[2].mxu0  ;;  %v5877_v37 = vpop.f32.mrb[2].mxu1  ;;  %v6924_v43 = vadd.f32 %v6915_v27, %v748_v33 }
 0x17c   : > { %v813_v40 = vmax.f32 %v693_v30, 0.0  ;;  %v696_v41 = vadd.f32 %v5861_v36, %v6915_v27  ;;  %v687_v42 = vpop.f32.mrb[3].mxu0  ;;  %v6926_v44 = vpop.f32.mrb[3].mxu1  ;;  %v829_v51 = vmax.f32 %v6920_v39, 0.0  ;;  %v6932_v55 = vadd.f32 %v5877_v37, %v6915_v27  ;;  %v1267_v30 = vld [vmem:[#allocation2 + $0x14] sm:$0x1] }
 0x17d   : > { %v811_v45 = vmax.f32 %v685_v35, 0.0  ;;  %v688_v46 = vadd.f32 %v6915_v27, %v687_v42  ;;  %v827_v54 = vmax.f32 %v6924_v43, 0.0 }
 0x17e   : > { %v5212_v47 = vpack.c.bf16 %v813_v40, %v813_v40  ;;  %v814_v48 = vmax.f32 %v696_v41, 0.0 }
 0x17f   : > { %v5210_v49 = vpack.c.bf16 %v811_v45, %v811_v45  ;;  %v812_v50 = vmax.f32 %v688_v46, 0.0  ;;  %v1284_v46 = vld [vmem:[#allocation2 + $0x30] sm:$0xf] }
 0x180   : > { %v959_v52 = vshrl.u32 %v5212_v47, 16  ;;  %v5213_v53 = vpack.c.bf16 %v814_v48, %v814_v48  ;;  %v962_v56 = vshll.u32 %v5212_v47, 16 }
 0x181   : > { %v942_v58 = vshrl.u32 %v5210_v49, 16  ;;  %v945_v59 = vshll.u32 %v5210_v49, 16  ;;  %v5211_v60 = vpack.c.bf16 %v812_v50, %v812_v50  ;;  %v5864_v61 = vpop.f32.mrb[4].mxu0  ;;  %v6934_v62 = vpop.f32.mrb[4].mxu1 }
 0x182   : > { %v961_v63 = vrot.slane %v959_v52, 7  ;;  %v967_v1 = vshrl.u32 %v5213_v53, 16  ;;  %v970_v2 = vshll.u32 %v5213_v53, 16  ;;  %v709_v3 = vadd.f32 %v5864_v61, %v6915_v27  ;;  %v700_v4 = vpop.f32.mrb[5].mxu0  ;;  %v6937_v5 = vpop.f32.mrb[5].mxu1  ;;  %v6236_v61 = vld [vmem:[#allocation8 + $0x178] sm:$0xff]  }
 0x183   : > { %v944_v7 = vrot.slane %v942_v58, 7  ;;  %v950_v8 = vshrl.u32 %v5211_v60, 16  ;;  %v953_v9 = vshll.u32 %v5211_v60, 16  ;;  %v701_v11 = vadd.f32 %v6915_v27, %v700_v4  ;;  %v5865_v12 = vpop.f32.mrb[6].mxu0  ;;  %v6946_v13 = vpop.f32.mrb[6].mxu1  ;;  %5584 = vmatprep.subr.bf16.mxu1 %v6236_v61 }
 0x184   : > { %v964_v14 = vor.u32 %v962_v56, %v961_v63  ;;  %v965_v15 = vrot.slane %v961_v63, 4  ;;  %v969_v16 = vrot.slane %v967_v1, 7  ;;  %v817_v17 = vmax.f32 %v709_v3, 0.0  ;;  %v703_v18 = vpop.f32.mrb[7].mxu0  ;;  %v6948_v19 = vpop.f32.mrb[7].mxu1 }
 0x185   : > { %v947_v20 = vor.u32 %v945_v59, %v944_v7  ;;  %v948_v21 = vrot.slane %v944_v7, 4  ;;  %v952_v24 = vrot.slane %v950_v8, 7  ;;  %v815_v25 = vmax.f32 %v701_v11, 0.0  ;;  %v1277_v53 = vld [vmem:[#allocation2 + $0x24] sm:$0xf]  ;;  %v6237_v7 = vld [vmem:[#allocation8 + $0x138] sm:$0xff]  }
 0x186   : > { %v1271_v26 = vsel %vm6941_vm9, %v964_v14, %v1270_v57  ;;  %v972_v28 = vor.u32 %v970_v2, %v969_v16  ;;  %v974_v29 = vrot.slane %v969_v16, 4  ;;  %v5216_v32 = vpack.c.bf16 %v817_v17, %v817_v17  ;;  %5585 = vmatpush3.bf16.msra.mxu1 %v6237_v7 }
 0x187   : > { %1272 = vst [vmem:[#allocation2 + $0x18] sm:$0xf] %v1271_v26  ;;  %v1264_v33 = vsel %vm6941_vm9, %v947_v20, %v1263_v0  ;;  %v955_v34 = vor.u32 %v953_v9, %v952_v24  ;;  %v957_v35 = vrot.slane %v952_v24, 4  ;;  %v5214_v36 = vpack.c.bf16 %v815_v25, %v815_v25 }
 0x188   : > { %1265 = vst [vmem:[#allocation2 + $0xc] sm:$0xf] %v1264_v33  ;;  %v973_v37 = vsel %vm6952_vm10, %v965_v15, %v972_v28  ;;  %v1275_v38 = vsel %vm6820_vm2, %v974_v29, %v1274_v23  ;;  %v993_v40 = vshrl.u32 %v5216_v32, 16  ;;  %v996_v41 = vshll.u32 %v5216_v32, 16 }
 0x189   : > { %1273 = vst [vmem:[#allocation2 + $0x1c] sm:$0xf] %v973_v37  ;;  %1276 = vst [vmem:[#allocation2 + $0x20] sm:$0x1] %v1275_v38  ;;  %v956_v42 = vsel %vm6952_vm10, %v948_v21, %v955_v34  ;;  %v1268_v45 = vsel %vm6820_vm2, %v957_v35, %v1267_v30  ;;  %v976_v47 = vshrl.u32 %v5214_v36, 16  ;;  %v979_v48 = vshll.u32 %v5214_v36, 16 }
 0x18a   : > { %v5868_v49 = vpop.f32.mrb[8].mxu0  ;;  %v6968_v50 = vpop.f32.mrb[8].mxu1  ;;  %1266 = vst [vmem:[#allocation2 + $0x10] sm:$0xf] %v956_v42  ;;  %1269 = vst [vmem:[#allocation2 + $0x14] sm:$0x1] %v1268_v45  ;;  %v712_v56 = vadd.f32 %v5865_v12, %v6915_v27  ;;  %v704_v57 = vadd.f32 %v6915_v27, %v703_v18  ;;  %v6983_v2 = vpack.c.bf16 %v829_v51, %v829_v51 }
 0x18b   : > { %v6970_v52 = vrot.slane %v993_v40, 7  ;;  %v725_v58 = vadd.f32 %v5868_v49, %v6915_v27  ;;  %v716_v59 = vpop.f32.mrb[9].mxu0  ;;  %v6975_v60 = vpop.f32.mrb[9].mxu1  ;;  %v6977_v63 = vrot.slane %v976_v47, 7  ;;  %v1288_v35 = vld [vmem:[#allocation2 + $0x38] sm:$0x1] }
 0x18c   : > { %v717_v0 = vadd.f32 %v6915_v27, %v716_v59  ;;  %v5869_v1 = vpop.f32.mrb[10].mxu0  ;;  %v6986_v4 = vpop.f32.mrb[10].mxu1  ;;  %v818_v11 = vmax.f32 %v712_v56, 0.0  ;;  %v816_v12 = vmax.f32 %v704_v57, 0.0  ;;  %v1281_v36 = vld [vmem:[#allocation2 + $0x2c] sm:$0x1] }
 0x18d   : > { %v998_v8 = vor.u32 %v996_v41, %v6970_v52  ;;  %v999_v9 = vrot.slane %v6970_v52, 4  ;;  %v719_v14 = vpop.f32.mrb[11].mxu0  ;;  %v6990_v15 = vpop.f32.mrb[11].mxu1  ;;  %v981_v39 = vor.u32 %v979_v48, %v6977_v63  ;;  %v982_v51 = vrot.slane %v6977_v63, 4  ;;  %v1298_v47 = vld [vmem:[#allocation2 + $0x48] sm:$0xf] }
 0x18e   : > { %v821_v16 = vmax.f32 %v725_v58, 0.0  ;;  %v819_v17 = vmax.f32 %v717_v0, 0.0  ;;  %v5217_v20 = vpack.c.bf16 %v818_v11, %v818_v11  ;;  %v5215_v21 = vpack.c.bf16 %v816_v12, %v816_v12  ;;  %v1291_v48 = vld [vmem:[#allocation2 + $0x3c] sm:$0xf]  ;;  %v6206_v57 = vld [vmem:[#allocation8 + $0x1c8] sm:$0xff]  }
 0x18f   : > { %v1285_v18 = vsel %vm6941_vm9, %v998_v8, %v1284_v46  ;;  %v728_v23 = vadd.f32 %v5869_v1, %v6915_v27  ;;  %v1278_v24 = vsel %vm6941_vm9, %v981_v39, %v1277_v53  ;;  %v720_v28 = vadd.f32 %v6915_v27, %v719_v14  ;;  %v1439_v34 = vld [vmem:[#allocation2 + $0xc] sm:$0xf]  ;;  %v6193_v56 = vld [vmem:[#allocation8 + $0x180] sm:$0xff]  }
 0x190   : > { %1286 = vst [vmem:[#allocation2 + $0x30] sm:$0xf] %v1285_v18  ;;  %v5220_v25 = vpack.c.bf16 %v821_v16, %v821_v16  ;;  %v5218_v26 = vpack.c.bf16 %v819_v17, %v819_v17  ;;  %1279 = vst [vmem:[#allocation2 + $0x24] sm:$0xf] %v1278_v24  ;;  %v1001_v29 = vshrl.u32 %v5217_v20, 16  ;;  %v1004_v30 = vshll.u32 %v5217_v20, 16 }
 0x191   : > { %v984_v32 = vshrl.u32 %v5215_v21, 16  ;;  %v987_v33 = vshll.u32 %v5215_v21, 16  ;;  %v1440_v42 = vld [vmem:[#allocation2 + $0x10] sm:$0xf]  ;;  %v822_v49 = vmax.f32 %v728_v23, 0.0  ;;  %v7002_v53 = vpop.f32.mrb[12].mxu0 }
 0x192   : > { %v1027_v37 = vshrl.u32 %v5220_v25, 16  ;;  %v1030_v38 = vshll.u32 %v5220_v25, 16  ;;  %v1010_v40 = vshrl.u32 %v5218_v26, 16  ;;  %v1013_v41 = vshll.u32 %v5218_v26, 16  ;;  %v7008_v63 = vpop.f32.mrb[13].mxu0 }
 0x193   : > { %v1003_v45 = vrot.slane %v1001_v29, 7  ;;  %v986_v46 = vrot.slane %v984_v32, 7  ;;  %v7000_v52 = vcombine.low %v1439_v34, %v1440_v42  ;;  %v820_v61 = vmax.f32 %v720_v28, 0.0  ;;  %v1442_v11 = vld [vmem:[#allocation2 + $0x1c] sm:$0xf]  ;;  %v7011_v12 = vpop.f32.mrb[14].mxu0 }
 0x194   : > { %v7004_v58 = vrot.slane %v1027_v37, 7  ;;  %v7006_v59 = vrot.slane %v1010_v40, 7  ;;  %v7016_v16 = vld [vmem:[#allocation2 + $0x14] ss:$0 sps:$4 sm:$0x11]   ;;  %v1095_v17 = vshrl.u32 %v6983_v2, 16  ;;  %v7045_v37 = vpack.c.bf16 %v827_v54, %v827_v54 }
 0x195   : > { %v1006_v0 = vor.u32 %v1004_v30, %v1003_v45  ;;  %v1008_v1 = vrot.slane %v1003_v45, 4  ;;  %v989_v7 = vor.u32 %v987_v33, %v986_v46  ;;  %v991_v8 = vrot.slane %v986_v46, 4  ;;  %3738 = vmatprep.mubr.bf16.mxu0 %v7000_v52  ;;  %v7027_v24 = vld [vmem:[#allocation2 + $0x10] sm:$0xf]  ;;  %v7029_v25 = vpop.f32.mrb[15].mxu0  ;;  %v7036_v30 = vpop.f32.mrb[12].mxu1 }
 0x196   : > { %v1032_v14 = vor.u32 %v1030_v38, %v7004_v58  ;;  %v1015_v39 = vor.u32 %v1013_v41, %v7006_v59  ;;  %3739 = vmatmul.mubr.bf16.vlgmr.msra.gmra.mrb[16].mxu0 %v6864_v31  ;;  %v6207_v31 = vld [vmem:[#allocation8 + $0x188] sm:$0xff]   ;;  %v1441_v28 = vld [vmem:[#allocation2 + $0x18] sm:$0xf]  ;;  %v1098_v29 = vshll.u32 %v6983_v2, 16  ;;  %v6220_v32 = vld [vmem:[#allocation8 + $0x1d0] sm:$0xff]   ;;  %v5219_v33 = vpack.c.bf16 %v820_v61, %v820_v61  ;;  %v7051_v40 = vpop.f32.mrb[13].mxu1 }
 0x197   : > { %v1007_v18 = vsel %vm6952_vm10, %v999_v9, %v1006_v0  ;;  %v1289_v20 = vsel %vm6820_vm2, %v1008_v1, %v1288_v35  ;;  %v990_v21 = vsel %vm6952_vm10, %v982_v51, %v989_v7  ;;  %v1282_v23 = vsel %vm6820_vm2, %v991_v8, %v1281_v36  ;;  %5683 = vmatpush3.bf16.msra.mxu0 %v6193_v56  ;;  %v1377_v35 = vld [vmem:[#allocation2 + $0xc] sm:$0xf]  ;;  %v7040_v36 = vld [vmem:[#allocation2 + $0x20] ss:$0 sps:$4 sm:$0x11]   ;;  %v7059_v43 = vpop.f32.mrb[14].mxu1 }
 0x198   : > { %1287 = vst [vmem:[#allocation2 + $0x34] sm:$0xf] %v1007_v18  ;;  %1290 = vst [vmem:[#allocation2 + $0x38] sm:$0x1] %v1289_v20  ;;  %v1299_v9 = vsel %vm6941_vm9, %v1032_v14, %v1298_v47  ;;  %v1292_v26 = vsel %vm6941_vm9, %v1015_v39, %v1291_v48  ;;  %v5221_v51 = vpack.c.bf16 %v822_v49, %v822_v49  ;;  %5684 = vmatprep.subr.bf16.mxu0 %v6206_v57  ;;  %v6221_v41 = vld [vmem:[#allocation8 + $0x190] sm:$0xff]   ;;  %v6234_v54 = vld [vmem:[#allocation8 + $0x1d8] sm:$0xff]  }
 0x199   : > { %1280 = vst [vmem:[#allocation2 + $0x28] sm:$0xf] %v990_v21  ;;  %1283 = vst [vmem:[#allocation2 + $0x2c] sm:$0x1] %v1282_v23  ;;  %v7038_v34 = vcombine.low %v1441_v28, %v1442_v11  ;;  %v7049_v38 = vadd.f32 %v6915_v27, %v6926_v44  ;;  %v7054_v46 = vcombine.low %v1377_v35, %v7027_v24  ;;  %v1733_v47 = vshll.u32 %v7016_v16, 16 }
 0x19a   : > { %1300 = vst [vmem:[#allocation2 + $0x48] sm:$0xf] %v1299_v9  ;;  %1293 = vst [vmem:[#allocation2 + $0x3c] sm:$0xf] %v1292_v26  ;;  %v1035_v42 = vshrl.u32 %v5221_v51, 16  ;;  %v1038_v45 = vshll.u32 %v5221_v51, 16 }
 0x19b   : > { %v7057_v48 = vld [vmem:[#allocation2 + $0x1c] sm:$0xf]  ;;  %v1033_v49 = vrot.slane %v7004_v58, 4  ;;  %v1018_v56 = vshrl.u32 %v5219_v33, 16  ;;  %v1021_v44 = vshll.u32 %v5219_v33, 16  ;;  %3746 = vmatprep.mubr.bf16.mxu0 %v7038_v34  ;;  %v7063_v61 = vrot.slane %v1095_v17, 7  ;;  %5685 = vmatpush3.bf16.msra.mxu0 %v6207_v31 }
 0x19c   : > { %v1379_v57 = vld [vmem:[#allocation2 + $0x18] sm:$0xf]  ;;  %v1016_v0 = vrot.slane %v7006_v59, 4  ;;  %v1037_v1 = vrot.slane %v1035_v42, 7  ;;  %v1726_v7 = vshrl.u32 %v7054_v46, 16  ;;  %v1728_v8 = vshll.u32 %v7054_v46, 16  ;;  %5686 = vmatprep.subr.bf16.mxu0 %v6220_v32 }
 0x19d   : > { %v1424_v11 = vld [vmem:[#allocation2 + $0xc] sm:$0xe]  ;;  %v1302_v14 = vld [vmem:[#allocation2 + $0x50] sm:$0x1]  ;;  %v1020_v39 = vrot.slane %v1018_v56, 7  ;;  %v1735_v18 = vrot.slane %v1733_v47, 1  ;;  %v7069_v20 = vcombine.low %v1379_v57, %v7057_v48 }
 0x19e   : > { %v1295_v58 = vld [vmem:[#allocation2 + $0x44] sm:$0x1]  ;;  %v5011_v17 = vcombine.low %v1424_v11, %v7027_v24  ;;  %v1040_v21 = vor.u32 %v1038_v45, %v1037_v1  ;;  %v1042_v23 = vrot.slane %v1037_v1, 4  ;;  %v1730_v31 = vrot.slane %v1728_v8, 1  ;;  %v7073_v26 = vpop.f32.mrb[15].mxu1  ;;  %v6235_v8 = vld [vmem:[#allocation8 + $0x198] sm:$0xff]  }
 0x19f   : > { %v1745_v59 = vshll.u32 %v7040_v36, 16  ;;  %v1443_v9 = vld [vmem:[#allocation2 + $0x24] sm:$0xf]  ;;  %v1023_v51 = vor.u32 %v1021_v44, %v1020_v39  ;;  %v1025_v28 = vrot.slane %v1020_v39, 4  ;;  %v1740_v32 = vshll.u32 %v7069_v20, 16  ;;  %5687 = vmatpush3.bf16.msra.mxu0 %v6221_v41  ;;  %v6241_v39 = vld [vmem:[#allocation8 + $0x1e0] sm:$0xff]  }
 0x1a0   : > { %v1974_v33 = vrot.slane %v7016_v16, 1  ;;  %v1444_v35 = vld [vmem:[#allocation2 + $0x28] sm:$0xf]  ;;  %v1381_v42 = vld [vmem:[#allocation2 + $0x24] sm:$0xf]  ;;  %v1041_v24 = vsel %vm6952_vm10, %v1033_v49, %v1040_v21  ;;  %v1303_v45 = vsel %vm6820_vm2, %v1042_v23, %v1302_v14  ;;  %v1731_v47 = vor.u32 %v1730_v31, %v1726_v7  ;;  %5688 = vmatprep.subr.bf16.mxu0 %v6234_v54 }
 0x1a1   : > { %v1738_v56 = vshrl.u32 %v7069_v20, 16  ;;  %v7082_v57 = vld [vmem:[#allocation2 + $0x28] sm:$0xf]  ;;  %1301 = vst [vmem:[#allocation2 + $0x4c] sm:$0xf] %v1041_v24  ;;  %v1024_v16 = vsel %vm6952_vm10, %v1016_v0, %v1023_v51  ;;  %v1296_v41 = vsel %vm6820_vm2, %v1025_v28, %v1295_v58  ;;  %v1742_v44 = vrot.slane %v1740_v32, 1 }
 0x1a2   : > { %1304 = vst [vmem:[#allocation2 + $0x50] sm:$0x1] %v1303_v45  ;;  %v1973_v1 = vrot.slane %v5011_v17, 1  ;;  %v7088_v49 = vld [vmem:[#allocation2 + $0x2c] ss:$0 sps:$4 sm:$0x11]   ;;  %v1736_v7 = vsel %vm1712_vm5, %v1731_v47, %v1735_v18  ;;  %v7091_v14 = vcombine.low %v1443_v9, %v1444_v35  ;;  %v741_v54 = vadd.f32 %v7002_v53, %v6915_v27 }
 0x1a3   : > { %1294 = vst [vmem:[#allocation2 + $0x40] sm:$0xf] %v1024_v16  ;;  %1297 = vst [vmem:[#allocation2 + $0x44] sm:$0x1] %v1296_v41  ;;  %v1747_v11 = vrot.slane %v1745_v59, 1  ;;  %3585 = vmatprep.mubr.bf16.mxu1 %v1736_v7  ;;  %v1743_v0 = vor.u32 %v1742_v44, %v1738_v56  ;;  %v733_v17 = vadd.f32 %v6915_v27, %v7008_v63  ;;  %v1078_v31 = vshrl.u32 %v7045_v37, 16 }
 0x1a4   : > { %v1975_v58 = vsel %vm1969_vm6, %v1973_v1, %v1974_v33  ;;  %v744_v21 = vadd.f32 %v7011_v12, %v6915_v27  ;;  %3586 = vmatmul.mubr.bf16.gmra.mrb[20].mxu1 %v7054_v46  ;;  %v825_v18 = vmax.f32 %v741_v54, 0.0  ;;  %v736_v23 = vadd.f32 %v6915_v27, %v7029_v25  ;;  %5689 = vmatpush3.bf16.msra.mxu0 %v6235_v8  ;;  %v6244_v46 = vld [vmem:[#allocation8 + $0x1a0] sm:$0xff]   ;;  %v6245_v35 = vld [vmem:[#allocation8 + $0x1e8] sm:$0xff]  }
 0x1a5   : > { %3747 = vmatmul.mubr.bf16.gmra.mrb[20].mxu0 %v1975_v58  ;;  %v7104_v53 = vcombine.low %v1381_v42, %v7082_v57  ;;  %v1748_v59 = vsel %vm1712_vm5, %v1743_v0, %v1747_v11  ;;  %v823_v63 = vmax.f32 %v733_v17, 0.0  ;;  %v1757_v12 = vshll.u32 %v7088_v49, 16  ;;  %v1425_v33 = vld [vmem:[#allocation2 + $0x18] sm:$0xe]  ;;  %5690 = vmatprep.subr.bf16.mxu0 %v6241_v39  ;;  %v1312_v8 = vld [vmem:[#allocation2 + $0x60] sm:$0xf] }
 0x1a6   : > { %3754 = vmatprep.mubr.bf16.mxu0 %v7091_v14  ;;  %v826_v9 = vmax.f32 %v744_v21, 0.0  ;;  %3593 = vmatprep.mubr.bf16.mxu1 %v1748_v59  ;;  %v5224_v51 = vpack.c.bf16 %v825_v18, %v825_v18  ;;  %v824_v28 = vmax.f32 %v736_v23, 0.0  ;;  %v5012_v47 = vcombine.low %v1425_v33, %v7057_v48  ;;  %v6255_v56 = vld [vmem:[#allocation8 + $0x200] sm:$0xff]   ;;  %v6246_v58 = vld [vmem:[#allocation8 + $0x1a8] sm:$0xff]   ;;  %v1305_v17 = vld [vmem:[#allocation2 + $0x54] sm:$0xf] }
 0x1a7   : > { %v1750_v25 = vshrl.u32 %v7104_v53, 16  ;;  %v1752_v32 = vshll.u32 %v7104_v53, 16  ;;  %v5222_v42 = vpack.c.bf16 %v823_v63, %v823_v63  ;;  %v1759_v45 = vrot.slane %v1757_v12, 1  ;;  %5890 = vmatprep.subr.bf16.mxu1 %v6255_v56  ;;  %v1316_v21 = vld [vmem:[#allocation2 + $0x68] sm:$0x1] }
 0x1a8   : > { %v5225_v24 = vpack.c.bf16 %v826_v9, %v826_v9  ;;  %v1061_v16 = vshrl.u32 %v5224_v51, 16  ;;  %v1064_v41 = vshll.u32 %v5224_v51, 16  ;;  %v5223_v44 = vpack.c.bf16 %v824_v28, %v824_v28  ;;  %5691 = vmatpush3.bf16.msra.mxu0 %v6244_v46  ;;  %v1445_v48 = vld [vmem:[#allocation2 + $0x30] sm:$0xf]  ;;  %v1446_v63 = vld [vmem:[#allocation2 + $0x34] sm:$0xf] }
 0x1a9   : > { %v1754_v1 = vrot.slane %v1752_v32, 1  ;;  %v1044_v7 = vshrl.u32 %v5222_v42, 16  ;;  %v1047_v11 = vshll.u32 %v5222_v42, 16  ;;  %5692 = vmatprep.subr.bf16.mxu0 %v6245_v35  ;;  %v6249_v9 = vld [vmem:[#allocation8 + $0x1f0] sm:$0xff]   ;;  %v1309_v28 = vld [vmem:[#allocation2 + $0x5c] sm:$0x1] }
 0x1aa   : > { %v1069_v54 = vshrl.u32 %v5225_v24, 16  ;;  %v1072_v0 = vshll.u32 %v5225_v24, 16  ;;  %v1063_v39 = vrot.slane %v1061_v16, 7  ;;  %v1052_v18 = vshrl.u32 %v5223_v44, 16  ;;  %v1383_v42 = vld [vmem:[#allocation2 + $0x30] sm:$0xf] }
 0x1ab   : > { %v1055_v23 = vshll.u32 %v5223_v44, 16  ;;  %v1755_v59 = vor.u32 %v1754_v1, %v1750_v25  ;;  %v1046_v12 = vrot.slane %v1044_v7, 7  ;;  %v1976_v32 = vrot.slane %v5012_v47, 1  ;;  %v7114_v46 = vld [vmem:[#allocation2 + $0x34] sm:$0xf]  ;;  %v6250_v47 = vld [vmem:[#allocation8 + $0x1b0] sm:$0xff]  }
 0x1ac   : > { %v1071_v51 = vrot.slane %v1069_v54, 7  ;;  %v1977_v33 = vrot.slane %v7040_v36, 1  ;;  %v1066_v24 = vor.u32 %v1064_v41, %v1063_v39  ;;  %v1067_v56 = vrot.slane %v1063_v39, 4  ;;  %3594 = vmatmul.mubr.bf16.gmra.mrb[24].mxu1 %v7069_v20  ;;  %v7118_v44 = vld [vmem:[#allocation2 + $0x38] ss:$0 sps:$4 sm:$0x11]   ;;  %5693 = vmatpush3.bf16.msra.mxu0 %v6246_v58 }
 0x1ad   : > { %v1054_v16 = vrot.slane %v1052_v18, 7  ;;  %v1760_v25 = vsel %vm1712_vm5, %v1755_v59, %v1759_v45  ;;  %v1049_v35 = vor.u32 %v1047_v11, %v1046_v12  ;;  %v1050_v1 = vrot.slane %v1046_v12, 4  ;;  %v1426_v20 = vld [vmem:[#allocation2 + $0x24] sm:$0xe]  ;;  %5694 = vmatprep.subr.bf16.mxu0 %v6249_v9  ;;  %v6253_v18 = vld [vmem:[#allocation8 + $0x1f8] sm:$0xff]  }
 0x1ae   : > { %v1074_v7 = vor.u32 %v1072_v0, %v1071_v51  ;;  %v1076_v54 = vrot.slane %v1071_v51, 4  ;;  %3601 = vmatprep.mubr.bf16.mxu1 %v1760_v25  ;;  %v1313_v36 = vsel %vm6941_vm9, %v1066_v24, %v1312_v8  ;;  %v1978_v39 = vsel %vm1969_vm6, %v1976_v32, %v1977_v33  ;;  %v1447_v59 = vld [vmem:[#allocation2 + $0x3c] sm:$0xf]  ;;  %v1448_v9 = vld [vmem:[#allocation2 + $0x40] sm:$0xf]  ;;  %v6254_v12 = vld [vmem:[#allocation8 + $0x1b8] sm:$0xff]  }
 0x1af   : > { %v1057_v3 = vor.u32 %v1055_v23, %v1054_v16  ;;  %v1059_v41 = vrot.slane %v1054_v16, 4  ;;  %1314 = vst [vmem:[#allocation2 + $0x60] sm:$0xf] %v1313_v36  ;;  %v1306_v45 = vsel %vm6941_vm9, %v1049_v35, %v1305_v17  ;;  %3755 = vmatmul.mubr.bf16.gmra.mrb[24].mxu0 %v1978_v39  ;;  %v7129_v58 = vcombine.low %v1445_v48, %v1446_v63  ;;  %v1326_v32 = vld [vmem:[#allocation2 + $0x78] sm:$0xf] }
 0x1b0   : > { %v1075_v11 = vsel %vm6952_vm10, %v1067_v56, %v1074_v7  ;;  %v1317_v0 = vsel %vm6820_vm2, %v1076_v54, %v1316_v21  ;;  %1307 = vst [vmem:[#allocation2 + $0x54] sm:$0xf] %v1306_v45  ;;  %v7136_v17 = vcombine.low %v1383_v42, %v7114_v46  ;;  %v1769_v21 = vshll.u32 %v7118_v44, 16  ;;  %5695 = vmatpush3.bf16.msra.mxu0 %v6250_v47  ;;  %v1385_v56 = vld [vmem:[#allocation2 + $0x3c] sm:$0xf] }
 0x1b1   : > { %1315 = vst [vmem:[#allocation2 + $0x64] sm:$0xf] %v1075_v11  ;;  %1318 = vst [vmem:[#allocation2 + $0x68] sm:$0x1] %v1317_v0  ;;  %v1058_v8 = vsel %vm6952_vm10, %v1050_v1, %v1057_v3  ;;  %v1310_v23 = vsel %vm6820_vm2, %v1059_v41, %v1309_v28  ;;  %3762 = vmatprep.mubr.bf16.mxu0 %v7129_v58  ;;  %v5013_v48 = vcombine.low %v1426_v20, %v7082_v57  ;;  %v1319_v1 = vld [vmem:[#allocation2 + $0x6c] sm:$0xf] }
 0x1b2   : > { %1308 = vst [vmem:[#allocation2 + $0x58] sm:$0xf] %v1058_v8  ;;  %1311 = vst [vmem:[#allocation2 + $0x5c] sm:$0x1] %v1310_v23  ;;  %v1980_v63 = vrot.slane %v7088_v49, 1  ;;  %v828_v3 = vmax.f32 %v7049_v38, 0.0  ;;  %5696 = vmatprep.subr.bf16.mxu0 %v6253_v18  ;;  %v7145_v24 = vcombine.low %v1447_v59, %v1448_v9  ;;  %v1100_v57 = vor.u32 %v1098_v29, %v7063_v61 }
 0x1b3   : > { %v1762_v51 = vshrl.u32 %v7136_v17, 16  ;;  %v1764_v28 = vshll.u32 %v7136_v17, 16  ;;  %v1771_v33 = vrot.slane %v1769_v21, 1  ;;  %v1979_v42 = vrot.slane %v5013_v48, 1  ;;  %v7150_v49 = vld [vmem:[#allocation2 + $0x40] sm:$0xf] }
 0x1b4   : > { %3602 = vmatmul.mubr.bf16.gmra.mrb[28].mxu1 %v7104_v53  ;;  %v1101_v16 = vrot.slane %v7063_v61, 4  ;;  %v1080_v25 = vrot.slane %v1078_v31, 7  ;;  %v1081_v35 = vshll.u32 %v7045_v37, 16  ;;  %v1327_v2 = vsel %vm6941_vm9, %v1100_v57, %v1326_v32  ;;  %v7163_v53 = vld [vmem:[#allocation2 + $0x44] ss:$0 sps:$4 sm:$0x11]   ;;  %5697 = vmatpush3.bf16.msra.mxu0 %v6254_v12 }
 0x1b5   : > { %v1766_v38 = vrot.slane %v1764_v28, 1  ;;  %v1981_v7 = vsel %vm1969_vm6, %v1979_v42, %v1980_v63  ;;  %v8216_v29 = vmax.f32 %v6932_v55, 0.0  ;;  %v5227_v47 = vpack.c.bf16 %v828_v3, %v828_v3  ;;  %1328 = vst [vmem:[#allocation2 + $0x78] sm:$0xf] %v1327_v2  ;;  %v1427_v41 = vld [vmem:[#allocation2 + $0x30] sm:$0xe] }
 0x1b6   : > { %v1083_v36 = vor.u32 %v1081_v35, %v1080_v25  ;;  %v1084_v31 = vrot.slane %v1080_v25, 4  ;;  %v7166_v37 = vcombine.low %v1385_v56, %v7150_v49  ;;  %v1330_v0 = vld [vmem:[#allocation2 + $0x80] sm:$0x1]  ;;  %v1449_v59 = vld [vmem:[#allocation2 + $0x48] sm:$0xf]  ;;  %v1781_v63 = vshll.u32 %v7163_v53, 16 }
 0x1b7   : > { %v5229_v54 = vpack.c.bf16 %v8216_v29, %v8216_v29  ;;  %v1767_v61 = vor.u32 %v1766_v38, %v1762_v51  ;;  %3763 = vmatmul.mubr.bf16.gmra.mrb[28].mxu0 %v1981_v7  ;;  %v1086_v18 = vshrl.u32 %v5227_v47, 16  ;;  %v1089_v45 = vshll.u32 %v5227_v47, 16  ;;  %v1450_v9 = vld [vmem:[#allocation2 + $0x4c] sm:$0xf]  ;;  %v1323_v51 = vld [vmem:[#allocation2 + $0x74] sm:$0x1] }
 0x1b8   : > { %3770 = vmatprep.mubr.bf16.mxu0 %v7145_v24  ;;  %v1320_v11 = vsel %vm6941_vm9, %v1083_v36, %v1319_v1  ;;  %v1774_v8 = vshrl.u32 %v7166_v37, 16  ;;  %v1776_v23 = vshll.u32 %v7166_v37, 16  ;;  %v5014_v3 = vcombine.low %v1427_v41, %v7114_v46  ;;  %v7176_v12 = vld [vmem:[#allocation2 + $0x50] ss:$0 sps:$4 sm:$0x11]  }
 0x1b9   : > { %v1103_v39 = vshrl.u32 %v5229_v54, 16  ;;  %v1106_v20 = vshll.u32 %v5229_v54, 16  ;;  %v1772_v55 = vsel %vm1712_vm5, %v1767_v61, %v1771_v33  ;;  %1321 = vst [vmem:[#allocation2 + $0x6c] sm:$0xf] %v1320_v11  ;;  %v1088_v48 = vrot.slane %v1086_v18, 7 }
 0x1ba   : > { %3609 = vmatprep.mubr.bf16.mxu1 %v1772_v55  ;;  %v1778_v28 = vrot.slane %v1776_v23, 1  ;;  %v1983_v32 = vrot.slane %v7118_v44, 1  ;;  %v1387_v38 = vld [vmem:[#allocation2 + $0x48] sm:$0xf]  ;;  %v7179_v25 = vld [vmem:[#allocation2 + $0x4c] sm:$0xf]  ;;  %v7182_v2 = vcombine.low %v1449_v59, %v1450_v9  ;;  %v773_v23 = vadd.f32 %v6934_v62, %v6915_v27 }
 0x1bb   : > { %v1105_v21 = vrot.slane %v1103_v39, 7  ;;  %v1091_v57 = vor.u32 %v1089_v45, %v1088_v48  ;;  %v1093_v56 = vrot.slane %v1088_v48, 4  ;;  %v1783_v1 = vrot.slane %v1781_v63, 1  ;;  %v1428_v46 = vld [vmem:[#allocation2 + $0x3c] sm:$0xe] }
 0x1bc   : > { %3610 = vmatmul.mubr.bf16.gmra.mrb[32].mxu1 %v7136_v17  ;;  %v1779_v35 = vor.u32 %v1778_v28, %v1774_v8  ;;  %v1982_v7 = vrot.slane %v5014_v3, 1  ;;  %v1451_v61 = vld [vmem:[#allocation2 + $0x54] sm:$0xf]  ;;  %v1452_v17 = vld [vmem:[#allocation2 + $0x58] sm:$0xf]  ;;  %v1793_v39 = vshll.u32 %v7176_v12, 16  ;;  %v768_v63 = vadd.f32 %v6915_v27, %v6948_v19 }
 0x1bd   : > { %v1108_v33 = vor.u32 %v1106_v20, %v1105_v21  ;;  %v1110_v42 = vrot.slane %v1105_v21, 4  ;;  %v1092_v54 = vsel %vm6952_vm10, %v1084_v31, %v1091_v57  ;;  %v1324_v47 = vsel %vm6820_vm2, %v1093_v56, %v1323_v51  ;;  %v1389_v20 = vld [vmem:[#allocation2 + $0x54] sm:$0xf]  ;;  %v7200_v45 = vld [vmem:[#allocation2 + $0x58] sm:$0xf] }
 0x1be   : > { %1322 = vst [vmem:[#allocation2 + $0x70] sm:$0xf] %v1092_v54  ;;  %1325 = vst [vmem:[#allocation2 + $0x74] sm:$0x1] %v1324_v47  ;;  %v1784_v36 = vsel %vm1712_vm5, %v1779_v35, %v1783_v1  ;;  %v1984_v41 = vsel %vm1969_vm6, %v1982_v7, %v1983_v32  ;;  %v5015_v31 = vcombine.low %v1428_v46, %v7150_v49  ;;  %v1986_v18 = vrot.slane %v7163_v53, 1 }
 0x1bf   : > { %v1109_v29 = vsel %vm6952_vm10, %v1101_v16, %v1108_v33  ;;  %v1331_v44 = vsel %vm6820_vm2, %v1110_v42, %v1330_v0  ;;  %v7195_v16 = vcombine.low %v1387_v38, %v7179_v25  ;;  %3617 = vmatprep.mubr.bf16.mxu1 %v1784_v36  ;;  %3771 = vmatmul.mubr.bf16.gmra.mrb[32].mxu0 %v1984_v41  ;;  %v7202_v55 = vld [vmem:[#allocation2 + $0x5c] ss:$0 sps:$4 sm:$0x11]   ;;  %v1795_v59 = vrot.slane %v1793_v39, 1  ;;  %v1429_v46 = vld [vmem:[#allocation2 + $0x48] sm:$0xe] }
 0x1c0   : > { %1329 = vst [vmem:[#allocation2 + $0x7c] sm:$0xf] %v1109_v29  ;;  %1332 = vst [vmem:[#allocation2 + $0x80] sm:$0x1] %v1331_v44  ;;  %3778 = vmatprep.mubr.bf16.mxu0 %v7182_v2  ;;  %v7207_v8 = vcombine.low %v1451_v61, %v1452_v17  ;;  %v1985_v9 = vrot.slane %v5015_v31, 1  ;;  %v765_v49 = vadd.f32 %v6915_v27, %v6937_v5  ;;  %v833_v48 = vmax.f32 %v773_v23, 0.0 }
 0x1c1   : > { %v1786_v11 = vshrl.u32 %v7195_v16, 16  ;;  %v1788_v0 = vshll.u32 %v7195_v16, 16  ;;  %v776_v53 = vadd.f32 %v6946_v13, %v6915_v27  ;;  %v7218_v3 = vcombine.low %v1389_v20, %v7200_v45  ;;  %v1340_v29 = vld [vmem:[#allocation2 + $0x90] sm:$0xf]  ;;  %v1333_v17 = vld [vmem:[#allocation2 + $0x84] sm:$0xf] }
 0x1c2   : > { %v1987_v51 = vsel %vm1969_vm6, %v1985_v9, %v1986_v18  ;;  %v831_v28 = vmax.f32 %v765_v49, 0.0  ;;  %v1805_v32 = vshll.u32 %v7202_v55, 16  ;;  %v5232_v33 = vpack.c.bf16 %v833_v48, %v833_v48  ;;  %v1344_v36 = vld [vmem:[#allocation2 + $0x98] sm:$0x1]  ;;  %v1454_v48 = vld [vmem:[#allocation2 + $0x64] sm:$0xf] }
 0x1c3   : > { %v1790_v21 = vrot.slane %v1788_v0, 1  ;;  %v834_v62 = vmax.f32 %v776_v53, 0.0  ;;  %v832_v42 = vmax.f32 %v768_v63, 0.0  ;;  %v1798_v13 = vshrl.u32 %v7218_v3, 16  ;;  %v1391_v63 = vld [vmem:[#allocation2 + $0x60] sm:$0xf] }
 0x1c4   : > { %3618 = vmatmul.mubr.bf16.gmra.mrb[36].mxu1 %v7166_v37  ;;  %v5230_v57 = vpack.c.bf16 %v831_v28, %v831_v28  ;;  %v1800_v27 = vshll.u32 %v7218_v3, 16  ;;  %v1807_v19 = vrot.slane %v1805_v32, 1  ;;  %v1129_v35 = vshrl.u32 %v5232_v33, 16 }
 0x1c5   : > { %v1791_v5 = vor.u32 %v1790_v21, %v1786_v11  ;;  %v5233_v56 = vpack.c.bf16 %v834_v62, %v834_v62  ;;  %v1132_v1 = vshll.u32 %v5232_v33, 16  ;;  %v5231_v7 = vpack.c.bf16 %v832_v42, %v832_v42  ;;  %v1337_v11 = vld [vmem:[#allocation2 + $0x8c] sm:$0x1] }
 0x1c6   : > { %v1112_v37 = vshrl.u32 %v5230_v57, 16  ;;  %v1115_v44 = vshll.u32 %v5230_v57, 16  ;;  %v1131_v61 = vrot.slane %v1129_v35, 7  ;;  %v1802_v20 = vrot.slane %v1800_v27, 1  ;;  %v7235_v57 = vld [vmem:[#allocation2 + $0x64] sm:$0xf] }
 0x1c7   : > { %v1796_v38 = vsel %vm1712_vm5, %v1791_v5, %v1795_v59  ;;  %3779 = vmatmul.mubr.bf16.gmra.mrb[36].mxu0 %v1987_v51  ;;  %v1137_v54 = vshrl.u32 %v5233_v56, 16  ;;  %v1140_v47 = vshll.u32 %v5233_v56, 16  ;;  %v1120_v41 = vshrl.u32 %v5231_v7, 16  ;;  %v1453_v59 = vld [vmem:[#allocation2 + $0x60] sm:$0xf] }
 0x1c8   : > { %3625 = vmatprep.mubr.bf16.mxu1 %v1796_v38  ;;  %3786 = vmatprep.mubr.bf16.mxu0 %v7207_v8  ;;  %v1123_v39 = vshll.u32 %v5231_v7, 16  ;;  %v1114_v31 = vrot.slane %v1112_v37, 7  ;;  %v5016_v0 = vcombine.low %v1429_v46, %v7179_v25  ;;  %v1989_v23 = vrot.slane %v7176_v12, 1  ;;  %v7229_v5 = vld [vmem:[#allocation2 + $0x68] ss:$0 sps:$4 sm:$0x11]  }
 0x1c9   : > { %v1139_v18 = vrot.slane %v1137_v54, 7  ;;  %v1134_v9 = vor.u32 %v1132_v1, %v1131_v61  ;;  %v1135_v49 = vrot.slane %v1131_v61, 4  ;;  %v1122_v53 = vrot.slane %v1120_v41, 7  ;;  %v7249_v46 = vld [vmem:[#allocation2 + $0x70] sm:$0xf] }
 0x1ca   : > { %v1803_v21 = vor.u32 %v1802_v20, %v1798_v13  ;;  %v1117_v51 = vor.u32 %v1115_v44, %v1114_v31  ;;  %v1118_v28 = vrot.slane %v1114_v31, 4  ;;  %v1430_v13 = vld [vmem:[#allocation2 + $0x54] sm:$0xe]  ;;  %v1988_v35 = vrot.slane %v5016_v0, 1  ;;  %v7257_v61 = vld [vmem:[#allocation2 + $0x70] sm:$0xf] }
 0x1cb   : > { %v1142_v62 = vor.u32 %v1140_v47, %v1139_v18  ;;  %v1144_v32 = vrot.slane %v1139_v18, 4  ;;  %v1341_v33 = vsel %vm6941_vm9, %v1134_v9, %v1340_v29  ;;  %v1125_v25 = vor.u32 %v1123_v39, %v1122_v53  ;;  %v1393_v29 = vld [vmem:[#allocation2 + $0x6c] sm:$0xf] }
 0x1cc   : > { %3626 = vmatmul.mubr.bf16.gmra.mrb[40].mxu1 %v7195_v16  ;;  %v1127_v12 = vrot.slane %v1122_v53, 4  ;;  %v1808_v42 = vsel %vm1712_vm5, %v1803_v21, %v1807_v19  ;;  %1342 = vst [vmem:[#allocation2 + $0x90] sm:$0xf] %v1341_v33  ;;  %v1334_v56 = vsel %vm6941_vm9, %v1117_v51, %v1333_v17  ;;  %v1455_v16 = vld [vmem:[#allocation2 + $0x6c] sm:$0xf]  ;;  %v7247_v7 = vcombine.low %v1453_v59, %v1454_v48 }
 0x1cd   : > { %v1143_v27 = vsel %vm6952_vm10, %v1135_v49, %v1142_v62  ;;  %v1345_v38 = vsel %vm6820_vm2, %v1144_v32, %v1344_v36  ;;  %3633 = vmatprep.mubr.bf16.mxu1 %v1808_v42  ;;  %1335 = vst [vmem:[#allocation2 + $0x84] sm:$0xf] %v1334_v56  ;;  %v1126_v19 = vsel %vm6952_vm10, %v1118_v28, %v1125_v25  ;;  %v1817_v54 = vshll.u32 %v7229_v5, 16  ;;  %v7259_v17 = vld [vmem:[#allocation2 + $0x74] ss:$0 sps:$4 sm:$0x11]  }
 0x1ce   : > { %1343 = vst [vmem:[#allocation2 + $0x94] sm:$0xf] %v1143_v27  ;;  %1346 = vst [vmem:[#allocation2 + $0x98] sm:$0x1] %v1345_v38  ;;  %v1338_v1 = vsel %vm6820_vm2, %v1127_v12, %v1337_v11  ;;  %v1990_v37 = vsel %vm1969_vm6, %v1988_v35, %v1989_v23  ;;  %v7253_v44 = vcombine.low %v1391_v63, %v7235_v57  ;;  %v1992_v36 = vrot.slane %v7202_v55, 1 }
 0x1cf   : > { %1336 = vst [vmem:[#allocation2 + $0x88] sm:$0xf] %v1126_v19  ;;  %1339 = vst [vmem:[#allocation2 + $0x8c] sm:$0x1] %v1338_v1  ;;  %v5017_v47 = vcombine.low %v1430_v13, %v7200_v45  ;;  %3787 = vmatmul.mubr.bf16.gmra.mrb[40].mxu0 %v1990_v37  ;;  %v7266_v31 = vcombine.low %v1455_v16, %v7249_v46  ;;  %v1819_v18 = vrot.slane %v1817_v54, 1  ;;  %v1829_v48 = vshll.u32 %v7259_v17, 16 }
 0x1d0   : > { %3794 = vmatprep.mubr.bf16.mxu0 %v7247_v7  ;;  %v1810_v41 = vshrl.u32 %v7253_v44, 16  ;;  %v1812_v39 = vshll.u32 %v7253_v44, 16  ;;  %v7271_v45 = vld [vmem:[%s8183_s2] ss:$0 sm:$0xff]  ;;  %v7283_v49 = vcombine.low %v1393_v29, %v7257_v61  ;;  %v1457_v13 = vld [vmem:[#allocation2 + $0x78] sm:$0xf] }
 0x1d1   : > { %v1991_v20 = vrot.slane %v5017_v47, 1  ;;  %v789_v11 = vadd.f32 %v7271_v45, %v6968_v50  ;;  %v781_v55 = vadd.f32 %v7271_v45, %v6975_v60  ;;  %v792_v0 = vadd.f32 %v7271_v45, %v6986_v4  ;;  %v1431_v60 = vld [vmem:[#allocation2 + $0x60] sm:$0xe]  ;;  %v1458_v56 = vld [vmem:[#allocation2 + $0x7c] sm:$0xf] }
 0x1d2   : > { %v1814_v23 = vrot.slane %v1812_v39, 1  ;;  %v784_v9 = vadd.f32 %v7271_v45, %v6990_v15  ;;  %v1822_v4 = vshrl.u32 %v7283_v49, 16  ;;  %v1824_v28 = vshll.u32 %v7283_v49, 16  ;;  %v1354_v19 = vld [vmem:[#allocation2 + $0xa8] sm:$0xf] }
 0x1d3   : > { %v1993_v59 = vsel %vm1969_vm6, %v1991_v20, %v1992_v36  ;;  %v837_v53 = vmax.f32 %v789_v11, 0.0  ;;  %v835_v21 = vmax.f32 %v781_v55, 0.0  ;;  %v838_v50 = vmax.f32 %v792_v0, 0.0  ;;  %v1347_v1 = vld [vmem:[#allocation2 + $0x9c] sm:$0xf] }
 0x1d4   : > { %3634 = vmatmul.mubr.bf16.gmra.mrb[44].mxu1 %v7218_v3  ;;  %v1815_v63 = vor.u32 %v1814_v23, %v1810_v41  ;;  %v836_v51 = vmax.f32 %v784_v9, 0.0  ;;  %v1831_v33 = vrot.slane %v1829_v48, 1  ;;  %v1826_v3 = vrot.slane %v1824_v28, 1  ;;  %v1358_v39 = vld [vmem:[#allocation2 + $0xb0] sm:$0x1] }
 0x1d5   : > { %v5236_v62 = vpack.c.bf16 %v837_v53, %v837_v53  ;;  %v5234_v32 = vpack.c.bf16 %v835_v21, %v835_v21  ;;  %v5237_v15 = vpack.c.bf16 %v838_v50, %v838_v50  ;;  %v5018_v42 = vcombine.low %v1431_v60, %v7235_v57  ;;  %v1351_v57 = vld [vmem:[#allocation2 + $0xa4] sm:$0x1]  ;;  %v7296_v48 = vld [vmem:[#allocation2 + $0x80] ss:$0 sps:$4 sm:$0x11]  }
 0x1d6   : > { %v1820_v25 = vsel %vm1712_vm5, %v1815_v63, %v1819_v18  ;;  %v5235_v12 = vpack.c.bf16 %v836_v51, %v836_v51  ;;  %v1827_v20 = vor.u32 %v1826_v3, %v1822_v4  ;;  %v1995_v0 = vrot.slane %v7229_v5, 1  ;;  %v7298_v28 = vld [vmem:[#allocation2 + $0x7c] sm:$0xf] }
 0x1d7   : > { %3641 = vmatprep.mubr.bf16.mxu1 %v1820_v25  ;;  %3795 = vmatmul.mubr.bf16.gmra.mrb[44].mxu0 %v1993_v59  ;;  %v1163_v27 = vshrl.u32 %v5236_v62, 16  ;;  %v1166_v38 = vshll.u32 %v5236_v62, 16  ;;  %v1146_v35 = vshrl.u32 %v5234_v32, 16  ;;  %v1149_v16 = vshll.u32 %v5234_v32, 16  ;;  %v1395_v59 = vld [vmem:[#allocation2 + $0x78] sm:$0xf] }
 0x1d8   : > { %3802 = vmatprep.mubr.bf16.mxu0 %v7266_v31  ;;  %v1171_v29 = vshrl.u32 %v5237_v15, 16  ;;  %v1174_v37 = vshll.u32 %v5237_v15, 16  ;;  %v1154_v54 = vshrl.u32 %v5235_v12, 16  ;;  %v1157_v47 = vshll.u32 %v5235_v12, 16  ;;  %v1432_v25 = vld [vmem:[#allocation2 + $0x6c] sm:$0xe] }
 0x1d9   : > { %v1165_v36 = vrot.slane %v1163_v27, 7  ;;  %v1148_v41 = vrot.slane %v1146_v35, 7  ;;  %v1994_v18 = vrot.slane %v5018_v42, 1  ;;  %v7293_v23 = vcombine.low %v1457_v13, %v1458_v56  ;;  %v1459_v13 = vld [vmem:[#allocation2 + $0x84] sm:$0xf] }
 0x1da   : > { %v1173_v11 = vrot.slane %v1171_v29, 7  ;;  %v1156_v55 = vrot.slane %v1154_v54, 7  ;;  %v1832_v32 = vsel %vm1712_vm5, %v1827_v20, %v1831_v33  ;;  %v1460_v33 = vld [vmem:[#allocation2 + $0x88] sm:$0xf]  ;;  %v4988_v56 = vcombine.low %v1395_v59, %v7298_v28 }
 0x1db   : > { %v1168_v9 = vor.u32 %v1166_v38, %v1165_v36  ;;  %v1169_v53 = vrot.slane %v1165_v36, 4  ;;  %v1151_v21 = vor.u32 %v1149_v16, %v1148_v41  ;;  %v1152_v50 = vrot.slane %v1148_v41, 4  ;;  %v1397_v38 = vld [vmem:[#allocation2 + $0x84] sm:$0xf] }
 0x1dc   : > { %3642 = vmatmul.mubr.bf16.gmra.mrb[48].mxu1 %v7253_v44  ;;  %v1176_v60 = vor.u32 %v1174_v37, %v1173_v11  ;;  %v1178_v63 = vrot.slane %v1173_v11, 4  ;;  %v1159_v51 = vor.u32 %v1157_v47, %v1156_v55  ;;  %v1161_v4 = vrot.slane %v1156_v55, 4 }
 0x1dd   : > { %v1355_v5 = vsel %vm6941_vm9, %v1168_v9, %v1354_v19  ;;  %v1348_v62 = vsel %vm6941_vm9, %v1151_v21, %v1347_v1  ;;  %v1996_v15 = vsel %vm1969_vm6, %v1994_v18, %v1995_v0  ;;  %3649 = vmatprep.mubr.bf16.mxu1 %v1832_v32  ;;  %v1841_v27 = vshll.u32 %v7296_v48, 16  ;;  %v7319_v19 = vld [vmem:[#allocation2 + $0x88] sm:$0xf]  ;;  %v7321_v1 = vld [vmem:[#allocation2 + $0x8c] ss:$0 sps:$4 sm:$0x11]  }
 0x1de   : > { %1356 = vst [vmem:[#allocation2 + $0xa8] sm:$0xf] %v1355_v5  ;;  %1349 = vst [vmem:[#allocation2 + $0x9c] sm:$0xf] %v1348_v62  ;;  %v1177_v44 = vsel %vm6952_vm10, %v1169_v53, %v1176_v60  ;;  %v1359_v12 = vsel %vm6820_vm2, %v1178_v63, %v1358_v39  ;;  %v1160_v3 = vsel %vm6952_vm10, %v1152_v50, %v1159_v51  ;;  %v1998_v16 = vrot.slane %v7259_v17, 1 }
 0x1df   : > { %v1352_v42 = vsel %vm6820_vm2, %v1161_v4, %v1351_v57  ;;  %1357 = vst [vmem:[#allocation2 + $0xac] sm:$0xf] %v1177_v44  ;;  %1360 = vst [vmem:[#allocation2 + $0xb0] sm:$0x1] %v1359_v12  ;;  %3803 = vmatmul.mubr.bf16.gmra.mrb[48].mxu0 %v1996_v15  ;;  %v5019_v35 = vcombine.low %v1432_v25, %v7257_v61  ;;  %v1834_v29 = vshrl.u32 %v4988_v56, 16  ;;  %v1836_v37 = vshll.u32 %v4988_v56, 16 }
 0x1e0   : > { %1350 = vst [vmem:[#allocation2 + $0xa0] sm:$0xf] %v1160_v3  ;;  %1353 = vst [vmem:[#allocation2 + $0xa4] sm:$0x1] %v1352_v42  ;;  %3810 = vmatprep.mubr.bf16.mxu0 %v7293_v23  ;;  %v7323_v54 = vcombine.low %v1459_v13, %v1460_v33  ;;  %v805_v47 = vadd.f32 %v7271_v45, %v7036_v30  ;;  %v1843_v36 = vrot.slane %v1841_v27, 1  ;;  %v1853_v0 = vshll.u32 %v7321_v1, 16 }
 0x1e1   : > { %v1997_v41 = vrot.slane %v5019_v35, 1  ;;  %v797_v39 = vadd.f32 %v7271_v45, %v7051_v40  ;;  %v808_v61 = vadd.f32 %v7271_v45, %v7059_v43  ;;  %v1838_v17 = vrot.slane %v1836_v37, 1  ;;  %v1433_v51 = vld [vmem:[#allocation2 + $0x78] sm:$0xe]  ;;  %v1368_v4 = vld [vmem:[#allocation2 + $0xc0] sm:$0xf] }
 0x1e2   : > { %v841_v57 = vmax.f32 %v805_v47, 0.0  ;;  %v800_v20 = vadd.f32 %v7271_v45, %v7073_v26  ;;  %v7335_v18 = vcombine.low %v1397_v38, %v7319_v19  ;;  %v1855_v50 = vrot.slane %v1853_v0, 1  ;;  %v1361_v44 = vld [vmem:[#allocation2 + $0xb4] sm:$0xf]  ;;  %v1372_v12 = vld [vmem:[#allocation2 + $0xc8] sm:$0x1] }
 0x1e3   : > { %v1999_v30 = vsel %vm1969_vm6, %v1997_v41, %v1998_v16  ;;  %v839_v11 = vmax.f32 %v797_v39, 0.0  ;;  %v842_v55 = vmax.f32 %v808_v61, 0.0  ;;  %v1839_v40 = vor.u32 %v1838_v17, %v1834_v29  ;;  %v1365_v38 = vld [vmem:[#allocation2 + $0xbc] sm:$0x1]  ;;  %v1461_v29 = vld [vmem:[#allocation2 + $0x90] sm:$0xf] }
 0x1e4   : > { %3650 = vmatmul.mubr.bf16.gmra.mrb[52].mxu1 %v7283_v49  ;;  %v5240_v59 = vpack.c.bf16 %v841_v57, %v841_v57  ;;  %v840_v9 = vmax.f32 %v800_v20, 0.0  ;;  %v1846_v43 = vshrl.u32 %v7335_v18, 16  ;;  %v1848_v21 = vshll.u32 %v7335_v18, 16  ;;  %v1462_v37 = vld [vmem:[#allocation2 + $0x94] sm:$0xf] }
 0x1e5   : > { %v5238_v49 = vpack.c.bf16 %v839_v11, %v839_v11  ;;  %v5241_v53 = vpack.c.bf16 %v842_v55, %v842_v55  ;;  %v1844_v26 = vsel %vm1712_vm5, %v1839_v40, %v1843_v36  ;;  %v5020_v35 = vcombine.low %v1433_v51, %v7298_v28  ;;  %v7345_v61 = vld [vmem:[#allocation2 + $0x98] ss:$0 sps:$4 sm:$0x11]   ;;  %v1399_v11 = vld [vmem:[#allocation2 + $0x90] sm:$0xf] }
 0x1e6   : > { %v1197_v45 = vshrl.u32 %v5240_v59, 16  ;;  %v1200_v60 = vshll.u32 %v5240_v59, 16  ;;  %v5239_v63 = vpack.c.bf16 %v840_v9, %v840_v9  ;;  %3657 = vmatprep.mubr.bf16.mxu1 %v1844_v26  ;;  %v1850_v13 = vrot.slane %v1848_v21, 1  ;;  %v7350_v40 = vld [vmem:[#allocation2 + $0x94] sm:$0xf] }
 0x1e7   : > { %3811 = vmatmul.mubr.bf16.gmra.mrb[52].mxu0 %v1999_v30  ;;  %v1180_v5 = vshrl.u32 %v5238_v49, 16  ;;  %v1183_v62 = vshll.u32 %v5238_v49, 16  ;;  %v1205_v32 = vshrl.u32 %v5241_v53, 16  ;;  %v1208_v15 = vshll.u32 %v5241_v53, 16  ;;  %v1434_v59 = vld [vmem:[#allocation2 + $0x84] sm:$0xe] }
 0x1e8   : > { %3818 = vmatprep.mubr.bf16.mxu0 %v7323_v54  ;;  %v1199_v25 = vrot.slane %v1197_v45, 7  ;;  %v1188_v3 = vshrl.u32 %v5239_v63, 16  ;;  %v1191_v42 = vshll.u32 %v5239_v63, 16  ;;  %v2001_v16 = vrot.slane %v7296_v48, 1  ;;  %v1401_v53 = vld [vmem:[#allocation2 + $0x9c] sm:$0xf] }
 0x1e9   : > { %v1182_v33 = vrot.slane %v1180_v5, 7  ;;  %v1207_v27 = vrot.slane %v1205_v32, 7  ;;  %v1851_v39 = vor.u32 %v1850_v13, %v1846_v43  ;;  %v2000_v49 = vrot.slane %v5020_v35, 1  ;;  %v7364_v26 = vld [vmem:[#allocation2 + $0xa4] ss:$0 sps:$4 sm:$0x11]  }
 0x1ea   : > { %v1202_v47 = vor.u32 %v1200_v60, %v1199_v25  ;;  %v1203_v36 = vrot.slane %v1199_v25, 4  ;;  %v1190_v41 = vrot.slane %v1188_v3, 7  ;;  %v7362_v6 = vcombine.low %v1461_v29, %v1462_v37  ;;  %v7366_v45 = vpop.f32.mrb[16].mxu1  ;;  %v1464_v32 = vld [vmem:[#allocation2 + $0xa0] sm:$0xf] }
 0x1eb   : > { %v1185_v17 = vor.u32 %v1183_v62, %v1182_v33  ;;  %v1186_v57 = vrot.slane %v1182_v33, 4  ;;  %v1210_v20 = vor.u32 %v1208_v15, %v1207_v27  ;;  %v1212_v30 = vrot.slane %v1207_v27, 4  ;;  %v1463_v62 = vld [vmem:[#allocation2 + $0x9c] sm:$0xf]  ;;  %v7380_v3 = vpop.f32.mrb[17].mxu1 }
 0x1ec   : > { %3658 = vmatmul.mubr.bf16.gmra.mrb[56].mxu1 %v4988_v56  ;;  %v1369_v55 = vsel %vm6941_vm9, %v1202_v47, %v1368_v4  ;;  %v1193_v28 = vor.u32 %v1191_v42, %v1190_v41  ;;  %v1195_v0 = vrot.slane %v1190_v41, 4  ;;  %v1856_v48 = vsel %vm1712_vm5, %v1851_v39, %v1855_v50  ;;  %v7372_v4 = vld [vmem:[#allocation2 + $0xa0] sm:$0xf]  ;;  %v1435_v35 = vld [vmem:[#allocation2 + $0x90] sm:$0xe]  ;;  %v7388_v37 = vpop.f32.mrb[18].mxu1 }
 0x1ed   : > { %1370 = vst [vmem:[#allocation2 + $0xc0] sm:$0xf] %v1369_v55  ;;  %v1362_v56 = vsel %vm6941_vm9, %v1185_v17, %v1361_v44  ;;  %v1211_v9 = vsel %vm6952_vm10, %v1203_v36, %v1210_v20  ;;  %v1373_v43 = vsel %vm6820_vm2, %v1212_v30, %v1372_v12  ;;  %3665 = vmatprep.mubr.bf16.mxu1 %v1856_v48  ;;  %v1865_v51 = vshll.u32 %v7345_v61, 16  ;;  %v1403_v44 = vld [vmem:[#allocation2 + $0xa8] sm:$0xf] }
 0x1ee   : > { %1363 = vst [vmem:[#allocation2 + $0xb4] sm:$0xf] %v1362_v56  ;;  %1371 = vst [vmem:[#allocation2 + $0xc4] sm:$0xf] %v1211_v9  ;;  %v1194_v21 = vsel %vm6952_vm10, %v1186_v57, %v1193_v28  ;;  %v1366_v50 = vsel %vm6820_vm2, %v1195_v0, %v1365_v38  ;;  %v2002_v60 = vsel %vm1969_vm6, %v2000_v49, %v2001_v16  ;;  %v1877_v25 = vshll.u32 %v7364_v26, 16 }
 0x1ef   : > { %1374 = vst [vmem:[#allocation2 + $0xc8] sm:$0x1] %v1373_v43  ;;  %1364 = vst [vmem:[#allocation2 + $0xb8] sm:$0xf] %v1194_v21  ;;  %v4990_v63 = vcombine.low %v1399_v11, %v7350_v40  ;;  %v5021_v22 = vcombine.low %v1434_v59, %v7319_v19  ;;  %3819 = vmatmul.mubr.bf16.gmra.mrb[56].mxu0 %v2002_v60  ;;  %v4991_v15 = vcombine.low %v1401_v53, %v7372_v4  ;;  %v7378_v12 = vld [vmem:[#allocation2 + $0xac] sm:$0xf] }
 0x1f0   : > { %1367 = vst [vmem:[#allocation2 + $0xbc] sm:$0x1] %v1366_v50  ;;  %3826 = vmatprep.mubr.bf16.mxu0 %v7362_v6  ;;  %v1867_v42 = vrot.slane %v1865_v51, 1  ;;  %v2004_v33 = vrot.slane %v7321_v1, 1  ;;  %v7390_v47 = vcombine.low %v1463_v62, %v1464_v32  ;;  %v1879_v41 = vrot.slane %v1877_v25, 1  ;;  %v7398_v11 = vpop.f32.mrb[19].mxu1 }
 0x1f1   : > { %v1858_v10 = vshrl.u32 %v4990_v63, 16  ;;  %v1860_v5 = vshll.u32 %v4990_v63, 16  ;;  %v2003_v13 = vrot.slane %v5021_v22, 1  ;;  %v1870_v27 = vshrl.u32 %v4991_v15, 16  ;;  %v1465_v48 = vld [vmem:[#allocation2 + $0xa8] sm:$0xf] }
 0x1f2   : > { %v1872_v38 = vshll.u32 %v4991_v15, 16  ;;  %v7386_v29 = vld [vmem:[#allocation2 + $0xb0] ss:$0 sps:$4 sm:$0x11]   ;;  %v5022_v57 = vcombine.low %v1435_v35, %v7350_v40  ;;  %v2007_v43 = vrot.slane %v7345_v61, 1 }
 0x1f3   : > { %v1862_v19 = vrot.slane %v1860_v5, 1  ;;  %v2005_v1 = vsel %vm1969_vm6, %v2003_v13, %v2004_v33  ;;  %v1889_v56 = vshll.u32 %v7386_v29, 16  ;;  %v1466_v49 = vld [vmem:[#allocation2 + $0xac] sm:$0xf]  ;;  %v1436_v53 = vld [vmem:[#allocation2 + $0x9c] sm:$0xe] }
 0x1f4   : > { %3666 = vmatmul.mubr.bf16.gmra.mrb[60].mxu1 %v7335_v18  ;;  %v7384_v18 = vcombine.low %v1403_v44, %v7378_v12  ;;  %v1874_v36 = vrot.slane %v1872_v38, 1  ;;  %v2006_v9 = vrot.slane %v5022_v57, 1  ;;  %v7412_v22 = vcombine.low %v1465_v48, %v1466_v49  ;;  %v6248_v57 = vld [vmem:[#allocation2 + $0x14] ss:$0 sps:$4 sm:$0x11]  }
 0x1f5   : > { %v1863_v16 = vor.u32 %v1862_v19, %v1858_v10  ;;  %v1405_v39 = vld [vmem:[#allocation2 + $0xb4] sm:$0xf]  ;;  %v5023_v10 = vcombine.low %v1436_v53, %v7372_v4  ;;  %v2010_v44 = vrot.slane %v7364_v26, 1  ;;  %v1437_v19 = vld [vmem:[#allocation2 + $0xa8] sm:$0xe] }
 0x1f6   : > { %v1884_v20 = vshll.u32 %v7384_v18, 16  ;;  %v7396_v30 = vld [vmem:[#allocation2 + $0xb8] sm:$0xf]  ;;  %v1875_v55 = vor.u32 %v1874_v36, %v1870_v27  ;;  %v1882_v40 = vshrl.u32 %v7384_v18, 16  ;;  %v2008_v51 = vsel %vm1969_vm6, %v2006_v9, %v2007_v43  ;;  %v1505_v27 = vld [vmem:[#allocation2 + $0x1c] sm:$0xf] }
 0x1f7   : > { %v1868_v17 = vsel %vm1712_vm5, %v1863_v16, %v1867_v42  ;;  %3827 = vmatmul.mubr.bf16.gmra.mrb[60].mxu0 %v2005_v1  ;;  %v7402_v28 = vcombine.low %v1405_v39, %v7396_v30  ;;  %v7408_v21 = vld [vmem:[#allocation2 + $0xbc] ss:$0 sps:$4 sm:$0x11]   ;;  %v2009_v25 = vrot.slane %v5023_v10, 1  ;;  %v1467_v42 = vld [vmem:[#allocation2 + $0xb4] sm:$0xf]  ;;  %v5024_v16 = vcombine.low %v1437_v19, %v7378_v12 }
 0x1f8   : > { %3673 = vmatprep.mubr.bf16.mxu1 %v1868_v17  ;;  %3834 = vmatprep.mubr.bf16.mxu0 %v7390_v47  ;;  %v1880_v0 = vsel %vm1712_vm5, %v1875_v55, %v1879_v41  ;;  %v1886_v59 = vrot.slane %v1884_v20, 1  ;;  %v1901_v61 = vshll.u32 %v7408_v21, 16  ;;  %v1468_v13 = vld [vmem:[#allocation2 + $0xb8] sm:$0xf]  ;;  %v1487_v39 = vld [vmem:[#allocation2 + $0xc] sm:$0xe] }
 0x1f9   : > { %v1896_v50 = vshll.u32 %v7402_v28, 16  ;;  %v1894_v5 = vshrl.u32 %v7402_v28, 16  ;;  %v2011_v38 = vsel %vm1969_vm6, %v2009_v25, %v2010_v44  ;;  %v7421_v35 = vcombine.low %v1467_v42, %v1468_v13  ;;  %v1504_v36 = vld [vmem:[#allocation2 + $0x18] sm:$0xf]  ;;  %v6333_v26 = vld [vmem:[#allocation2 + $0x10] sm:$0xf] }
 0x1fa   : > { %v1887_v60 = vor.u32 %v1886_v59, %v1882_v40  ;;  %v1903_v4 = vrot.slane %v1901_v61, 1  ;;  %v7425_v41 = vcombine.low %v1504_v36, %v1505_v27  ;;  %v5058_v17 = vcombine.low %v1487_v39, %v6333_v26  ;;  %v1469_v1 = vld [vmem:[#allocation2 + $0xc0] sm:$0xf]  ;;  %v1470_v12 = vld [vmem:[#allocation2 + $0xc4] sm:$0xf] }
 0x1fb   : > { %v1898_v62 = vrot.slane %v1896_v50, 1  ;;  %v2012_v20 = vrot.slane %v5024_v16, 1  ;;  %v2013_v55 = vrot.slane %v7386_v29, 1  ;;  %v2181_v40 = vshll.u32 %v7000_v52, 16  ;;  %v1506_v59 = vld [vmem:[#allocation2 + $0x24] sm:$0xf] }
 0x1fc   : > { %3674 = vmatmul.mubr.bf16.gmra.mrb[64].mxu1 %v4990_v63  ;;  %v1891_v63 = vrot.slane %v1889_v56, 1  ;;  %v2645_v48 = vshll.u32 %v7425_v41, 16  ;;  %v1507_v56 = vld [vmem:[#allocation2 + $0x28] sm:$0xf]  ;;  %v2434_v9 = vrot.slane %v5058_v17, 1  ;;  %v2435_v43 = vrot.slane %v6248_v57, 1 }
 0x1fd   : > { %3681 = vmatprep.mubr.bf16.mxu1 %v1880_v0  ;;  %v1899_v33 = vor.u32 %v1898_v62, %v1894_v5  ;;  %v1438_v0 = vld [vmem:[#allocation2 + $0xb4] sm:$0xe]  ;;  %v6252_v49 = vld [vmem:[#allocation2 + $0x20] ss:$0 sps:$4 sm:$0x11]   ;;  %v2014_v53 = vsel %vm1969_vm6, %v2012_v20, %v2013_v55  ;;  %v7436_v29 = vcombine.low %v1506_v59, %v1507_v56  ;;  %v2016_v19 = vrot.slane %v7408_v21, 1 }
 0x1fe   : > { %v1892_v32 = vsel %vm1712_vm5, %v1887_v60, %v1891_v63  ;;  %v5025_v50 = vcombine.low %v1438_v0, %v7396_v30  ;;  %v2647_v60 = vrot.slane %v2645_v48, 1  ;;  %v2179_v63 = vshrl.u32 %v7000_v52, 16  ;;  %v1488_v10 = vld [vmem:[#allocation2 + $0x18] sm:$0xe]  ;;  %v6334_v5 = vld [vmem:[#allocation2 + $0x1c] sm:$0xf] }
 0x1ff   : > { %3835 = vmatmul.mubr.bf16.gmra.mrb[64].mxu0 %v2008_v51  ;;  %v2183_v51 = vrot.slane %v2181_v40, 1  ;;  %v5059_v62 = vcombine.low %v1488_v10, %v6334_v5  ;;  %v2436_v61 = vsel %vm1969_vm6, %v2434_v9, %v2435_v43  ;;  %v2650_v25 = vshll.u32 %v6252_v49, 16  ;;  %v6256_v30 = vld [vmem:[#allocation2 + $0x20] ss:$0 sps:$4 sm:$0x11]   ;;  %v6336_v43 = vld [vmem:[#allocation8 + $0x200] sm:$0xff]  }
 0x200   : > { %3842 = vmatprep.mubr.bf16.mxu0 %v7412_v22  ;;  %v2015_v44 = vrot.slane %v5025_v50, 1  ;;  %v2186_v42 = vshll.u32 %v6248_v57, 16  ;;  %v6258_v52 = vld [vmem:[#allocation2 + $0x2c] ss:$0 sps:$4 sm:$0x11]   ;;  %v2655_v57 = vshrl.u32 %v7436_v29, 16 }
 0x201   : > { %v2184_v27 = vor.u32 %v2183_v51, %v2179_v63  ;;  %v2652_v16 = vrot.slane %v2650_v25, 1  ;;  %v2437_v36 = vrot.slane %v5059_v62, 1  ;;  %v1489_v39 = vld [vmem:[#allocation2 + $0x24] sm:$0xe]  ;;  %v2662_v21 = vshll.u32 %v6258_v52, 16  ;;  %v6269_v10 = vld [vmem:[#allocation8 + $0x210] sm:$0xff]  }
 0x202   : > { %v2017_v26 = vsel %vm1969_vm6, %v2015_v44, %v2016_v19  ;;  %v2188_v17 = vrot.slane %v2186_v42, 1  ;;  %v6335_v40 = vld [vmem:[#allocation2 + $0x28] sm:$0xf]  ;;  %v6259_v9 = vld [vmem:[#allocation2 + $0x2c] ss:$0 sps:$4 sm:$0x11]  }
 0x203   : > { %v5060_v59 = vcombine.low %v1489_v39, %v6335_v40  ;;  %v2191_v49 = vshrl.u32 %v7038_v34, 16  ;;  %v7457_v50 = vld [vmem:[#allocation2 + $0x38] ss:$0 sps:$4 sm:$0x11]   ;;  %v2664_v63 = vrot.slane %v2662_v21, 1  ;;  %v2205_v5 = vshll.u32 %v7091_v14, 16 }
 0x204   : > { %3682 = vmatmul.mubr.bf16.gmra.mrb[68].mxu1 %v4991_v15  ;;  %v1904_v15 = vsel %vm1712_vm5, %v1899_v33, %v1903_v4  ;;  %v2657_v33 = vshll.u32 %v7436_v29, 16  ;;  %v2193_v4 = vshll.u32 %v7038_v34, 16  ;;  %v2189_v0 = vsel %vm1712_vm5, %v2184_v27, %v2188_v17  ;;  %v1490_v19 = vld [vmem:[#allocation2 + $0x30] sm:$0xe]  ;;  %v7477_v40 = vld [vmem:[#allocation2 + $0x4c] sm:$0xf] }
 0x205   : > { %3689 = vmatprep.mubr.bf16.mxu1 %v1892_v32  ;;  %v2643_v32 = vshrl.u32 %v7425_v41, 16  ;;  %v2440_v25 = vrot.slane %v5060_v59, 1  ;;  %v2441_v44 = vrot.slane %v6259_v9, 1  ;;  %v2674_v34 = vshll.u32 %v7457_v50, 16 }
 0x206   : > { %v2659_v20 = vrot.slane %v2657_v33, 1  ;;  %v2195_v48 = vrot.slane %v2193_v4, 1  ;;  %v6276_v4 = vld [vmem:[#allocation8 + $0x218] sm:$0xff]   ;;  %v7473_v17 = vld [vmem:[#allocation2 + $0x44] ss:$0 sps:$4 sm:$0x11]  }
 0x207   : > { %3843 = vmatmul.mubr.bf16.gmra.mrb[68].mxu0 %v2011_v38  ;;  %v2648_v13 = vor.u32 %v2647_v60, %v2643_v32  ;;  %v1508_v38 = vld [vmem:[#allocation2 + $0x30] sm:$0xf]  ;;  %v7461_v32 = vld [vmem:[#allocation2 + $0x40] sm:$0xf] }
 0x208   : > { %3850 = vmatprep.mubr.bf16.mxu0 %v7421_v35  ;;  %v2660_v60 = vor.u32 %v2659_v20, %v2655_v57  ;;  %v2196_v62 = vor.u32 %v2195_v48, %v2191_v49  ;;  %v6283_v20 = vld [vmem:[#allocation8 + $0x220] sm:$0xff]   ;;  %v1512_v48 = vld [vmem:[#allocation2 + $0x48] sm:$0xf] }
 0x20c   : > { %3690 = vmatmul.mubr.bf16.gmra.mrb[72].mxu1 %v7384_v18  ;;  %v7433_v18 = vcombine.low %v1469_v1, %v1470_v12  ;;  %v2653_v1 = vsel %vm1712_vm5, %v2648_v13, %v2652_v16  ;;  %v6262_v12 = vld [vmem:[#allocation8 + $0x208] sm:$0xff]   ;;  %v2207_v16 = vrot.slane %v2205_v5, 1  ;;  %v2215_v5 = vshrl.u32 %v7129_v58, 16 }
 0x20d   : > { %3697 = vmatprep.mubr.bf16.mxu1 %v1904_v15  ;;  %v2438_v15 = vrot.slane %v6256_v30, 1 }
 0x20f   : > { %3851 = vmatmul.mubr.bf16.gmra.mrb[72].mxu0 %v2014_v53  ;;  %v2439_v56 = vsel %vm1969_vm6, %v2437_v36, %v2438_v15  ;;  %v2198_v53 = vshll.u32 %v6256_v30, 16  ;;  %v2665_v30 = vsel %vm1712_vm5, %v2660_v60, %v2664_v63  ;;  %v2210_v36 = vshll.u32 %v6259_v9, 16  ;;  %v6337_v15 = vld [vmem:[#allocation2 + $0x34] sm:$0xf]  ;;  %v1491_v9 = vld [vmem:[#allocation2 + $0x3c] sm:$0xe] }
 0x210   : > { %3858 = vmatprep.mubr.bf16.mxu0 %v7433_v18  ;;  %v5061_v39 = vcombine.low %v1490_v19, %v6337_v15  ;;  %v7484_v63 = vcombine.low %v1512_v48, %v7477_v40  ;;  %v6266_v19 = vld [vmem:[#allocation2 + $0x44] ss:$0 sps:$4 sm:$0x11]   ;;  %v1492_v15 = vld [vmem:[#allocation2 + $0x48] sm:$0xe]  ;;  %v2241_v48 = vshll.u32 %v7182_v2, 16 }
 0x211   : > { %v2200_v42 = vrot.slane %v2198_v53, 1 }
 0x212   : > { %v2443_v59 = vrot.slane %v5061_v39, 1 }
 0x213   : > { %v2201_v27 = vsel %vm1712_vm5, %v2196_v62, %v2200_v42  ;;  %v2229_v42 = vshll.u32 %v7145_v24, 16 }
 0x214   : > { %3698 = vmatmul.mubr.bf16.gmra.mrb[76].mxu1 %v7402_v28  ;;  %v7446_v28 = vld [vmem:[#allocation2 + $0x34] sm:$0xf] }
 0x215   : > { %3899 = vmatprep.mubr.bf16.mxu1 %v2436_v61  ;;  %v7452_v55 = vcombine.low %v1508_v38, %v7446_v28  ;;  %v1510_v61 = vld [vmem:[#allocation2 + $0x3c] sm:$0xf]  ;;  %v2203_v38 = vshrl.u32 %v7091_v14, 16  ;;  %v2217_v14 = vshll.u32 %v7129_v58, 16  ;;  %v7495_v58 = vadd.f32 %v7380_v3, %v7366_v45 }
 0x216   : > { %v7468_v33 = vcombine.low %v1510_v61, %v7461_v32  ;;  %v2227_v45 = vshrl.u32 %v7145_v24, 16  ;;  %v2231_v3 = vrot.slane %v2229_v42, 1  ;;  %v2253_v42 = vshll.u32 %v7207_v8, 16 }
 0x217   : > { %3859 = vmatmul.mubr.bf16.gmra.mrb[76].mxu0 %v2017_v26  ;;  %v2669_v51 = vshll.u32 %v7452_v55, 16  ;;  %v2667_v52 = vshrl.u32 %v7452_v55, 16  ;;  %v6263_v26 = vld [vmem:[#allocation2 + $0x38] ss:$0 sps:$4 sm:$0x11]   ;;  %v2219_v62 = vrot.slane %v2217_v14, 1 }
 0x218   : > { %4060 = vmatprep.mubr.bf16.mxu0 %v2653_v1  ;;  %v2676_v1 = vrot.slane %v2674_v34, 1  ;;  %v2681_v57 = vshll.u32 %v7468_v33, 16  ;;  %v2679_v53 = vshrl.u32 %v7468_v33, 16  ;;  %v2222_v61 = vshll.u32 %v6263_v26, 16 }
 0x219   : > { %v2671_v13 = vrot.slane %v2669_v51, 1  ;;  %v6290_v51 = vld [vmem:[#allocation8 + $0x228] sm:$0xff]   ;;  %v7490_v34 = vld [vmem:[#allocation2 + $0x50] ss:$0 sps:$4 sm:$0x11]  }
 0x21a   : > { %v2683_v60 = vrot.slane %v2681_v57, 1  ;;  %v1516_v57 = vld [vmem:[#allocation2 + $0x60] sm:$0xf] }
 0x21b   : > { %v2672_v21 = vor.u32 %v2671_v13, %v2667_v52  ;;  %v2693_v13 = vshll.u32 %v7484_v63, 16 }
 0x21c   : > { %3900 = vmatmul.mubr.bf16.vlgmr.msra.gmra.mrb[80].mxu1 %v2189_v0  ;;  %v2212_v0 = vrot.slane %v2210_v36, 1  ;;  %v7497_v36 = vld [vmem:[#allocation2 + $0x58] sm:$0xf] }
 0x21d   : > { %5891 = vmatpush3.bf16.msra.mxu1 %v6336_v43  ;;  %3907 = vmatprep.mubr.bf16.mxu1 %v2439_v56  ;;  %v2444_v56 = vrot.slane %v6263_v26, 1  ;;  %v2686_v43 = vshll.u32 %v7473_v17, 16  ;;  %v2677_v49 = vsel %vm1712_vm5, %v2672_v21, %v2676_v1  ;;  %v7501_v26 = vadd.f32 %v7398_v11, %v7388_v37  ;;  %v7511_v37 = vld [vmem:[#allocation2 + $0x64] sm:$0xf]  ;;  %v6304_v11 = vld [vmem:[#allocation8 + $0x238] sm:$0xff]  }
 0x21e   : > { %5892 = vmatprep.subr.bf16.mxu1 %v6262_v12  ;;  %v2691_v21 = vshrl.u32 %v7484_v63, 16  ;;  %v2698_v1 = vshll.u32 %v7490_v34, 16  ;;  %v2695_v14 = vrot.slane %v2693_v13, 1  ;;  %v6341_v13 = vld [vmem:[#allocation2 + $0x64] sm:$0xf] }
 0x21f   : > { %4061 = vmatmul.mubr.bf16.vlgmr.msra.gmra.mrb[80].mxu0 %v7425_v41  ;;  %v2442_v41 = vsel %vm1969_vm6, %v2440_v25, %v2441_v44  ;;  %v6338_v25 = vld [vmem:[#allocation2 + $0x40] sm:$0xf]  ;;  %v2688_v52 = vrot.slane %v2686_v43, 1 }
 0x220   : > { %4068 = vmatprep.mubr.bf16.mxu0 %v2665_v30  ;;  %v5062_v44 = vcombine.low %v1491_v9, %v6338_v25  ;;  %v2684_v30 = vor.u32 %v2683_v60, %v2679_v53  ;;  %v7514_v9 = vld [vmem:[#allocation2 + $0x60] sm:$0xe]  ;;  %v7518_v53 = vld [vmem:[#allocation2 + $0x5c] ss:$0 sps:$4 sm:$0x11]  }
 0x221   : > { %5893 = vmatpush3.bf16.msra.mxu1 %v6262_v12  ;;  %v2208_v12 = vor.u32 %v2207_v16, %v2203_v38  ;;  %v2224_v38 = vrot.slane %v2222_v61, 1  ;;  %v1514_v16 = vld [vmem:[#allocation2 + $0x54] sm:$0xf]  ;;  %v7520_v60 = vld [vmem:[#allocation2 + $0x6c] sm:$0xe]  ;;  %v2232_v61 = vor.u32 %v2231_v3, %v2227_v45 }
 0x222   : > { %5894 = vmatprep.subr.bf16.mxu1 %v6269_v10  ;;  %v2446_v39 = vrot.slane %v5062_v44, 1  ;;  %v6277_v3 = vld [vmem:[#allocation2 + $0x68] ss:$0 sps:$4 sm:$0x11]  }
 0x224   : > { %3908 = vmatmul.mubr.bf16.gmra.mrb[84].mxu1 %v2201_v27  ;;  %v2220_v27 = vor.u32 %v2219_v62, %v2215_v5  ;;  %v7525_v5 = vcombine.low %v1516_v57, %v7511_v37  ;;  %v2696_v62 = vor.u32 %v2695_v14, %v2691_v21  ;;  %v2265_v21 = vshll.u32 %v7247_v7, 16 }
 0x225   : > { %3915 = vmatprep.mubr.bf16.mxu1 %v2442_v41  ;;  %5895 = vmatpush3.bf16.msra.mxu1 %v6269_v10  ;;  %v2213_v10 = vsel %vm1712_vm5, %v2208_v12, %v2212_v0  ;;  %v2447_v41 = vrot.slane %v6266_v19, 1  ;;  %v2234_v12 = vshll.u32 %v6266_v19, 16  ;;  %v7509_v0 = vcombine.low %v1514_v16, %v7497_v36  ;;  %v7528_v19 = vld [vmem:[#allocation2 + $0x70] sm:$0xf] }
 0x226   : > { %5896 = vmatprep.subr.bf16.mxu1 %v6276_v4  ;;  %v7532_v16 = vld [vmem:[#allocation2 + $0x68] ss:$0 sps:$4 sm:$0x11]   ;;  %v2717_v45 = vshll.u32 %v7525_v5, 16 }
 0x227   : > { %4069 = vmatmul.mubr.bf16.gmra.mrb[84].mxu0 %v7436_v29  ;;  %v2445_v29 = vsel %vm1969_vm6, %v2443_v59, %v2444_v56  ;;  %v6339_v59 = vld [vmem:[#allocation2 + $0x4c] sm:$0xf]  ;;  %v1493_v56 = vld [vmem:[#allocation2 + $0x54] sm:$0xe]  ;;  %v2448_v43 = vsel %vm1969_vm6, %v2446_v39, %v2447_v41  ;;  %v2236_v25 = vrot.slane %v2234_v12, 1  ;;  %v2705_v44 = vshll.u32 %v7509_v0, 16 }
 0x228   : > { %4076 = vmatprep.mubr.bf16.mxu0 %v2677_v49  ;;  %v5063_v24 = vcombine.low %v1492_v15, %v6339_v59  ;;  %v6270_v49 = vld [vmem:[#allocation2 + $0x50] ss:$0 sps:$4 sm:$0x11]   ;;  %v2710_v15 = vshll.u32 %v7518_v53, 16  ;;  %v2239_v39 = vshrl.u32 %v7182_v2, 16  ;;  %v2243_v41 = vrot.slane %v2241_v48, 1 }
 0x229   : > { %5897 = vmatpush3.bf16.msra.mxu1 %v6276_v4  ;;  %v6297_v4 = vld [vmem:[#allocation8 + $0x230] sm:$0xff]   ;;  %v2237_v14 = vsel %vm1712_vm5, %v2232_v61, %v2236_v25  ;;  %v2703_v2 = vshrl.u32 %v7509_v0, 16  ;;  %v2707_v12 = vrot.slane %v2705_v44, 1  ;;  %v7547_v48 = vld [vmem:[#allocation2 + $0x74] ss:$0 sps:$4 sm:$0x11]  }
 0x22a   : > { %5898 = vmatprep.subr.bf16.mxu1 %v6283_v20  ;;  %v2246_v59 = vshll.u32 %v6270_v49, 16  ;;  %v2719_v61 = vrot.slane %v2717_v45, 1  ;;  %v2722_v25 = vshll.u32 %v7532_v16, 16  ;;  %v7555_v44 = vld [vmem:[#allocation2 + $0x7c] sm:$0xf] }
 0x22c   : > { %3916 = vmatmul.mubr.bf16.gmra.mrb[88].mxu1 %v2213_v10  ;;  %v7522_v10 = vld [vmem:[#allocation2 + $0x5c] ss:$0 sps:$4 sm:$0x11]  }
 0x22d   : > { %3923 = vmatprep.mubr.bf16.mxu1 %v2445_v29  ;;  %5899 = vmatpush3.bf16.msra.mxu1 %v6283_v20  ;;  %v2689_v20 = vsel %vm1712_vm5, %v2684_v30, %v2688_v52  ;;  %v1518_v29 = vld [vmem:[#allocation2 + $0x6c] sm:$0xf]  ;;  %v6340_v30 = vld [vmem:[#allocation2 + $0x58] sm:$0xf] }
 0x22e   : > { %5900 = vmatprep.subr.bf16.mxu1 %v6290_v51  ;;  %v5064_v52 = vcombine.low %v1493_v56, %v6340_v30  ;;  %v7541_v57 = vcombine.low %v1518_v29, %v7528_v19  ;;  %v2255_v56 = vrot.slane %v2253_v42, 1  ;;  %v2263_v29 = vshrl.u32 %v7247_v7, 16  ;;  %v7564_v7 = vld [vmem:[#allocation2 + $0x74] ss:$0 sps:$4 sm:$0x11]  }
 0x22f   : > { %4077 = vmatmul.mubr.bf16.gmra.mrb[88].mxu0 %v7452_v55  ;;  %v2225_v55 = vsel %vm1712_vm5, %v2220_v27, %v2224_v38  ;;  %v5065_v27 = vcombine.low %v7514_v9, %v6341_v13  ;;  %v2449_v38 = vrot.slane %v5063_v24, 1  ;;  %v2251_v24 = vshrl.u32 %v7207_v8, 16 }
 0x230   : > { %4084 = vmatprep.mubr.bf16.mxu0 %v2689_v20  ;;  %v2258_v9 = vshll.u32 %v7522_v10, 16  ;;  %v2708_v8 = vor.u32 %v2707_v12, %v2703_v2  ;;  %v2267_v42 = vrot.slane %v2265_v21, 1  ;;  %v2270_v30 = vshll.u32 %v6277_v3, 16 }
 0x231   : > { %5901 = vmatpush3.bf16.msra.mxu1 %v6290_v51  ;;  %v2700_v51 = vrot.slane %v2698_v1, 1  ;;  %v5066_v1 = vcombine.low %v7520_v60, %v7249_v46  ;;  %v2248_v13 = vrot.slane %v2246_v59, 1  ;;  %v2727_v2 = vshrl.u32 %v7541_v57, 16  ;;  %v1523_v46 = vld [vmem:[#allocation2 + $0x88] sm:$0xf] }
 0x232   : > { %5902 = vmatprep.subr.bf16.mxu1 %v6297_v4  ;;  %v2268_v21 = vor.u32 %v2267_v42, %v2263_v29  ;;  %v2272_v59 = vrot.slane %v2270_v30, 1  ;;  %v2275_v42 = vshrl.u32 %v7266_v31, 16  ;;  %v1522_v30 = vld [vmem:[#allocation2 + $0x84] sm:$0xf]  ;;  %v2905_v60 = vrot.slane %v7457_v50, 1 }
 0x233   : > { %v2701_v20 = vsel %vm1712_vm5, %v2696_v62, %v2700_v51  ;;  %v1520_v51 = vld [vmem:[#allocation2 + $0x78] sm:$0xf]  ;;  %v2715_v62 = vshrl.u32 %v7525_v5, 16  ;;  %v2911_v50 = vrot.slane %v7490_v34, 1 }
 0x234   : > { %3924 = vmatmul.mubr.bf16.gmra.mrb[92].mxu1 %v2225_v55  ;;  %v2244_v55 = vor.u32 %v2243_v41, %v2239_v39  ;;  %v2456_v39 = vrot.slane %v6277_v3, 1  ;;  %v2734_v41 = vshll.u32 %v7547_v48, 16  ;;  %v7561_v45 = vcombine.low %v1520_v51, %v7555_v44  ;;  %v7618_v34 = vld [vmem:[#allocation2 + $0xb0] ss:$0 sps:$4 sm:$0x11]  }
 0x235   : > { %3931 = vmatprep.mubr.bf16.mxu1 %v2448_v43  ;;  %5903 = vmatpush3.bf16.msra.mxu1 %v6297_v4  ;;  %v2450_v4 = vrot.slane %v6270_v49, 1  ;;  %v2452_v43 = vrot.slane %v5064_v52, 1  ;;  %v2729_v49 = vshll.u32 %v7541_v57, 16  ;;  %v2256_v52 = vor.u32 %v2255_v56, %v2251_v24 }
 0x236   : > { %5904 = vmatprep.subr.bf16.mxu1 %v6304_v11  ;;  %v2277_v3 = vshll.u32 %v7266_v31, 16  ;;  %v2249_v24 = vsel %vm1712_vm5, %v2244_v55, %v2248_v13  ;;  %v7580_v55 = vrot.slane %v5066_v1, 1 }
 0x237   : > { %4085 = vmatmul.mubr.bf16.gmra.mrb[92].mxu0 %v7468_v33  ;;  %v2712_v33 = vrot.slane %v2710_v15, 1  ;;  %v2455_v15 = vrot.slane %v5065_v27, 1  ;;  %v2731_v12 = vrot.slane %v2729_v49, 1  ;;  %v7568_v27 = vld [vmem:[#allocation2 + $0x80] ss:$0 sps:$4 sm:$0x11]  }
 0x238   : > { %4092 = vmatprep.mubr.bf16.mxu0 %v2701_v20  ;;  %v2720_v20 = vor.u32 %v2719_v61, %v2715_v62  ;;  %v1555_v62 = vld [vmem:[#allocation2 + $0x3c] sm:$0xe]  ;;  %v1556_v49 = vld [vmem:[#allocation2 + $0x48] sm:$0xe]  ;;  %v2746_v29 = vshll.u32 %v7568_v27, 16 }
 0x239   : > { %5905 = vmatpush3.bf16.msra.mxu1 %v6304_v11  ;;  %v2451_v11 = vsel %vm1969_vm6, %v2449_v38, %v2450_v4  ;;  %v2453_v38 = vrot.slane %v7522_v10, 1  ;;  %v2260_v4 = vrot.slane %v2258_v9, 1  ;;  %v2713_v10 = vsel %vm1712_vm5, %v2708_v8, %v2712_v33  ;;  %v1554_v9 = vld [vmem:[#allocation2 + $0x30] sm:$0xe] }
 0x23a   : > { %v2457_v51 = vsel %vm1969_vm6, %v2455_v15, %v2456_v39  ;;  %v2741_v33 = vshll.u32 %v7561_v45, 16  ;;  %v7584_v8 = vsel %vm1712_vm5, %v2268_v21, %v2272_v59  ;;  %v5108_v13 = vcombine.low %v1554_v9, %v7446_v28  ;;  %v7596_v39 = vld [vmem:[#allocation2 + $0x8c] ss:$0 sps:$4 sm:$0x11]   ;;  %v1558_v28 = vld [vmem:[#allocation2 + $0x60] sm:$0xe] }
 0x23b   : > { %v2454_v56 = vsel %vm1969_vm6, %v2452_v43, %v2453_v38  ;;  %v2459_v43 = vrot.slane %v7564_v7, 1  ;;  %v1557_v38 = vld [vmem:[#allocation2 + $0x54] sm:$0xe]  ;;  %v5109_v1 = vcombine.low %v1555_v62, %v7461_v32  ;;  %v1559_v21 = vld [vmem:[#allocation2 + $0x6c] sm:$0xe]  ;;  %v2917_v62 = vrot.slane %v7532_v16, 1 }
 0x23c   : > { %3932 = vmatmul.mubr.bf16.gmra.mrb[96].mxu1 %v2237_v14  ;;  %v2724_v14 = vrot.slane %v2722_v25, 1  ;;  %v2732_v25 = vor.u32 %v2731_v12, %v2727_v2  ;;  %v7594_v15 = vrot.slane %v2741_v33, 1  ;;  %v7603_v12 = vld [vmem:[#allocation2 + $0x98] ss:$0 sps:$4 sm:$0x11]   ;;  %v5111_v32 = vcombine.low %v1557_v38, %v7497_v36 }
 0x23d   : > { %3939 = vmatprep.mubr.bf16.mxu1 %v2451_v11  ;;  %v2261_v11 = vsel %vm1712_vm5, %v2256_v52, %v2260_v4  ;;  %v2739_v52 = vshrl.u32 %v7561_v45, 16  ;;  %v7590_v4 = vrot.slane %v2277_v3, 1  ;;  %v1560_v59 = vld [vmem:[#allocation2 + $0x78] sm:$0xe]  ;;  %v7608_v3 = vcombine.low %v1522_v30, %v1523_v46  ;;  %v1561_v9 = vld [vmem:[#allocation2 + $0x84] sm:$0xe] }
 0x23e   : > { %v2725_v61 = vsel %vm1712_vm5, %v2720_v20, %v2724_v14  ;;  %v2908_v20 = vrot.slane %v7473_v17, 1  ;;  %v5110_v14 = vcombine.low %v1556_v49, %v7477_v40  ;;  %v7610_v17 = vld [vmem:[#allocation2 + $0xa4] ss:$0 sps:$4 sm:$0x11]   ;;  %v5112_v33 = vcombine.low %v1558_v28, %v7511_v37  ;;  %v7625_v49 = vld [vmem:[#allocation2 + $0xa0] sm:$0xf] }
 0x23f   : > { %4093 = vmatmul.mubr.bf16.gmra.mrb[96].mxu0 %v7484_v63  ;;  %v2736_v63 = vrot.slane %v2734_v41, 1  ;;  %v2904_v41 = vrot.slane %v5108_v13, 1  ;;  %v7627_v30 = vld [vmem:[#allocation2 + $0xbc] ss:$0 sps:$4 sm:$0x11]   ;;  %v2920_v13 = vrot.slane %v7547_v48, 1  ;;  %v5114_v38 = vcombine.low %v1560_v59, %v7555_v44 }
 0x240   : > { %4100 = vmatprep.mubr.bf16.mxu0 %v2713_v10  ;;  %v2907_v10 = vrot.slane %v5109_v1, 1  ;;  %v7635_v37 = vld [vmem:[#allocation2 + $0xc8] ss:$0 sps:$4 sm:$0x11]   ;;  %v2923_v1 = vrot.slane %v7568_v27, 1  ;;  %v2926_v28 = vrot.slane %v7596_v39, 1  ;;  %v2280_v27 = vor.u32 %v7590_v4, %v2275_v42 }
 0x241   : > { %v7601_v2 = vsel %vm1712_vm5, %v2732_v25, %v2736_v63  ;;  %v7613_v40 = vsel %vm1969_vm6, %v2904_v41, %v2905_v60  ;;  %v7616_v63 = vld [vmem:[#allocation2 + $0x94] sm:$0xf]  ;;  %v1562_v25 = vld [vmem:[#allocation2 + $0x90] sm:$0xe]  ;;  %v1563_v60 = vld [vmem:[#allocation2 + $0x9c] sm:$0xe]  ;;  %v5115_v41 = vcombine.low %v1561_v9, %v1523_v46 }
 0x242   : > { %v7621_v36 = vsel %vm1969_vm6, %v2907_v10, %v2908_v20  ;;  %v1564_v48 = vld [vmem:[#allocation2 + $0xa8] sm:$0xe]  ;;  %v2929_v10 = vrot.slane %v7603_v12, 1  ;;  %v1496_v59 = vld [vmem:[#allocation2 + $0x78] sm:$0xe] }
 0x243   : > { %v7712_v42 = vld [vmem:[#allocation2 + $0xd4] ss:$0 sps:$4 sm:$0x11]  }
 0x244   : > { %3940 = vmatmul.mubr.bf16.gmra.mrb[100].mxu1 %v2249_v24  ;;  %v2910_v24 = vrot.slane %v5110_v14, 1  ;;  %v2922_v14 = vrot.slane %v5114_v38, 1 }
 0x245   : > { %3947 = vmatprep.mubr.bf16.mxu1 %v2454_v56  ;;  %v2914_v56 = vrot.slane %v7518_v53, 1 }
 0x246   : > { %v7630_v53 = vsel %vm1969_vm6, %v2910_v24, %v2911_v50  ;;  %v5117_v50 = vcombine.low %v1563_v60, %v7625_v49  ;;  %v7648_v24 = vld [vmem:[#allocation2 + $0xac] sm:$0xf]  ;;  %v2935_v60 = vrot.slane %v7618_v34, 1 }
 0x247   : > { %4101 = vmatmul.mubr.bf16.gmra.mrb[100].mxu0 %v7509_v0  ;;  %v2913_v0 = vrot.slane %v5111_v32, 1  ;;  %v1565_v32 = vld [vmem:[#allocation2 + $0xb4] sm:$0xe]  ;;  %v5118_v38 = vcombine.low %v1564_v48, %v7648_v24 }
 0x248   : > { %4108 = vmatprep.mubr.bf16.mxu0 %v2725_v61  ;;  %v5113_v61 = vcombine.low %v1559_v21, %v7528_v19  ;;  %v5116_v19 = vcombine.low %v1562_v25, %v7616_v63  ;;  %v1566_v21 = vld [vmem:[#allocation2 + $0xc0] sm:$0xe] }
 0x249   : > { %v7638_v16 = vsel %vm1969_vm6, %v2913_v0, %v2914_v56  ;;  %v7654_v56 = vsel %vm1969_vm6, %v2922_v14, %v2923_v1  ;;  %v2932_v0 = vrot.slane %v7610_v17, 1  ;;  %v2938_v1 = vrot.slane %v7627_v30, 1 }
 0x24a   : > { %v2919_v20 = vrot.slane %v5113_v61, 1  ;;  %v2928_v9 = vrot.slane %v5116_v19, 1  ;;  %v2931_v61 = vrot.slane %v5117_v50, 1  ;;  %v2941_v19 = vrot.slane %v7635_v37, 1 }
 0x24c   : > { %3948 = vmatmul.mubr.bf16.gmra.mrb[104].mxu1 %v2261_v11  ;;  %v2916_v11 = vrot.slane %v5112_v33, 1  ;;  %v7651_v46 = vsel %vm1969_vm6, %v2919_v20, %v2920_v13  ;;  %v7657_v33 = vld [vmem:[#allocation2 + $0xb8] sm:$0xf]  ;;  %v7668_v13 = vsel %vm1969_vm6, %v2928_v9, %v2929_v10  ;;  %v2282_v20 = vshll.u32 %v7564_v7, 16  ;;  %v1524_v9 = vld [vmem:[#allocation2 + $0x90] sm:$0xf] }
 0x24d   : > { %3955 = vmatprep.mubr.bf16.mxu1 %v2457_v51  ;;  %v2925_v51 = vrot.slane %v5115_v41, 1  ;;  %v7676_v14 = vsel %vm1969_vm6, %v2931_v61, %v2932_v0  ;;  %v6284_v10 = vld [vmem:[#allocation2 + $0x80] ss:$0 sps:$4 sm:$0x11]   ;;  %v7710_v31 = vcombine.low %v1524_v9, %v7616_v63  ;;  %v2944_v63 = vrot.slane %v7712_v42, 1 }
 0x24e   : > { %v7644_v44 = vsel %vm1969_vm6, %v2916_v11, %v2917_v62  ;;  %v7659_v62 = vld [vmem:[#allocation2 + $0xc4] sm:$0xf]  ;;  %v5119_v11 = vcombine.low %v1565_v32, %v7657_v33  ;;  %v2748_v32 = vrot.slane %v2746_v29, 1  ;;  %v2284_v29 = vrot.slane %v2282_v20, 1 }
 0x24f   : > { %v7662_v25 = vsel %vm1969_vm6, %v2925_v51, %v2926_v28  ;;  %4109 = vmatmul.mubr.bf16.gmra.mrb[104].mxu0 %v7525_v5  ;;  %v5120_v41 = vcombine.low %v1566_v21, %v7659_v62  ;;  %v2934_v28 = vrot.slane %v5118_v38, 1  ;;  %v6342_v5 = vld [vmem:[#allocation2 + $0x7c] sm:$0xf]  ;;  %v2460_v51 = vsel %vm1969_vm6, %v7580_v55, %v2459_v43  ;;  %v1497_v38 = vld [vmem:[#allocation2 + $0x84] sm:$0xe] }
 0x250   : > { %4116 = vmatprep.mubr.bf16.mxu0 %v7601_v2  ;;  %v5067_v48 = vcombine.low %v1496_v59, %v6342_v5  ;;  %v2937_v50 = vrot.slane %v5119_v11, 1  ;;  %v2744_v59 = vor.u32 %v7594_v15, %v2739_v52  ;;  %v2289_v43 = vshll.u32 %v7293_v23, 16  ;;  %v7704_v15 = vld [vmem:[#allocation2 + $0xd0] sm:$0xf] }
 0x251   : > { %v2940_v2 = vrot.slane %v5120_v41, 1  ;;  %v7687_v21 = vsel %vm1969_vm6, %v2934_v28, %v2935_v60  ;;  %v2462_v61 = vrot.slane %v6284_v10, 1  ;;  %v2758_v52 = vshll.u32 %v7596_v39, 16  ;;  %v1567_v28 = vld [vmem:[#allocation2 + $0xcc] sm:$0xe] }
 0x252   : > { %v7694_v7 = vsel %vm1969_vm6, %v2937_v50, %v2938_v1  ;;  %v2461_v0 = vrot.slane %v5067_v48, 1  ;;  %v2749_v60 = vsel %vm1712_vm5, %v2744_v59, %v2748_v32  ;;  %v2751_v11 = vshrl.u32 %v7608_v3, 16  ;;  %v6287_v48 = vld [vmem:[#allocation2 + $0x8c] ss:$0 sps:$4 sm:$0x11]  }
 0x253   : > { %v7697_v55 = vsel %vm1969_vm6, %v2940_v2, %v2941_v19  ;;  %v2285_v4 = vsel %vm1712_vm5, %v2280_v27, %v2284_v29  ;;  %v2287_v41 = vshrl.u32 %v7293_v23, 16  ;;  %v2291_v39 = vrot.slane %v2289_v43, 1  ;;  %v6343_v19 = vld [vmem:[#allocation2 + $0x88] sm:$0xf]  ;;  %v1526_v43 = vld [vmem:[#allocation2 + $0x9c] sm:$0xf] }
 0x254   : > { %3956 = vmatmul.mubr.bf16.gmra.mrb[108].mxu1 %v7584_v8  ;;  %v2753_v8 = vshll.u32 %v7608_v3, 16  ;;  %v2294_v20 = vshll.u32 %v6284_v10, 16  ;;  %v2463_v5 = vsel %vm1969_vm6, %v2461_v0, %v2462_v61  ;;  %v2301_v50 = vshll.u32 %v7323_v54, 16  ;;  %v1498_v0 = vld [vmem:[#allocation2 + $0x90] sm:$0xe] }
 0x255   : > { %3963 = vmatprep.mubr.bf16.mxu1 %v2460_v51  ;;  %v5121_v51 = vcombine.low %v1567_v28, %v7704_v15  ;;  %v2760_v32 = vrot.slane %v2758_v52, 1  ;;  %v2765_v23 = vshll.u32 %v7710_v31, 16  ;;  %v2292_v10 = vor.u32 %v2291_v39, %v2287_v41 }
 0x256   : > { %v2755_v1 = vrot.slane %v2753_v8, 1  ;;  %v2296_v8 = vrot.slane %v2294_v20, 1  ;;  %v2465_v29 = vrot.slane %v6287_v48, 1  ;;  %v2770_v61 = vshll.u32 %v7603_v12, 16  ;;  %v6344_v20 = vld [vmem:[#allocation2 + $0x94] sm:$0xf] }
 0x257   : > { %4117 = vmatmul.mubr.bf16.gmra.mrb[108].mxu0 %v7541_v57  ;;  %v5068_v57 = vcombine.low %v1497_v38, %v6343_v19  ;;  %v2943_v59 = vrot.slane %v5121_v51, 1  ;;  %v2299_v38 = vshrl.u32 %v7323_v54, 16  ;;  %v7730_v41 = vcombine.low %v1526_v43, %v7625_v49  ;;  %v6291_v12 = vld [vmem:[#allocation2 + $0x98] ss:$0 sps:$4 sm:$0x11]  }
 0x258   : > { %4124 = vmatprep.mubr.bf16.mxu0 %v2749_v60  ;;  %v2756_v2 = vor.u32 %v2755_v1, %v2751_v11  ;;  %v2303_v60 = vrot.slane %v2301_v50, 1  ;;  %v2763_v11 = vshrl.u32 %v7710_v31, 16  ;;  %v2767_v1 = vrot.slane %v2765_v23, 1 }
 0x259   : > { %v2464_v27 = vrot.slane %v5068_v57, 1  ;;  %v7722_v9 = vsel %vm1969_vm6, %v2943_v59, %v2944_v63  ;;  %v2297_v39 = vsel %vm1712_vm5, %v2292_v10, %v2296_v8  ;;  %v5069_v28 = vcombine.low %v1498_v0, %v6344_v20  ;;  %v1528_v63 = vld [vmem:[#allocation2 + $0xa8] sm:$0xf] }
 0x25a   : > { %v2761_v52 = vsel %vm1712_vm5, %v2756_v2, %v2760_v32  ;;  %v2304_v19 = vor.u32 %v2303_v60, %v2299_v38  ;;  %v2768_v57 = vor.u32 %v2767_v1, %v2763_v11  ;;  %v2777_v49 = vshll.u32 %v7730_v41, 16  ;;  %v1499_v32 = vld [vmem:[#allocation2 + $0x9c] sm:$0xe] }
 0x25b   : > { %v2466_v54 = vsel %vm1969_vm6, %v2464_v27, %v2465_v29  ;;  %v2313_v51 = vshll.u32 %v7362_v6, 16  ;;  %v2467_v50 = vrot.slane %v5069_v28, 1  ;;  %v2468_v2 = vrot.slane %v6291_v12, 1 }
 0x25c   : > { %3964 = vmatmul.mubr.bf16.gmra.mrb[112].mxu1 %v2285_v4  ;;  %v2306_v4 = vshll.u32 %v6287_v48, 16  ;;  %v7737_v48 = vld [vmem:[%s8185_s4] ss:$0 sm:$0xff]  ;;  %v2782_v10 = vshll.u32 %v7610_v17, 16  ;;  %v2775_v27 = vshrl.u32 %v7730_v41, 16  ;;  %v2779_v29 = vrot.slane %v2777_v49, 1 }
 0x25d   : > { %3971 = vmatprep.mubr.bf16.mxu1 %v2463_v5  ;;  %v2772_v5 = vrot.slane %v2770_v61, 1  ;;  %v3580_v59 = vadd.f32 %v7495_v58, %v7737_v48  ;;  %v7749_v61 = vcombine.low %v1528_v63, %v7648_v24  ;;  %v2315_v58 = vrot.slane %v2313_v51, 1  ;;  %v6345_v17 = vld [vmem:[#allocation2 + $0xa0] sm:$0xf]  ;;  %v1530_v49 = vld [vmem:[#allocation2 + $0xb4] sm:$0xf] }
 0x25e   : > { %v5070_v11 = vcombine.low %v1499_v32, %v6345_v17  ;;  %v2325_v20 = vshll.u32 %v7390_v47, 16  ;;  %v3583_v24 = vadd.f32 %v7501_v26, %v7737_v48  ;;  %v2794_v32 = vshll.u32 %v7618_v34, 16 }
 0x25f   : > { %4125 = vmatmul.mubr.bf16.gmra.mrb[112].mxu0 %v7561_v45  ;;  %v2308_v45 = vrot.slane %v2306_v4, 1  ;;  %v2773_v43 = vsel %vm1712_vm5, %v2768_v57, %v2772_v5  ;;  %v2311_v4 = vshrl.u32 %v7362_v6, 16  ;;  %v2784_v6 = vrot.slane %v2782_v10, 1 }
 0x260   : > { %4132 = vmatprep.mubr.bf16.mxu0 %v2761_v52  ;;  %v2318_v52 = vshll.u32 %v6291_v12, 16  ;;  %v2789_v12 = vshll.u32 %v7749_v61, 16  ;;  %v2470_v51 = vrot.slane %v5070_v11, 1  ;;  %v2323_v26 = vshrl.u32 %v7390_v47, 16  ;;  %v1532_v11 = vld [vmem:[#allocation2 + $0xc0] sm:$0xf] }
 0x261   : > { %v2309_v23 = vsel %vm1712_vm5, %v2304_v19, %v2308_v45  ;;  %v2780_v19 = vor.u32 %v2779_v29, %v2775_v27  ;;  %v2316_v57 = vor.u32 %v2315_v58, %v2311_v4  ;;  %v6346_v29 = vld [vmem:[#allocation2 + $0xac] sm:$0xf]  ;;  %v2337_v47 = vshll.u32 %v7412_v22, 16 }
 0x262   : > { %v2320_v5 = vrot.slane %v2318_v52, 1  ;;  %v2791_v10 = vrot.slane %v2789_v12, 1 }
 0x264   : > { %3972 = vmatmul.mubr.bf16.gmra.mrb[116].mxu1 %v2297_v39  ;;  %v6294_v39 = vld [vmem:[#allocation2 + $0xa4] ss:$0 sps:$4 sm:$0x11]   ;;  %v2321_v27 = vsel %vm1712_vm5, %v2316_v57, %v2320_v5 }
 0x265   : > { %3979 = vmatprep.mubr.bf16.mxu1 %v2466_v54  ;;  %v2471_v63 = vrot.slane %v6294_v39, 1 }
 0x267   : > { %4133 = vmatmul.mubr.bf16.gmra.mrb[116].mxu0 %v7608_v3  ;;  %v2469_v3 = vsel %vm1969_vm6, %v2467_v50, %v2468_v2  ;;  %v1500_v50 = vld [vmem:[#allocation2 + $0xa8] sm:$0xe]  ;;  %v2787_v2 = vshrl.u32 %v7749_v61, 16  ;;  %v2472_v34 = vsel %vm1969_vm6, %v2470_v51, %v2471_v63  ;;  %v2339_v51 = vrot.slane %v2337_v47, 1 }
 0x268   : > { %4140 = vmatprep.mubr.bf16.mxu0 %v2773_v43  ;;  %v7767_v43 = vcombine.low %v1530_v49, %v7657_v33 }
 0x269   : > { %v5474_v8 = vpop.f32.mrb[16].mxu0 }
 0x26a   : > { %v5475_v0 = vpop.f32.mrb[17].mxu0  ;;  %v2801_v52 = vshll.u32 %v7767_v43, 16  ;;  %v2799_v49 = vshrl.u32 %v7767_v43, 16 }
 0x26b   : > { %v5476_v38 = vadd.f32 %v5475_v0, %v5474_v8  ;;  %v5477_v60 = vpop.f32.mrb[18].mxu0  ;;  %v2330_v8 = vshll.u32 %v6294_v39, 16  ;;  %v5071_v0 = vcombine.low %v1500_v50, %v6346_v29  ;;  %v6301_v29 = vld [vmem:[#allocation2 + $0xbc] ss:$0 sps:$4 sm:$0x11]  }
 0x26c   : > { %3980 = vmatmul.mubr.bf16.gmra.mrb[120].mxu1 %v2309_v23  ;;  %v5478_v1 = vpop.f32.mrb[19].mxu0  ;;  %v2327_v23 = vrot.slane %v2325_v20, 1 }
 0x26d   : > { %3987 = vmatprep.mubr.bf16.mxu1 %v2469_v3  ;;  %v7756_v28 = vadd.f32 %v5476_v38, %v3580_v59  ;;  %v5479_v54 = vadd.f32 %v5478_v1, %v5477_v60  ;;  %v2785_v59 = vsel %vm1712_vm5, %v2780_v19, %v2784_v6  ;;  %v6298_v38 = vld [vmem:[#allocation2 + $0xb0] ss:$0 sps:$4 sm:$0x11]   ;;  %v2792_v60 = vor.u32 %v2791_v10, %v2787_v2  ;;  %v1501_v19 = vld [vmem:[#allocation2 + $0xb4] sm:$0xe] }
 0x26e   : > { %v2328_v4 = vor.u32 %v2327_v23, %v2323_v26  ;;  %v2332_v58 = vrot.slane %v2330_v8, 1  ;;  %v2473_v39 = vrot.slane %v5071_v0, 1  ;;  %v2474_v20 = vrot.slane %v6298_v38, 1  ;;  %v6347_v8 = vld [vmem:[#allocation2 + $0xb8] sm:$0xf] }
 0x26f   : > { %v7759_v45 = vadd.f32 %v5479_v54, %v3583_v24  ;;  %4141 = vmatmul.mubr.bf16.gmra.mrb[120].mxu0 %v7710_v31  ;;  %v2796_v31 = vrot.slane %v2794_v32, 1  ;;  %v2806_v24 = vshll.u32 %v7627_v30, 16  ;;  %v2335_v54 = vshrl.u32 %v7412_v22, 16 }
 0x270   : > { %4148 = vmatprep.mubr.bf16.mxu0 %v2785_v59  ;;  %v2333_v32 = vsel %vm1712_vm5, %v2328_v4, %v2332_v58  ;;  %v2803_v26 = vrot.slane %v2801_v52, 1  ;;  %v7780_v30 = vcombine.low %v1532_v11, %v7659_v62  ;;  %v2342_v10 = vshll.u32 %v6298_v38, 16  ;;  %v6324_v11 = vld [vmem:[#allocation9] sm:$0xff]  }
 0x271   : > { %v2797_v63 = vsel %vm1712_vm5, %v2792_v60, %v2796_v31  ;;  %v2349_v0 = vshll.u32 %v7421_v35, 16  ;;  %v1534_v31 = vld [vmem:[#allocation2 + $0xcc] sm:$0xf]  ;;  %v2808_v4 = vrot.slane %v2806_v24, 1  ;;  %v2818_v24 = vshll.u32 %v7635_v37, 16  ;;  %5938 = vmatprep.subr.bf16.mxu0 %v6324_v11 }
 0x272   : > { %v2804_v60 = vor.u32 %v2803_v26, %v2799_v49  ;;  %v2813_v58 = vshll.u32 %v7780_v30, 16  ;;  %5939 = vmatpush3.bf16.msra.mxu0 %v6324_v11 }
 0x273   : > { %v2351_v49 = vrot.slane %v2349_v0, 1 }
 0x274   : > { %3988 = vmatmul.mubr.bf16.gmra.mrb[124].mxu1 %v2321_v27  ;;  %v5072_v27 = vcombine.low %v1501_v19, %v6347_v8  ;;  %v2477_v19 = vrot.slane %v6301_v29, 1  ;;  %v2361_v8 = vshll.u32 %v7433_v18, 16 }
 0x275   : > { %3995 = vmatprep.mubr.bf16.mxu1 %v2472_v34  ;;  %v1502_v34 = vld [vmem:[#allocation2 + $0xc0] sm:$0xe] }
 0x277   : > { %v5368_v33 = vpop.f32.mrb[20].mxu1  ;;  %4149 = vmatmul.mubr.bf16.gmra.mrb[124].mxu0 %v7730_v41  ;;  %v2475_v41 = vsel %vm1969_vm6, %v2473_v39, %v2474_v20  ;;  %v2476_v20 = vrot.slane %v5072_v27, 1 }
 0x278   : > { %v5480_v17 = vpop.f32.mrb[20].mxu0  ;;  %v5369_v3 = vpop.f32.mrb[21].mxu1  ;;  %4156 = vmatprep.mubr.bf16.mxu0 %v2797_v63 }
 0x279   : > { %v5481_v1 = vpop.f32.mrb[21].mxu0  ;;  %v5370_v6 = vadd.f32 %v5369_v3, %v5368_v33  ;;  %v5371_v12 = vpop.f32.mrb[22].mxu1  ;;  %v2340_v33 = vor.u32 %v2339_v51, %v2335_v54  ;;  %v6348_v3 = vld [vmem:[#allocation2 + $0xc4] sm:$0xf]  ;;  %v2809_v54 = vsel %vm1712_vm5, %v2804_v60, %v2808_v4 }
 0x27a   : > { %v5482_v57 = vadd.f32 %v5481_v1, %v5480_v17  ;;  %v5483_v5 = vpop.f32.mrb[22].mxu0  ;;  %v5372_v50 = vpop.f32.mrb[23].mxu1  ;;  %v2344_v17 = vrot.slane %v2342_v10, 1  ;;  %v5073_v1 = vcombine.low %v1502_v34, %v6348_v3 }
 0x27b   : > { %v5484_v2 = vpop.f32.mrb[23].mxu0  ;;  %v3588_v22 = vadd.f32 %v5370_v6, %v7737_v48  ;;  %v5373_v23 = vadd.f32 %v5372_v50, %v5371_v12  ;;  %v7792_v6 = vcombine.low %v1534_v31, %v7704_v15  ;;  %v2811_v50 = vshrl.u32 %v7780_v30, 16 }
 0x27c   : > { %v5485_v59 = vadd.f32 %v5484_v2, %v5483_v5  ;;  %3996 = vmatmul.mubr.bf16.gmra.mrb[128].mxu1 %v2333_v32  ;;  %v2347_v5 = vshrl.u32 %v7421_v35, 16  ;;  %v2815_v2 = vrot.slane %v2813_v58, 1  ;;  %v2354_v32 = vshll.u32 %v6301_v29, 16  ;;  %v6305_v35 = vld [vmem:[#allocation2 + $0xc8] ss:$0 sps:$4 sm:$0x11]  }
 0x27d   : > { %v7785_v47 = vadd.f32 %v5482_v57, %v3588_v22  ;;  %v3591_v62 = vadd.f32 %v5373_v23, %v7737_v48  ;;  %4003 = vmatprep.mubr.bf16.mxu1 %v2475_v41  ;;  %v2345_v37 = vsel %vm1712_vm5, %v2340_v33, %v2344_v17  ;;  %v2825_v10 = vshll.u32 %v7792_v6, 16 }
 0x27e   : > { %v2820_v29 = vrot.slane %v2818_v24, 1  ;;  %v2352_v0 = vor.u32 %v2351_v49, %v2347_v5  ;;  %v2816_v31 = vor.u32 %v2815_v2, %v2811_v50  ;;  %v2356_v60 = vrot.slane %v2354_v32, 1  ;;  %v1552_v2 = vld [vmem:[#allocation2 + $0x18] sm:$0xe] }
 0x27f   : > { %v7789_v38 = vadd.f32 %v5485_v59, %v3591_v62  ;;  %v5374_v52 = vpop.f32.mrb[24].mxu1  ;;  %4157 = vmatmul.mubr.bf16.gmra.mrb[128].mxu0 %v7749_v61  ;;  %v2478_v61 = vsel %vm1969_vm6, %v2476_v20, %v2477_v19  ;;  %v2479_v58 = vrot.slane %v5073_v1, 1  ;;  %v2823_v11 = vshrl.u32 %v7792_v6, 16 }
 0x280   : > { %v5375_v39 = vpop.f32.mrb[25].mxu1  ;;  %4164 = vmatprep.mubr.bf16.mxu0 %v2809_v54  ;;  %v2827_v3 = vrot.slane %v2825_v10, 1  ;;  %v2357_v5 = vsel %vm1712_vm5, %v2352_v0, %v2356_v60  ;;  %v2359_v1 = vshrl.u32 %v7433_v18, 16  ;;  %v2363_v49 = vrot.slane %v2361_v8, 1 }
 0x281   : > { %v5376_v12 = vadd.f32 %v5375_v39, %v5374_v52  ;;  %v5377_v57 = vpop.f32.mrb[26].mxu1  ;;  %v2480_v52 = vrot.slane %v6305_v35, 1  ;;  %v2830_v39 = vshll.u32 %v7712_v42, 16  ;;  %v2366_v50 = vshll.u32 %v6305_v35, 16  ;;  %v6325_v35 = vld [vmem:[#allocation9 + $0x8] sm:$0xff]  }
 0x282   : > { %v5486_v51 = vpop.f32.mrb[24].mxu0  ;;  %v5378_v63 = vpop.f32.mrb[27].mxu1  ;;  %v2364_v8 = vor.u32 %v2363_v49, %v2359_v1  ;;  %v6350_v60 = vld [vmem:[#allocation2 + $0x20] ss:$0 sps:$4 sm:$0x11]   ;;  %5940 = vmatprep.subr.bf16.mxu0 %v6325_v35 }
 0x283   : > { %v3596_v15 = vadd.f32 %v5376_v12, %v7737_v48  ;;  %v5487_v26 = vpop.f32.mrb[25].mxu0  ;;  %v5379_v22 = vadd.f32 %v5378_v63, %v5377_v57  ;;  %v2821_v12 = vsel %vm1712_vm5, %v2816_v31, %v2820_v29  ;;  %v2481_v42 = vsel %vm1969_vm6, %v2479_v58, %v2480_v52  ;;  %5941 = vmatpush3.bf16.msra.mxu0 %v6325_v35 }
 0x284   : > { %v5488_v23 = vadd.f32 %v5487_v26, %v5486_v51  ;;  %v5489_v59 = vpop.f32.mrb[26].mxu0  ;;  %4004 = vmatmul.mubr.bf16.gmra.mrb[132].mxu1 %v2345_v37  ;;  %v2832_v26 = vrot.slane %v2830_v39, 1 }
 0x285   : > { %v3599_v27 = vadd.f32 %v5379_v22, %v7737_v48  ;;  %v5490_v41 = vpop.f32.mrb[27].mxu0  ;;  %4011 = vmatprep.mubr.bf16.mxu1 %v2478_v61  ;;  %v6349_v22 = vld [vmem:[#allocation2 + $0x1c] sm:$0xf] }
 0x286   : > { %v7805_v34 = vadd.f32 %v5488_v23, %v3596_v15  ;;  %v5491_v62 = vadd.f32 %v5490_v41, %v5489_v59  ;;  %v2828_v15 = vor.u32 %v2827_v3, %v2823_v11  ;;  %v5106_v37 = vcombine.low %v1552_v2, %v6349_v22  ;;  %v1553_v41 = vld [vmem:[#allocation2 + $0x24] sm:$0xe]  ;;  %v6351_v3 = vld [vmem:[#allocation2 + $0x28] sm:$0xf] }
 0x287   : > { %v5380_v4 = vpop.f32.mrb[28].mxu1  ;;  %4165 = vmatmul.mubr.bf16.gmra.mrb[132].mxu0 %v7767_v43  ;;  %v5107_v39 = vcombine.low %v1553_v41, %v6351_v3 }
 0x288   : > { %v7807_v33 = vadd.f32 %v5491_v62, %v3599_v27  ;;  %v5381_v17 = vpop.f32.mrb[29].mxu1  ;;  %4172 = vmatprep.mubr.bf16.mxu0 %v2821_v12  ;;  %v2368_v27 = vrot.slane %v2366_v50, 1  ;;  %v2833_v62 = vsel %vm1712_vm5, %v2828_v15, %v2832_v26  ;;  %v2898_v31 = vrot.slane %v5106_v37, 1  ;;  %v6352_v50 = vld [vmem:[#allocation2 + $0x2c] ss:$0 sps:$4 sm:$0x11]  }
 0x289   : > { %v5382_v20 = vadd.f32 %v5381_v17, %v5380_v4  ;;  %v5383_v19 = vpop.f32.mrb[30].mxu1  ;;  %v2899_v4 = vrot.slane %v6350_v60, 1  ;;  %v2902_v2 = vrot.slane %v6352_v50, 1 }
 0x28a   : > { %v5492_v57 = vpop.f32.mrb[28].mxu0  ;;  %v5384_v24 = vpop.f32.mrb[31].mxu1 }
 0x28b   : > { %v3604_v54 = vadd.f32 %v5382_v20, %v7737_v48  ;;  %v5493_v51 = vpop.f32.mrb[29].mxu0  ;;  %v5385_v63 = vadd.f32 %v5384_v24, %v5383_v19  ;;  %v2900_v1 = vsel %vm1969_vm6, %v2898_v31, %v2899_v4  ;;  %v6326_v31 = vld [vmem:[#allocation9 + $0x10] sm:$0xff]  }
 0x28c   : > { %v5494_v32 = vadd.f32 %v5493_v51, %v5492_v57  ;;  %v5495_v43 = vpop.f32.mrb[30].mxu0  ;;  %4012 = vmatmul.mubr.bf16.gmra.mrb[136].mxu1 %v2357_v5  ;;  %v2369_v57 = vsel %vm1712_vm5, %v2364_v8, %v2368_v27  ;;  %5942 = vmatprep.subr.bf16.mxu0 %v6326_v31 }
 0x28d   : > { %v3607_v23 = vadd.f32 %v5385_v63, %v7737_v48  ;;  %v5496_v18 = vpop.f32.mrb[31].mxu0  ;;  %4019 = vmatprep.mubr.bf16.mxu1 %v2481_v42  ;;  %v2901_v42 = vrot.slane %v5107_v39, 1  ;;  %5943 = vmatpush3.bf16.msra.mxu0 %v6326_v31 }
 0x28e   : > { %v7818_v59 = vadd.f32 %v5494_v32, %v3604_v54  ;;  %v5497_v61 = vadd.f32 %v5496_v18, %v5495_v43 }
 0x28f   : > { %v5386_v10 = vpop.f32.mrb[32].mxu1  ;;  %4173 = vmatmul.mubr.bf16.gmra.mrb[136].mxu0 %v7780_v30 }
 0x290   : > { %v7820_v29 = vadd.f32 %v5497_v61, %v3607_v23  ;;  %v5387_v0 = vpop.f32.mrb[33].mxu1  ;;  %4180 = vmatprep.mubr.bf16.mxu0 %v2833_v62 }
 0x291   : > { %v5388_v58 = vadd.f32 %v5387_v0, %v5386_v10  ;;  %v5389_v52 = vpop.f32.mrb[34].mxu1  ;;  %v2903_v10 = vsel %vm1969_vm6, %v2901_v42, %v2902_v2 }
 0x292   : > { %v5498_v17 = vpop.f32.mrb[32].mxu0  ;;  %v5390_v11 = vpop.f32.mrb[35].mxu1 }
 0x293   : > { %v3612_v20 = vadd.f32 %v5388_v58, %v7737_v48  ;;  %v5499_v19 = vpop.f32.mrb[33].mxu0  ;;  %v5391_v12 = vadd.f32 %v5390_v11, %v5389_v52 }
 0x294   : > { %v5500_v24 = vadd.f32 %v5499_v19, %v5498_v17  ;;  %v5501_v5 = vpop.f32.mrb[34].mxu0  ;;  %4020 = vmatmul.mubr.bf16.gmra.mrb[140].mxu1 %v2369_v57 }
 0x295   : > { %v3615_v49 = vadd.f32 %v5391_v12, %v7737_v48  ;;  %v5502_v30 = vpop.f32.mrb[35].mxu0  ;;  %5906 = vmatprep.mubr.bf16.mxu1 %v2900_v1 }
 0x296   : > { %v7828_v54 = vadd.f32 %v5500_v24, %v3612_v20  ;;  %v5503_v51 = vadd.f32 %v5502_v30, %v5501_v5 }
 0x297   : > { %v5392_v63 = vpop.f32.mrb[36].mxu1  ;;  %4181 = vmatmul.mubr.bf16.gmra.mrb[140].mxu0 %v7792_v6 }
 0x298   : > { %v7830_v32 = vadd.f32 %v5503_v51, %v3615_v49  ;;  %v5393_v43 = vpop.f32.mrb[37].mxu1 }
 0x299   : > { %v5394_v15 = vadd.f32 %v5393_v43, %v5392_v63  ;;  %v5395_v26 = vpop.f32.mrb[38].mxu1 }
 0x29a   : > { %v5504_v22 = vpop.f32.mrb[36].mxu0  ;;  %v5396_v37 = vpop.f32.mrb[39].mxu1 }
 0x29b   : > { %v3620_v23 = vadd.f32 %v5394_v15, %v7737_v48  ;;  %v5505_v18 = vpop.f32.mrb[37].mxu0  ;;  %v5397_v61 = vadd.f32 %v5396_v37, %v5395_v26 }
 0x29c   : > { %v5506_v8 = vadd.f32 %v5505_v18, %v5504_v22  ;;  %v5507_v27 = vpop.f32.mrb[38].mxu0  ;;  %5907 = vmatmul.mubr.bf16.vlgmr.msra.gmra.mrb[144].mxu1 %v2903_v10 }
 0x29d   : > { %v3623_v41 = vadd.f32 %v5397_v61, %v7737_v48  ;;  %v5508_v35 = vpop.f32.mrb[39].mxu0  ;;  %5910 = vmatprep.mubr.bf16.mxu1 %v7613_v40  ;;  %v6327_v61 = vld [vmem:[#allocation9 + $0x18] sm:$0xff]  }
 0x29e   : > { %v7837_v0 = vadd.f32 %v5506_v8, %v3620_v23  ;;  %v5509_v62 = vadd.f32 %v5508_v35, %v5507_v27  ;;  %5944 = vmatprep.subr.bf16.mxu0 %v6327_v61 }
 0x29f   : > { %v5398_v6 = vpop.f32.mrb[40].mxu1  ;;  %5945 = vmatpush3.bf16.msra.mxu0 %v6327_v61 }
 0x2a0   : > { %v7839_v60 = vadd.f32 %v5509_v62, %v3623_v41  ;;  %v5399_v4 = vpop.f32.mrb[41].mxu1 }
 0x2a1   : > { %v5400_v58 = vadd.f32 %v5399_v4, %v5398_v6  ;;  %v5401_v52 = vpop.f32.mrb[42].mxu1 }
 0x2a2   : > { %v5402_v17 = vpop.f32.mrb[43].mxu1  ;;  %v5510_v3 = vpop.f32.mrb[40].mxu0 }
 0x2a3   : > { %v3628_v11 = vadd.f32 %v5400_v58, %v7737_v48  ;;  %v5403_v39 = vadd.f32 %v5402_v17, %v5401_v52  ;;  %v5511_v20 = vpop.f32.mrb[41].mxu0 }
 0x2a4   : > { %5911 = vmatmul.mubr.bf16.gmra.mrb[148].mxu1 %v7621_v36  ;;  %v5512_v40 = vadd.f32 %v5511_v20, %v5510_v3  ;;  %v5513_v12 = vpop.f32.mrb[42].mxu0 }
 0x2a5   : > { %v3631_v19 = vadd.f32 %v5403_v39, %v7737_v48  ;;  %5914 = vmatprep.mubr.bf16.mxu1 %v7630_v53  ;;  %v5514_v57 = vpop.f32.mrb[43].mxu0 }
 0x2a6   : > { %v7845_v24 = vadd.f32 %v5512_v40, %v3628_v11  ;;  %v5515_v5 = vadd.f32 %v5514_v57, %v5513_v12 }
 0x2a7   : > { %v5404_v1 = vpop.f32.mrb[44].mxu1 }
 0x2a8   : > { %v5405_v49 = vpop.f32.mrb[45].mxu1  ;;  %v7847_v30 = vadd.f32 %v5515_v5, %v3631_v19 }
 0x2a9   : > { %v5406_v51 = vadd.f32 %v5405_v49, %v5404_v1  ;;  %v5407_v63 = vpop.f32.mrb[46].mxu1 }
 0x2aa   : > { %v5408_v42 = vpop.f32.mrb[47].mxu1  ;;  %v5516_v36 = vpop.f32.mrb[44].mxu0 }
 0x2ab   : > { %v3636_v50 = vadd.f32 %v5406_v51, %v7737_v48  ;;  %v5409_v2 = vadd.f32 %v5408_v42, %v5407_v63  ;;  %v5517_v43 = vpop.f32.mrb[45].mxu0 }
 0x2ac   : > { %5915 = vmatmul.mubr.bf16.gmra.mrb[152].mxu1 %v7638_v16  ;;  %v5518_v15 = vadd.f32 %v5517_v43, %v5516_v36  ;;  %v5519_v26 = vpop.f32.mrb[46].mxu0 }
 0x2ad   : > { %v3639_v53 = vadd.f32 %v5409_v2, %v7737_v48  ;;  %5918 = vmatprep.mubr.bf16.mxu1 %v7644_v44  ;;  %v5520_v22 = vpop.f32.mrb[47].mxu0  ;;  %v6328_v2 = vld [vmem:[#allocation9 + $0x20] sm:$0xff]  }
 0x2ae   : > { %v7853_v37 = vadd.f32 %v5518_v15, %v3636_v50  ;;  %v5521_v23 = vadd.f32 %v5520_v22, %v5519_v26  ;;  %5946 = vmatprep.subr.bf16.mxu0 %v6328_v2 }
 0x2af   : > { %v5410_v18 = vpop.f32.mrb[48].mxu1  ;;  %5947 = vmatpush3.bf16.msra.mxu0 %v6328_v2 }
 0x2b0   : > { %v5411_v10 = vpop.f32.mrb[49].mxu1  ;;  %v7855_v8 = vadd.f32 %v5521_v23, %v3639_v53 }
 0x2b1   : > { %v5412_v27 = vadd.f32 %v5411_v10, %v5410_v18  ;;  %v5413_v41 = vpop.f32.mrb[50].mxu1 }
 0x2b2   : > { %v5414_v35 = vpop.f32.mrb[51].mxu1  ;;  %v5522_v62 = vpop.f32.mrb[48].mxu0 }
 0x2b3   : > { %v3644_v16 = vadd.f32 %v5412_v27, %v7737_v48  ;;  %v5415_v6 = vadd.f32 %v5414_v35, %v5413_v41  ;;  %v5523_v31 = vpop.f32.mrb[49].mxu0 }
 0x2b4   : > { %5919 = vmatmul.mubr.bf16.gmra.mrb[156].mxu1 %v7651_v46  ;;  %v5524_v44 = vadd.f32 %v5523_v31, %v5522_v62  ;;  %v5525_v58 = vpop.f32.mrb[50].mxu0 }
 0x2b5   : > { %v3647_v4 = vadd.f32 %v5415_v6, %v7737_v48  ;;  %5922 = vmatprep.mubr.bf16.mxu1 %v7654_v56  ;;  %v5526_v52 = vpop.f32.mrb[51].mxu0 }
 0x2b6   : > { %v7861_v17 = vadd.f32 %v5524_v44, %v3644_v16  ;;  %v5527_v11 = vadd.f32 %v5526_v52, %v5525_v58 }
 0x2b7   : > { %v5416_v3 = vpop.f32.mrb[52].mxu1 }
 0x2b8   : > { %v5417_v39 = vpop.f32.mrb[53].mxu1  ;;  %v7863_v20 = vadd.f32 %v5527_v11, %v3647_v4 }
 0x2b9   : > { %v5418_v40 = vadd.f32 %v5417_v39, %v5416_v3  ;;  %v5419_v19 = vpop.f32.mrb[54].mxu1 }
 0x2ba   : > { %v5420_v12 = vpop.f32.mrb[55].mxu1  ;;  %v5528_v46 = vpop.f32.mrb[52].mxu0 }
 0x2bb   : > { %v3652_v57 = vadd.f32 %v5418_v40, %v7737_v48  ;;  %v5421_v5 = vadd.f32 %v5420_v12, %v5419_v19  ;;  %v5529_v1 = vpop.f32.mrb[53].mxu0  ;;  %v6329_v12 = vld [vmem:[#allocation9 + $0x28] sm:$0xff]  }
 0x2bc   : > { %5923 = vmatmul.mubr.bf16.gmra.mrb[160].mxu1 %v7662_v25  ;;  %v5530_v49 = vadd.f32 %v5529_v1, %v5528_v46  ;;  %v5531_v51 = vpop.f32.mrb[54].mxu0  ;;  %5948 = vmatprep.subr.bf16.mxu0 %v6329_v12 }
 0x2bd   : > { %v3655_v56 = vadd.f32 %v5421_v5, %v7737_v48  ;;  %5926 = vmatprep.mubr.bf16.mxu1 %v7668_v13  ;;  %v5532_v63 = vpop.f32.mrb[55].mxu0  ;;  %5949 = vmatpush3.bf16.msra.mxu0 %v6329_v12 }
 0x2be   : > { %v7869_v42 = vadd.f32 %v5530_v49, %v3652_v57  ;;  %v5533_v50 = vadd.f32 %v5532_v63, %v5531_v51 }
 0x2bf   : > { %v5422_v36 = vpop.f32.mrb[56].mxu1 }
 0x2c0   : > { %v5423_v43 = vpop.f32.mrb[57].mxu1  ;;  %v7871_v15 = vadd.f32 %v5533_v50, %v3655_v56 }
 0x2c1   : > { %v5424_v53 = vadd.f32 %v5423_v43, %v5422_v36  ;;  %v5425_v26 = vpop.f32.mrb[58].mxu1 }
 0x2c2   : > { %v5426_v22 = vpop.f32.mrb[59].mxu1  ;;  %v5534_v13 = vpop.f32.mrb[56].mxu0 }
 0x2c3   : > { %v5427_v25 = vadd.f32 %v5426_v22, %v5425_v26  ;;  %v3660_v23 = vadd.f32 %v5424_v53, %v7737_v48  ;;  %v5535_v18 = vpop.f32.mrb[57].mxu0 }
 0x2c4   : > { %5927 = vmatmul.mubr.bf16.gmra.mrb[164].mxu1 %v7676_v14  ;;  %v5536_v61 = vadd.f32 %v5535_v18, %v5534_v13  ;;  %v5537_v27 = vpop.f32.mrb[58].mxu0 }
 0x2c5   : > { %5930 = vmatprep.mubr.bf16.mxu1 %v7687_v21  ;;  %v3663_v10 = vadd.f32 %v5427_v25, %v7737_v48  ;;  %v5538_v35 = vpop.f32.mrb[59].mxu0 }
 0x2c6   : > { %v7877_v62 = vadd.f32 %v5536_v61, %v3660_v23  ;;  %v5539_v6 = vadd.f32 %v5538_v35, %v5537_v27 }
 0x2c7   : > { %v5428_v41 = vpop.f32.mrb[60].mxu1 }
 0x2c8   : > { %v5429_v16 = vpop.f32.mrb[61].mxu1  ;;  %v7879_v14 = vadd.f32 %v5539_v6, %v3663_v10 }
 0x2c9   : > { %v5430_v31 = vadd.f32 %v5429_v16, %v5428_v41  ;;  %v5431_v44 = vpop.f32.mrb[62].mxu1 }
 0x2ca   : > { %v5432_v4 = vpop.f32.mrb[63].mxu1  ;;  %v5540_v52 = vpop.f32.mrb[60].mxu0 }
 0x2cb   : > { %v5433_v58 = vadd.f32 %v5432_v4, %v5431_v44  ;;  %v3668_v21 = vadd.f32 %v5430_v31, %v7737_v48  ;;  %v5541_v11 = vpop.f32.mrb[61].mxu0 }
 0x2cc   : > { %5931 = vmatmul.mubr.bf16.gmra.mrb[168].mxu1 %v7694_v7  ;;  %v5542_v3 = vadd.f32 %v5541_v11, %v5540_v52  ;;  %v5543_v40 = vpop.f32.mrb[62].mxu0 }
 0x2cd   : > { %5934 = vmatprep.mubr.bf16.mxu1 %v7697_v55  ;;  %v3671_v39 = vadd.f32 %v5433_v58, %v7737_v48  ;;  %v5544_v57 = vpop.f32.mrb[63].mxu0  ;;  %v6330_v58 = vld [vmem:[#allocation9 + $0x30] sm:$0xff]  }
 0x2ce   : > { %v7885_v5 = vadd.f32 %v5542_v3, %v3668_v21  ;;  %v5545_v1 = vadd.f32 %v5544_v57, %v5543_v40  ;;  %5950 = vmatprep.subr.bf16.mxu0 %v6330_v58 }
 0x2cf   : > { %v5434_v19 = vpop.f32.mrb[64].mxu1  ;;  %5951 = vmatpush3.bf16.msra.mxu0 %v6330_v58 }
 0x2d0   : > { %v5435_v46 = vpop.f32.mrb[65].mxu1  ;;  %v7887_v51 = vadd.f32 %v5545_v1, %v3671_v39 }
 0x2d1   : > { %v5436_v49 = vadd.f32 %v5435_v46, %v5434_v19  ;;  %v5437_v56 = vpop.f32.mrb[66].mxu1 }
 0x2d2   : > { %v5438_v7 = vpop.f32.mrb[67].mxu1  ;;  %v5546_v50 = vpop.f32.mrb[64].mxu0 }
 0x2d3   : > { %v5439_v55 = vadd.f32 %v5438_v7, %v5437_v56  ;;  %v3676_v63 = vadd.f32 %v5436_v49, %v7737_v48  ;;  %v5547_v36 = vpop.f32.mrb[65].mxu0 }
 0x2d4   : > { %5935 = vmatmul.mubr.bf16.gmra.mrb[172].mxu1 %v7722_v9  ;;  %v5548_v2 = vadd.f32 %v5547_v36, %v5546_v50  ;;  %v5549_v53 = vpop.f32.mrb[66].mxu0 }
 0x2d5   : > { %v3679_v43 = vadd.f32 %v5439_v55, %v7737_v48  ;;  %v5550_v22 = vpop.f32.mrb[67].mxu0 }
 0x2d6   : > { %v7892_v23 = vadd.f32 %v5548_v2, %v3676_v63  ;;  %v5551_v13 = vadd.f32 %v5550_v22, %v5549_v53 }
 0x2d7   : > { %v5440_v26 = vpop.f32.mrb[68].mxu1 }
 0x2d8   : > { %v5441_v25 = vpop.f32.mrb[69].mxu1  ;;  %v7894_v27 = vadd.f32 %v5551_v13, %v3679_v43 }
 0x2d9   : > { %v5442_v18 = vadd.f32 %v5441_v25, %v5440_v26  ;;  %v5443_v61 = vpop.f32.mrb[70].mxu1 }
 0x2da   : > { %v5444_v10 = vpop.f32.mrb[71].mxu1  ;;  %v5552_v35 = vpop.f32.mrb[68].mxu0 }
 0x2db   : > { %v5445_v9 = vadd.f32 %v5444_v10, %v5443_v61  ;;  %v3684_v41 = vadd.f32 %v5442_v18, %v7737_v48  ;;  %v5553_v16 = vpop.f32.mrb[69].mxu0  ;;  %v6331_v10 = vld [vmem:[#allocation9 + $0x38] sm:$0xff]  }
 0x2dc   : > { %v5554_v6 = vadd.f32 %v5553_v16, %v5552_v35  ;;  %v5555_v44 = vpop.f32.mrb[70].mxu0  ;;  %5952 = vmatprep.subr.bf16.mxu0 %v6331_v10 }
 0x2dd   : > { %v3687_v31 = vadd.f32 %v5445_v9, %v7737_v48  ;;  %v5556_v21 = vpop.f32.mrb[71].mxu0  ;;  %5953 = vmatpush3.bf16.msra.mxu0 %v6331_v10 }
 0x2de   : > { %v7898_v11 = vadd.f32 %v5554_v6, %v3684_v41  ;;  %v5557_v3 = vadd.f32 %v5556_v21, %v5555_v44 }
 0x2df   : > { %v5446_v4 = vpop.f32.mrb[72].mxu1 }
 0x2e0   : > { %v5447_v52 = vpop.f32.mrb[73].mxu1  ;;  %v7900_v12 = vadd.f32 %v5557_v3, %v3687_v31 }
 0x2e1   : > { %v5448_v39 = vadd.f32 %v5447_v52, %v5446_v4  ;;  %v5449_v40 = vpop.f32.mrb[74].mxu1 }
 0x2e2   : > { %v5450_v19 = vpop.f32.mrb[75].mxu1  ;;  %v5558_v1 = vpop.f32.mrb[72].mxu0 }
 0x2e3   : > { %v5451_v57 = vadd.f32 %v5450_v19, %v5449_v40  ;;  %v3692_v46 = vadd.f32 %v5448_v39, %v7737_v48  ;;  %v5559_v49 = vpop.f32.mrb[73].mxu0 }
 0x2e4   : > { %v5560_v56 = vadd.f32 %v5559_v49, %v5558_v1  ;;  %v5561_v55 = vpop.f32.mrb[74].mxu0 }
 0x2e5   : > { %v3695_v7 = vadd.f32 %v5451_v57, %v7737_v48  ;;  %v5562_v50 = vpop.f32.mrb[75].mxu0 }
 0x2e6   : > { %v7904_v2 = vadd.f32 %v5560_v56, %v3692_v46  ;;  %v5563_v43 = vadd.f32 %v5562_v50, %v5561_v55 }
 0x2e7   : > { %v5452_v63 = vpop.f32.mrb[76].mxu1 }
 0x2e8   : > { %v5453_v36 = vpop.f32.mrb[77].mxu1  ;;  %v7906_v25 = vadd.f32 %v5563_v43, %v3695_v7 }
 0x2e9   : > { %v5454_v53 = vadd.f32 %v5453_v36, %v5452_v63  ;;  %v5455_v26 = vpop.f32.mrb[78].mxu1 }
 0x2ea   : > { %v5456_v22 = vpop.f32.mrb[79].mxu1  ;;  %v5564_v61 = vpop.f32.mrb[76].mxu0 }
 0x2eb   : > { %v5457_v13 = vadd.f32 %v5456_v22, %v5455_v26  ;;  %v3700_v18 = vadd.f32 %v5454_v53, %v7737_v48  ;;  %v5565_v9 = vpop.f32.mrb[77].mxu0 }
 0x2ec   : > { %v5566_v41 = vadd.f32 %v5565_v9, %v5564_v61  ;;  %v5567_v16 = vpop.f32.mrb[78].mxu0 }
 0x2ed   : > { %v3703_v35 = vadd.f32 %v5457_v13, %v7737_v48  ;;  %v5568_v31 = vpop.f32.mrb[79].mxu0 }
 0x2ee   : > { %v7910_v4 = vadd.f32 %v5566_v41, %v3700_v18  ;;  %v5569_v58 = vadd.f32 %v5568_v31, %v5567_v16 }
 0x2ef   : > { %v5586_v6 = vpop.f32.mrb[80].mxu1 }
 0x2f0   : > { %v5587_v44 = vpop.f32.mrb[81].mxu1  ;;  %v7912_v39 = vadd.f32 %v5569_v58, %v3703_v35 }
 0x2f1   : > { %v5588_v21 = vadd.f32 %v5587_v44, %v5586_v6  ;;  %v5589_v52 = vpop.f32.mrb[82].mxu1 }
 0x2f2   : > { %v5590_v3 = vpop.f32.mrb[83].mxu1  ;;  %v5698_v57 = vpop.f32.mrb[80].mxu0 }
 0x2f3   : > { %v3902_v40 = vadd.f32 %v5588_v21, %v7756_v28  ;;  %v5591_v19 = vadd.f32 %v5590_v3, %v5589_v52  ;;  %v5699_v46 = vpop.f32.mrb[81].mxu0 }
 0x2f4   : > { %v5700_v1 = vadd.f32 %v5699_v46, %v5698_v57  ;;  %v5701_v49 = vpop.f32.mrb[82].mxu0 }
 0x2f5   : > { %v3905_v48 = vadd.f32 %v5591_v19, %v7759_v45  ;;  %v5702_v7 = vpop.f32.mrb[83].mxu0 }
 0x2f6   : > { %v5703_v63 = vadd.f32 %v5702_v7, %v5701_v49  ;;  %v7916_v43 = vadd.f32 %v5700_v1, %v3902_v40 }
 0x2f7   : > { %v5592_v56 = vpop.f32.mrb[84].mxu1 }
 0x2f8   : > { %v5593_v55 = vpop.f32.mrb[85].mxu1  ;;  %v7919_v28 = vadd.f32 %v5703_v63, %v3905_v48 }
 0x2f9   : > { %v5594_v50 = vadd.f32 %v5593_v55, %v5592_v56  ;;  %v5595_v36 = vpop.f32.mrb[86].mxu1 }
 0x2fa   : > { %v5596_v53 = vpop.f32.mrb[87].mxu1  ;;  %v5704_v13 = vpop.f32.mrb[84].mxu0 }
 0x2fb   : > { %v3910_v26 = vadd.f32 %v5594_v50, %v7785_v47  ;;  %v5597_v22 = vadd.f32 %v5596_v53, %v5595_v36  ;;  %v5705_v18 = vpop.f32.mrb[85].mxu0 }
 0x2fc   : > { %v5706_v61 = vadd.f32 %v5705_v18, %v5704_v13  ;;  %v5707_v10 = vpop.f32.mrb[86].mxu0 }
 0x2fd   : > { %v3913_v45 = vadd.f32 %v5597_v22, %v7789_v38  ;;  %v5708_v41 = vpop.f32.mrb[87].mxu0 }
 0x2fe   : > { %v5709_v16 = vadd.f32 %v5708_v41, %v5707_v10  ;;  %v7922_v44 = vadd.f32 %v5706_v61, %v3910_v26 }
 0x2ff   : > { %v5598_v9 = vpop.f32.mrb[88].mxu1 }
 0x300   : > { %v5599_v35 = vpop.f32.mrb[89].mxu1  ;;  %v7925_v52 = vadd.f32 %v5709_v16, %v3913_v45 }
 0x301   : > { %v5600_v6 = vadd.f32 %v5599_v35, %v5598_v9  ;;  %v5601_v31 = vpop.f32.mrb[90].mxu1 }
 0x302   : > { %v5602_v58 = vpop.f32.mrb[91].mxu1  ;;  %v5710_v3 = vpop.f32.mrb[88].mxu0 }
 0x303   : > { %v3918_v47 = vadd.f32 %v5600_v6, %v7805_v34  ;;  %v5603_v21 = vadd.f32 %v5602_v58, %v5601_v31  ;;  %v5711_v40 = vpop.f32.mrb[89].mxu0 }
 0x304   : > { %v5712_v19 = vadd.f32 %v5711_v40, %v5710_v3  ;;  %v5713_v57 = vpop.f32.mrb[90].mxu0 }
 0x305   : > { %v3921_v38 = vadd.f32 %v5603_v21, %v7807_v33  ;;  %v5714_v46 = vpop.f32.mrb[91].mxu0 }
 0x306   : > { %v5715_v49 = vadd.f32 %v5714_v46, %v5713_v57  ;;  %v7928_v55 = vadd.f32 %v5712_v19, %v3918_v47 }
 0x307   : > { %v5604_v48 = vpop.f32.mrb[92].mxu1 }
 0x308   : > { %v5605_v1 = vpop.f32.mrb[93].mxu1  ;;  %v7931_v36 = vadd.f32 %v5715_v49, %v3921_v38 }
 0x309   : > { %v5606_v56 = vadd.f32 %v5605_v1, %v5604_v48  ;;  %v5607_v7 = vpop.f32.mrb[94].mxu1 }
 0x30a   : > { %v5608_v63 = vpop.f32.mrb[95].mxu1  ;;  %v5716_v53 = vpop.f32.mrb[92].mxu0 }
 0x30b   : > { %v3926_v34 = vadd.f32 %v5606_v56, %v7818_v59  ;;  %v5609_v50 = vadd.f32 %v5608_v63, %v5607_v7  ;;  %v5717_v26 = vpop.f32.mrb[93].mxu0 }
 0x30c   : > { %v5718_v22 = vadd.f32 %v5717_v26, %v5716_v53  ;;  %v5719_v13 = vpop.f32.mrb[94].mxu0 }
 0x30d   : > { %v3929_v33 = vadd.f32 %v5609_v50, %v7820_v29  ;;  %v5720_v18 = vpop.f32.mrb[95].mxu0 }
 0x30e   : > { %v5721_v10 = vadd.f32 %v5720_v18, %v5719_v13  ;;  %v7934_v35 = vadd.f32 %v5718_v22, %v3926_v34 }
 0x30f   : > { %v5610_v45 = vpop.f32.mrb[96].mxu1 }
 0x310   : > { %v5611_v61 = vpop.f32.mrb[97].mxu1  ;;  %v7937_v31 = vadd.f32 %v5721_v10, %v3929_v33 }
 0x311   : > { %v5612_v9 = vadd.f32 %v5611_v61, %v5610_v45  ;;  %v5613_v41 = vpop.f32.mrb[98].mxu1 }
 0x312   : > { %v5614_v16 = vpop.f32.mrb[99].mxu1  ;;  %v5722_v58 = vpop.f32.mrb[96].mxu0 }
 0x313   : > { %v3934_v59 = vadd.f32 %v5612_v9, %v7828_v54  ;;  %v5615_v6 = vadd.f32 %v5614_v16, %v5613_v41  ;;  %v5723_v47 = vpop.f32.mrb[97].mxu0 }
 0x314   : > { %v5724_v21 = vadd.f32 %v5723_v47, %v5722_v58  ;;  %v5725_v3 = vpop.f32.mrb[98].mxu0 }
 0x315   : > { %v3937_v29 = vadd.f32 %v5615_v6, %v7830_v32  ;;  %v5726_v40 = vpop.f32.mrb[99].mxu0 }
 0x316   : > { %v5727_v57 = vadd.f32 %v5726_v40, %v5725_v3  ;;  %v7940_v1 = vadd.f32 %v5724_v21, %v3934_v59 }
 0x317   : > { %v5616_v38 = vpop.f32.mrb[100].mxu1 }
 0x318   : > { %v5617_v19 = vpop.f32.mrb[101].mxu1  ;;  %v7943_v7 = vadd.f32 %v5727_v57, %v3937_v29 }
 0x319   : > { %v5618_v48 = vadd.f32 %v5617_v19, %v5616_v38  ;;  %v5619_v46 = vpop.f32.mrb[102].mxu1 }
 0x31a   : > { %v5620_v49 = vpop.f32.mrb[103].mxu1  ;;  %v5728_v63 = vpop.f32.mrb[100].mxu0 }
 0x31b   : > { %v3942_v54 = vadd.f32 %v5618_v48, %v7837_v0  ;;  %v5621_v56 = vadd.f32 %v5620_v49, %v5619_v46  ;;  %v5729_v34 = vpop.f32.mrb[101].mxu0 }
 0x31c   : > { %v5730_v50 = vadd.f32 %v5729_v34, %v5728_v63  ;;  %v5731_v53 = vpop.f32.mrb[102].mxu0 }
 0x31d   : > { %v3945_v32 = vadd.f32 %v5621_v56, %v7839_v60  ;;  %v5732_v26 = vpop.f32.mrb[103].mxu0 }
 0x31e   : > { %v5733_v13 = vadd.f32 %v5732_v26, %v5731_v53  ;;  %v7946_v61 = vadd.f32 %v5730_v50, %v3942_v54 }
 0x31f   : > { %v5622_v33 = vpop.f32.mrb[104].mxu1 }
 0x320   : > { %v5623_v22 = vpop.f32.mrb[105].mxu1  ;;  %v7949_v41 = vadd.f32 %v5733_v13, %v3945_v32 }
 0x321   : > { %v5624_v45 = vadd.f32 %v5623_v22, %v5622_v33  ;;  %v5625_v18 = vpop.f32.mrb[106].mxu1 }
 0x322   : > { %v5626_v10 = vpop.f32.mrb[107].mxu1  ;;  %v5734_v16 = vpop.f32.mrb[104].mxu0 }
 0x323   : > { %v3950_v0 = vadd.f32 %v5624_v45, %v7845_v24  ;;  %v5627_v9 = vadd.f32 %v5626_v10, %v5625_v18  ;;  %v5735_v59 = vpop.f32.mrb[105].mxu0 }
 0x324   : > { %v5736_v6 = vadd.f32 %v5735_v59, %v5734_v16  ;;  %v5737_v58 = vpop.f32.mrb[106].mxu0 }
 0x325   : > { %v3953_v60 = vadd.f32 %v5627_v9, %v7847_v30  ;;  %v5738_v47 = vpop.f32.mrb[107].mxu0 }
 0x326   : > { %v5739_v3 = vadd.f32 %v5738_v47, %v5737_v58  ;;  %v7952_v19 = vadd.f32 %v5736_v6, %v3950_v0 }
 0x327   : > { %v5628_v29 = vpop.f32.mrb[108].mxu1 }
 0x328   : > { %v5629_v21 = vpop.f32.mrb[109].mxu1  ;;  %v7955_v46 = vadd.f32 %v5739_v3, %v3953_v60 }
 0x329   : > { %v5630_v38 = vadd.f32 %v5629_v21, %v5628_v29  ;;  %v5631_v40 = vpop.f32.mrb[110].mxu1 }
 0x32a   : > { %v5632_v57 = vpop.f32.mrb[111].mxu1  ;;  %v5740_v49 = vpop.f32.mrb[108].mxu0 }
 0x32b   : > { %v3958_v24 = vadd.f32 %v5630_v38, %v7853_v37  ;;  %v5633_v48 = vadd.f32 %v5632_v57, %v5631_v40  ;;  %v5741_v54 = vpop.f32.mrb[109].mxu0 }
 0x32c   : > { %v5742_v56 = vadd.f32 %v5741_v54, %v5740_v49  ;;  %v5743_v63 = vpop.f32.mrb[110].mxu0 }
 0x32d   : > { %v3961_v30 = vadd.f32 %v5633_v48, %v7855_v8  ;;  %v5744_v34 = vpop.f32.mrb[111].mxu0 }
 0x32e   : > { %v5745_v53 = vadd.f32 %v5744_v34, %v5743_v63  ;;  %v7958_v22 = vadd.f32 %v5742_v56, %v3958_v24 }
 0x32f   : > { %v5634_v32 = vpop.f32.mrb[112].mxu1 }
 0x330   : > { %v5635_v50 = vpop.f32.mrb[113].mxu1  ;;  %v7961_v18 = vadd.f32 %v5745_v53, %v3961_v30 }
 0x331   : > { %v5636_v33 = vadd.f32 %v5635_v50, %v5634_v32  ;;  %v5637_v26 = vpop.f32.mrb[114].mxu1 }
 0x332   : > { %v5638_v13 = vpop.f32.mrb[115].mxu1  ;;  %v5746_v10 = vpop.f32.mrb[112].mxu0 }
 0x333   : > { %v3966_v37 = vadd.f32 %v5636_v33, %v7861_v17  ;;  %v5639_v45 = vadd.f32 %v5638_v13, %v5637_v26  ;;  %v5747_v0 = vpop.f32.mrb[113].mxu0 }
 0x334   : > { %v5748_v9 = vadd.f32 %v5747_v0, %v5746_v10  ;;  %v5749_v16 = vpop.f32.mrb[114].mxu0 }
 0x335   : > { %v3969_v8 = vadd.f32 %v5639_v45, %v7863_v20  ;;  %v5750_v59 = vpop.f32.mrb[115].mxu0 }
 0x336   : > { %v5751_v58 = vadd.f32 %v5750_v59, %v5749_v16  ;;  %v7964_v21 = vadd.f32 %v5748_v9, %v3966_v37 }
 0x337   : > { %v5640_v60 = vpop.f32.mrb[116].mxu1 }
 0x338   : > { %v5641_v6 = vpop.f32.mrb[117].mxu1  ;;  %v7967_v40 = vadd.f32 %v5751_v58, %v3969_v8 }
 0x339   : > { %v5642_v29 = vadd.f32 %v5641_v6, %v5640_v60  ;;  %v5643_v47 = vpop.f32.mrb[118].mxu1 }
 0x33a   : > { %v5644_v3 = vpop.f32.mrb[119].mxu1  ;;  %v5752_v57 = vpop.f32.mrb[116].mxu0 }
 0x33b   : > { %v3974_v17 = vadd.f32 %v5642_v29, %v7869_v42  ;;  %v5645_v38 = vadd.f32 %v5644_v3, %v5643_v47  ;;  %v5753_v24 = vpop.f32.mrb[117].mxu0 }
 0x33c   : > { %v5754_v48 = vadd.f32 %v5753_v24, %v5752_v57  ;;  %v5755_v49 = vpop.f32.mrb[118].mxu0 }
 0x33d   : > { %v3977_v20 = vadd.f32 %v5645_v38, %v7871_v15  ;;  %v5756_v54 = vpop.f32.mrb[119].mxu0 }
 0x33e   : > { %v5757_v63 = vadd.f32 %v5756_v54, %v5755_v49  ;;  %v7970_v50 = vadd.f32 %v5754_v48, %v3974_v17 }
 0x33f   : > { %v5646_v30 = vpop.f32.mrb[120].mxu1 }
 0x340   : > { %v5647_v56 = vpop.f32.mrb[121].mxu1  ;;  %v7973_v26 = vadd.f32 %v5757_v63, %v3977_v20 }
 0x341   : > { %v5648_v32 = vadd.f32 %v5647_v56, %v5646_v30  ;;  %v5649_v34 = vpop.f32.mrb[122].mxu1 }
 0x342   : > { %v5650_v53 = vpop.f32.mrb[123].mxu1  ;;  %v5758_v13 = vpop.f32.mrb[120].mxu0 }
 0x343   : > { %v3982_v42 = vadd.f32 %v5648_v32, %v7877_v62  ;;  %v5651_v33 = vadd.f32 %v5650_v53, %v5649_v34  ;;  %v5759_v37 = vpop.f32.mrb[121].mxu0 }
 0x344   : > { %v5760_v45 = vadd.f32 %v5759_v37, %v5758_v13  ;;  %v5761_v10 = vpop.f32.mrb[122].mxu0 }
 0x345   : > { %v3985_v15 = vadd.f32 %v5651_v33, %v7879_v14  ;;  %v5762_v0 = vpop.f32.mrb[123].mxu0 }
 0x346   : > { %v5763_v16 = vadd.f32 %v5762_v0, %v5761_v10  ;;  %v7976_v6 = vadd.f32 %v5760_v45, %v3982_v42 }
 0x347   : > { %v5652_v8 = vpop.f32.mrb[124].mxu1 }
 0x348   : > { %v5653_v9 = vpop.f32.mrb[125].mxu1  ;;  %v7979_v47 = vadd.f32 %v5763_v16, %v3985_v15 }
 0x349   : > { %v5654_v60 = vadd.f32 %v5653_v9, %v5652_v8  ;;  %v5655_v59 = vpop.f32.mrb[126].mxu1 }
 0x34a   : > { %v5656_v58 = vpop.f32.mrb[127].mxu1  ;;  %v5764_v3 = vpop.f32.mrb[124].mxu0 }
 0x34b   : > { %v3990_v62 = vadd.f32 %v5654_v60, %v7885_v5  ;;  %v5657_v29 = vadd.f32 %v5656_v58, %v5655_v59  ;;  %v5765_v17 = vpop.f32.mrb[125].mxu0 }
 0x34c   : > { %v5766_v38 = vadd.f32 %v5765_v17, %v5764_v3  ;;  %v5767_v57 = vpop.f32.mrb[126].mxu0 }
 0x34d   : > { %v3993_v14 = vadd.f32 %v5657_v29, %v7887_v51  ;;  %v5768_v24 = vpop.f32.mrb[127].mxu0 }
 0x34e   : > { %v5769_v49 = vadd.f32 %v5768_v24, %v5767_v57  ;;  %v7982_v56 = vadd.f32 %v5766_v38, %v3990_v62 }
 0x34f   : > { %v5658_v20 = vpop.f32.mrb[128].mxu1 }
 0x350   : > { %v5659_v48 = vpop.f32.mrb[129].mxu1  ;;  %v7985_v34 = vadd.f32 %v5769_v49, %v3993_v14 }
 0x351   : > { %v5660_v30 = vadd.f32 %v5659_v48, %v5658_v20  ;;  %v5661_v54 = vpop.f32.mrb[130].mxu1 }
 0x352   : > { %v5662_v63 = vpop.f32.mrb[131].mxu1  ;;  %v5770_v53 = vpop.f32.mrb[128].mxu0 }
 0x353   : > { %v3998_v5 = vadd.f32 %v5660_v30, %v7892_v23  ;;  %v5663_v32 = vadd.f32 %v5662_v63, %v5661_v54  ;;  %v5771_v42 = vpop.f32.mrb[129].mxu0 }
 0x354   : > { %v5772_v33 = vadd.f32 %v5771_v42, %v5770_v53  ;;  %v5773_v13 = vpop.f32.mrb[130].mxu0 }
 0x355   : > { %v4001_v51 = vadd.f32 %v5663_v32, %v7894_v27  ;;  %v5774_v37 = vpop.f32.mrb[131].mxu0 }
 0x356   : > { %v5775_v10 = vadd.f32 %v5774_v37, %v5773_v13  ;;  %v7988_v9 = vadd.f32 %v5772_v33, %v3998_v5 }
 0x357   : > { %v5664_v15 = vpop.f32.mrb[132].mxu1 }
 0x358   : > { %v5665_v45 = vpop.f32.mrb[133].mxu1  ;;  %v7991_v59 = vadd.f32 %v5775_v10, %v4001_v51 }
 0x359   : > { %v5666_v8 = vadd.f32 %v5665_v45, %v5664_v15  ;;  %v5667_v0 = vpop.f32.mrb[134].mxu1 }
 0x35a   : > { %v5668_v16 = vpop.f32.mrb[135].mxu1  ;;  %v5776_v58 = vpop.f32.mrb[132].mxu0 }
 0x35b   : > { %v4006_v23 = vadd.f32 %v5666_v8, %v7898_v11  ;;  %v5669_v60 = vadd.f32 %v5668_v16, %v5667_v0  ;;  %v5777_v62 = vpop.f32.mrb[133].mxu0 }
 0x35c   : > { %v5778_v29 = vadd.f32 %v5777_v62, %v5776_v58  ;;  %v5779_v3 = vpop.f32.mrb[134].mxu0 }
 0x35d   : > { %v4009_v27 = vadd.f32 %v5669_v60, %v7900_v12  ;;  %v5780_v17 = vpop.f32.mrb[135].mxu0 }
 0x35e   : > { %v5781_v57 = vadd.f32 %v5780_v17, %v5779_v3  ;;  %v7994_v48 = vadd.f32 %v5778_v29, %v4006_v23 }
 0x35f   : > { %v5670_v14 = vpop.f32.mrb[136].mxu1 }
 0x360   : > { %v5671_v38 = vpop.f32.mrb[137].mxu1  ;;  %v7997_v54 = vadd.f32 %v5781_v57, %v4009_v27 }
 0x361   : > { %v5672_v20 = vadd.f32 %v5671_v38, %v5670_v14  ;;  %v5673_v24 = vpop.f32.mrb[138].mxu1 }
 0x362   : > { %v5674_v49 = vpop.f32.mrb[139].mxu1  ;;  %v5782_v63 = vpop.f32.mrb[136].mxu0 }
 0x363   : > { %v4014_v11 = vadd.f32 %v5672_v20, %v7904_v2  ;;  %v5675_v30 = vadd.f32 %v5674_v49, %v5673_v24  ;;  %v5783_v5 = vpop.f32.mrb[137].mxu0 }
 0x364   : > { %v5784_v32 = vadd.f32 %v5783_v5, %v5782_v63  ;;  %v5785_v53 = vpop.f32.mrb[138].mxu0 }
 0x365   : > { %v4017_v12 = vadd.f32 %v5675_v30, %v7906_v25  ;;  %v5786_v42 = vpop.f32.mrb[139].mxu0 }
 0x366   : > { %v5787_v13 = vadd.f32 %v5786_v42, %v5785_v53  ;;  %v8000_v45 = vadd.f32 %v5784_v32, %v4014_v11 }
 0x367   : > { %v5676_v51 = vpop.f32.mrb[140].mxu1 }
 0x368   : > { %v5677_v33 = vpop.f32.mrb[141].mxu1  ;;  %v8003_v0 = vadd.f32 %v5787_v13, %v4017_v12 }
 0x369   : > { %v5678_v15 = vadd.f32 %v5677_v33, %v5676_v51  ;;  %v5679_v37 = vpop.f32.mrb[142].mxu1 }
 0x36a   : > { %v5680_v10 = vpop.f32.mrb[143].mxu1  ;;  %v5788_v16 = vpop.f32.mrb[140].mxu0 }
 0x36b   : > { %v4022_v2 = vadd.f32 %v5678_v15, %v7910_v4  ;;  %v5681_v8 = vadd.f32 %v5680_v10, %v5679_v37  ;;  %v5789_v23 = vpop.f32.mrb[141].mxu0 }
 0x36c   : > { %v5790_v60 = vadd.f32 %v5789_v23, %v5788_v16  ;;  %v5791_v58 = vpop.f32.mrb[142].mxu0 }
 0x36d   : > { %v4025_v25 = vadd.f32 %v5681_v8, %v7912_v39  ;;  %v5792_v62 = vpop.f32.mrb[143].mxu0 }
 0x36e   : > { %v5793_v14 = vadd.f32 %v5792_v62, %v5791_v58  ;;  %v8008_v57 = vadd.f32 %v5790_v60, %v4022_v2 }
 0x36f   : > { %v5908_v27 = vpop.f32.mrb[144].mxu1 }
 0x370   : > { %v4232_v29 = vadd.f32 %v5908_v27, %v7922_v44  ;;  %v4223_v3 = vpop.f32.mrb[145].mxu1  ;;  %v8012_v39 = vadd.f32 %v5793_v14, %v4025_v25 }
 0x371   : > { %v4224_v17 = vadd.f32 %v4223_v3, %v7916_v43  ;;  %v5909_v38 = vpop.f32.mrb[146].mxu1 }
 0x372   : > { %v4235_v4 = vadd.f32 %v5909_v38, %v7925_v52  ;;  %v4226_v20 = vpop.f32.mrb[147].mxu1  ;;  %v4352_v49 = vmax.f32 %v4232_v29, 0.0 }
 0x373   : > { %v4227_v24 = vadd.f32 %v4226_v20, %v7919_v28  ;;  %v4350_v30 = vmax.f32 %v4224_v17, 0.0 }
 0x374   : > { %v4353_v11 = vmax.f32 %v4235_v4, 0.0 }
 0x375   : > { %v4351_v63 = vmax.f32 %v4227_v24, 0.0 }
 0x376   : > { %v4383_v12 = vpack.c.bf16 %v4353_v11, %v4352_v49 }
 0x377   : > { %v4382_v44 = vpack.c.bf16 %v4351_v63, %v4350_v30  ;;  %v5912_v5 = vpop.f32.mrb[148].mxu1 }
 0x378   : > { %v4248_v32 = vadd.f32 %v5912_v5, %v7934_v35  ;;  %v4239_v43 = vpop.f32.mrb[149].mxu1 }
 0x379   : > { %v4240_v53 = vadd.f32 %v4239_v43, %v7928_v55  ;;  %v5913_v51 = vpop.f32.mrb[150].mxu1  ;;  %5954 = vmatprep.mubr.bf16.mxu0 %v4382_v44 }
 0x37a   : > { %v4251_v52 = vadd.f32 %v5913_v51, %v7937_v31  ;;  %v4242_v42 = vpop.f32.mrb[151].mxu1  ;;  %5955 = vmatmul.mubr.bf16.vlgmr.msra.gmra.mrb[144].mxu0 %v4383_v12  ;;  %v4356_v33 = vmax.f32 %v4248_v32, 0.0 }
 0x37b   : > { %v4243_v28 = vadd.f32 %v4242_v42, %v7931_v36  ;;  %v4354_v15 = vmax.f32 %v4240_v53, 0.0 }
 0x37c   : > { %v4357_v13 = vmax.f32 %v4251_v52, 0.0 }
 0x37d   : > { %v4355_v37 = vmax.f32 %v4243_v28, 0.0 }
 0x37e   : > { %v4385_v10 = vpack.c.bf16 %v4357_v13, %v4356_v33 }
 0x37f   : > { %v4384_v2 = vpack.c.bf16 %v4355_v37, %v4354_v15  ;;  %v5916_v8 = vpop.f32.mrb[152].mxu1 }
 0x380   : > { %v4264_v35 = vadd.f32 %v5916_v8, %v7946_v61  ;;  %v4255_v16 = vpop.f32.mrb[153].mxu1 }
 0x381   : > { %v4256_v55 = vadd.f32 %v4255_v16, %v7940_v1  ;;  %v5917_v25 = vpop.f32.mrb[154].mxu1  ;;  %5958 = vmatprep.mubr.bf16.mxu0 %v4384_v2 }
 0x382   : > { %v4267_v31 = vadd.f32 %v5917_v25, %v7949_v41  ;;  %v4258_v23 = vpop.f32.mrb[155].mxu1  ;;  %5959 = vmatmul.mubr.bf16.gmra.mrb[148].mxu0 %v4385_v10  ;;  %v4360_v60 = vmax.f32 %v4264_v35, 0.0 }
 0x383   : > { %v4259_v36 = vadd.f32 %v4258_v23, %v7943_v7  ;;  %v4358_v27 = vmax.f32 %v4256_v55, 0.0 }
 0x384   : > { %v4361_v58 = vmax.f32 %v4267_v31, 0.0 }
 0x385   : > { %v4359_v62 = vmax.f32 %v4259_v36, 0.0 }
 0x386   : > { %v4387_v29 = vpack.c.bf16 %v4361_v58, %v4360_v60 }
 0x387   : > { %v4386_v3 = vpack.c.bf16 %v4359_v62, %v4358_v27  ;;  %v5920_v14 = vpop.f32.mrb[156].mxu1 }
 0x388   : > { %v4280_v61 = vadd.f32 %v5920_v14, %v7958_v22  ;;  %v4271_v17 = vpop.f32.mrb[157].mxu1 }
 0x389   : > { %v4272_v1 = vadd.f32 %v4271_v17, %v7952_v19  ;;  %v5921_v38 = vpop.f32.mrb[158].mxu1  ;;  %5962 = vmatprep.mubr.bf16.mxu0 %v4386_v3 }
 0x38a   : > { %v4283_v41 = vadd.f32 %v5921_v38, %v7961_v18  ;;  %v4274_v4 = vpop.f32.mrb[159].mxu1  ;;  %5963 = vmatmul.mubr.bf16.gmra.mrb[152].mxu0 %v4387_v29  ;;  %v4364_v20 = vmax.f32 %v4280_v61, 0.0 }
 0x38b   : > { %v4275_v7 = vadd.f32 %v4274_v4, %v7955_v46  ;;  %v4362_v49 = vmax.f32 %v4272_v1, 0.0 }
 0x38c   : > { %v4365_v24 = vmax.f32 %v4283_v41, 0.0 }
 0x38d   : > { %v4363_v11 = vmax.f32 %v4275_v7, 0.0 }
 0x38e   : > { %v4389_v30 = vpack.c.bf16 %v4365_v24, %v4364_v20  ;;  %v5307_v24 = vld [vmem:[%s6802_s20 + $0x8] sm:$0xff]  }
 0x38f   : > { %v4388_v63 = vpack.c.bf16 %v4363_v11, %v4362_v49  ;;  %v5924_v12 = vpop.f32.mrb[160].mxu1  ;;  %v8047_v49 = vld [vmem:[%s8187_s6] ss:$0 sm:$0xff] }
 0x390   : > { %v4296_v22 = vadd.f32 %v5924_v12, %v7970_v50  ;;  %v4287_v44 = vpop.f32.mrb[161].mxu1  ;;  %v5250_v12 = vunpack.c.h.bf16 %v5307_v24 }
 0x391   : > { %v4288_v19 = vadd.f32 %v4287_v44, %v7964_v21  ;;  %v5925_v5 = vpop.f32.mrb[162].mxu1  ;;  %5966 = vmatprep.mubr.bf16.mxu0 %v4388_v63 }
 0x392   : > { %v4299_v18 = vadd.f32 %v5925_v5, %v7973_v26  ;;  %v4290_v32 = vpop.f32.mrb[163].mxu1  ;;  %5967 = vmatmul.mubr.bf16.gmra.mrb[156].mxu0 %v4389_v30  ;;  %v4368_v43 = vmax.f32 %v4296_v22, 0.0 }
 0x393   : > { %v4291_v46 = vadd.f32 %v4290_v32, %v7967_v40  ;;  %v4366_v51 = vmax.f32 %v4288_v19, 0.0 }
 0x394   : > { %v4369_v53 = vmax.f32 %v4299_v18, 0.0 }
 0x395   : > { %v4367_v52 = vmax.f32 %v4291_v46, 0.0 }
 0x396   : > { %v4391_v42 = vpack.c.bf16 %v4369_v53, %v4368_v43  ;;  %v5309_v53 = vld [vmem:[%s6802_s20 + $0x18] sm:$0xff]  }
 0x397   : > { %v4390_v28 = vpack.c.bf16 %v4367_v52, %v4366_v51  ;;  %v5928_v33 = vpop.f32.mrb[164].mxu1 }
 0x398   : > { %v4312_v50 = vadd.f32 %v5928_v33, %v7982_v56  ;;  %v4303_v13 = vpop.f32.mrb[165].mxu1 }
 0x399   : > { %v4304_v21 = vadd.f32 %v4303_v13, %v7976_v6  ;;  %v5929_v15 = vpop.f32.mrb[166].mxu1  ;;  %5970 = vmatprep.mubr.bf16.mxu0 %v4390_v28  ;;  %v5257_v13 = vunpack.c.l.bf16 %v5309_v53 }
 0x39a   : > { %v4315_v26 = vadd.f32 %v5929_v15, %v7985_v34  ;;  %v4306_v37 = vpop.f32.mrb[167].mxu1  ;;  %5971 = vmatmul.mubr.bf16.gmra.mrb[160].mxu0 %v4391_v42  ;;  %v4372_v10 = vmax.f32 %v4312_v50, 0.0  ;;  %v5308_v42 = vld [vmem:[%s6802_s20 + $0x10] sm:$0xff]  }
 0x39b   : > { %v4307_v40 = vadd.f32 %v4306_v37, %v7979_v47  ;;  %v4370_v8 = vmax.f32 %v4304_v21, 0.0 }
 0x39c   : > { %v4373_v2 = vmax.f32 %v4315_v26, 0.0  ;;  %v5253_v26 = vunpack.c.l.bf16 %v5308_v42 }
 0x39d   : > { %v4371_v35 = vmax.f32 %v4307_v40, 0.0 }
 0x39e   : > { %v4393_v16 = vpack.c.bf16 %v4373_v2, %v4372_v10  ;;  %v5258_v10 = vunpack.c.h.bf16 %v5309_v53 }
 0x39f   : > { %v4392_v55 = vpack.c.bf16 %v4371_v35, %v4370_v8  ;;  %v5932_v25 = vpop.f32.mrb[168].mxu1  ;;  %v5254_v35 = vunpack.c.h.bf16 %v5308_v42  ;;  %v5315_v42 = vld [vmem:[%s6802_s20 + $0x48] sm:$0xff]  }
 0x3a0   : > { %v4328_v56 = vadd.f32 %v5932_v25, %v7994_v48  ;;  %v4319_v31 = vpop.f32.mrb[169].mxu1 }
 0x3a1   : > { %v4320_v6 = vadd.f32 %v4319_v31, %v7988_v9  ;;  %v5933_v23 = vpop.f32.mrb[170].mxu1  ;;  %5974 = vmatprep.mubr.bf16.mxu0 %v4392_v55 }
 0x3a2   : > { %v4331_v34 = vadd.f32 %v5933_v23, %v7997_v54  ;;  %v4322_v36 = vpop.f32.mrb[171].mxu1  ;;  %5975 = vmatmul.mubr.bf16.gmra.mrb[164].mxu0 %v4393_v16  ;;  %v4376_v60 = vmax.f32 %v4328_v56, 0.0 }
 0x3a3   : > { %v4323_v47 = vadd.f32 %v4322_v36, %v7991_v59  ;;  %v4374_v27 = vmax.f32 %v4320_v6, 0.0  ;;  %v5311_v6 = vld [vmem:[%s6802_s20 + $0x28] sm:$0xff]   ;;  %v5310_v36 = vld [vmem:[%s6802_s20 + $0x20] sm:$0xff]  }
 0x3a4   : > { %v4377_v58 = vmax.f32 %v4331_v34, 0.0 }
 0x3a5   : > { %v4375_v62 = vmax.f32 %v4323_v47, 0.0 }
 0x3a6   : > { %v4395_v29 = vpack.c.bf16 %v4377_v58, %v4376_v60 }
 0x3a7   : > { %v4394_v3 = vpack.c.bf16 %v4375_v62, %v4374_v27  ;;  %v5936_v14 = vpop.f32.mrb[172].mxu1  ;;  %v5265_v27 = vunpack.c.l.bf16 %v5311_v6 }
 0x3a8   : > { %v4344_v48 = vadd.f32 %v5936_v14, %v8008_v57  ;;  %v4335_v61 = vpop.f32.mrb[173].mxu1 }
 0x3a9   : > { %v4336_v9 = vadd.f32 %v4335_v61, %v8000_v45  ;;  %v5937_v17 = vpop.f32.mrb[174].mxu1  ;;  %5978 = vmatprep.mubr.bf16.mxu0 %v4394_v3  ;;  %v5244_v45 = vld [vmem:[%s6802_s20] sm:$0xff]   ;;  %v5261_v3 = vunpack.c.l.bf16 %v5310_v36  ;;  %v5266_v61 = vunpack.c.h.bf16 %v5311_v6 }
 0x3aa   : > { %v4347_v54 = vadd.f32 %v5937_v17, %v8012_v39  ;;  %v4338_v1 = vpop.f32.mrb[175].mxu1  ;;  %5979 = vmatmul.mubr.bf16.gmra.mrb[168].mxu0 %v4395_v29  ;;  %v4380_v38 = vmax.f32 %v4344_v48, 0.0  ;;  %v5249_v39 = vunpack.c.l.bf16 %v5307_v24  ;;  %v5245_v30 = vunpack.c.l.bf16 %v5244_v45  ;;  %v5312_v24 = vld [vmem:[%s6802_s20 + $0x30] sm:$0xff]  }
 0x3ab   : > { %v4339_v59 = vadd.f32 %v4338_v1, %v8003_v0  ;;  %v4378_v4 = vmax.f32 %v4336_v9, 0.0  ;;  %v5246_v19 = vunpack.c.h.bf16 %v5244_v45 }
 0x3ac   : > { %v4381_v41 = vmax.f32 %v4347_v54, 0.0  ;;  %v5262_v54 = vunpack.c.h.bf16 %v5310_v36  ;;  %v5317_v36 = vld [vmem:[%s6802_s20 + $0x58] sm:$0xff]  }
 0x3ad   : > { %v4379_v7 = vmax.f32 %v4339_v59, 0.0 }
 0x3ae   : > { %v4397_v20 = vpack.c.bf16 %v4381_v41, %v4380_v38 }
 0x3af   : > { %v4396_v57 = vpack.c.bf16 %v4379_v7, %v4378_v4  ;;  %v5313_v7 = vld [vmem:[%s6802_s20 + $0x38] sm:$0xff]  }
 0x3b1   : > { %5982 = vmatprep.mubr.bf16.mxu0 %v4396_v57 }
 0x3b2   : > { %5983 = vmatmul.mubr.bf16.gmra.mrb[172].mxu0 %v4397_v20 }
 0x44d   : > { %v5956_v11 = vpop.f32.mrb[144].mxu0 }
 0x44e   : > { %v4512_v0 = vadd.f32 %v5956_v11, %v8047_v49  ;;  %v4503_v63 = vpop.f32.mrb[145].mxu0 }
 0x44f   : > { %v4504_v22 = vadd.f32 %v8047_v49, %v4503_v63  ;;  %v5957_v44 = vpop.f32.mrb[146].mxu0 }
 0x450   : > { %v4696_v5 = vadd.f32 %v5249_v39, %v4512_v0  ;;  %v4515_v18 = vadd.f32 %v5957_v44, %v8047_v49  ;;  %v4506_v32 = vpop.f32.mrb[147].mxu0 }
 0x451   : > { %v4694_v46 = vadd.f32 %v5245_v30, %v4504_v22  ;;  %v4507_v43 = vadd.f32 %v8047_v49, %v4506_v32  ;;  %v5273_v30 = vunpack.c.l.bf16 %v5313_v7  ;;  %v5270_v32 = vunpack.c.h.bf16 %v5312_v24 }
 0x452   : > { %v4728_v51 = vmax.f32 %v4696_v5, 0.0  ;;  %v4697_v52 = vadd.f32 %v5250_v12, %v4515_v18  ;;  %v5269_v12 = vunpack.c.l.bf16 %v5312_v24  ;;  %v5319_v24 = vld [vmem:[%s6802_s20 + $0x68] sm:$0xff]  }
 0x453   : > { %v4726_v28 = vmax.f32 %v4694_v46, 0.0  ;;  %v4695_v33 = vadd.f32 %v5246_v19, %v4507_v43  ;;  %v5274_v19 = vunpack.c.h.bf16 %v5313_v7 }
 0x454   : > { %4760 = vst [vmem:[%s8056_s16 + $0x10] sm:$0xff] %v4728_v51  ;;  %v4729_v50 = vmax.f32 %v4697_v52, 0.0 }
 0x455   : > { %4758 = vst [vmem:[%s8056_s16] sm:$0xff] %v4726_v28  ;;  %v4727_v21 = vmax.f32 %v4695_v33, 0.0  ;;  %v5960_v15 = vpop.f32.mrb[148].mxu0 }
 0x456   : > { %4761 = vst [vmem:[%s8056_s16 + $0x18] sm:$0xff] %v4729_v50  ;;  %v4528_v37 = vadd.f32 %v5960_v15, %v8047_v49  ;;  %v4519_v40 = vpop.f32.mrb[149].mxu0  ;;  %v5314_v50 = vld [vmem:[%s6802_s20 + $0x40] sm:$0xff]  }
 0x457   : > { %4759 = vst [vmem:[%s8056_s16 + $0x8] sm:$0xff] %v4727_v21  ;;  %v4520_v2 = vadd.f32 %v8047_v49, %v4519_v40  ;;  %v5961_v8 = vpop.f32.mrb[150].mxu0 }
 0x458   : > { %v4700_v16 = vadd.f32 %v5257_v13, %v4528_v37  ;;  %v4531_v55 = vadd.f32 %v5961_v8, %v8047_v49  ;;  %v4522_v25 = vpop.f32.mrb[151].mxu0 }
 0x459   : > { %v4698_v56 = vadd.f32 %v5253_v26, %v4520_v2  ;;  %v4523_v31 = vadd.f32 %v8047_v49, %v4522_v25  ;;  %v5281_v26 = vunpack.c.l.bf16 %v5315_v42  ;;  %v5278_v25 = vunpack.c.h.bf16 %v5314_v50 }
 0x45a   : > { %v4732_v23 = vmax.f32 %v4700_v16, 0.0  ;;  %v4701_v34 = vadd.f32 %v5258_v10, %v4531_v55  ;;  %v5277_v10 = vunpack.c.l.bf16 %v5314_v50  ;;  %v5321_v50 = vld [vmem:[%s6802_s20 + $0x78] sm:$0xff]  }
 0x45b   : > { %v4730_v47 = vmax.f32 %v4698_v56, 0.0  ;;  %v4699_v60 = vadd.f32 %v5254_v35, %v4523_v31  ;;  %v5282_v35 = vunpack.c.h.bf16 %v5315_v42 }
 0x45c   : > { %4764 = vst [vmem:[%s8056_s16 + $0x30] sm:$0xff] %v4732_v23  ;;  %v4733_v58 = vmax.f32 %v4701_v34, 0.0 }
 0x45d   : > { %4762 = vst [vmem:[%s8056_s16 + $0x20] sm:$0xff] %v4730_v47  ;;  %v4731_v62 = vmax.f32 %v4699_v60, 0.0  ;;  %v5964_v29 = vpop.f32.mrb[152].mxu0 }
 0x45e   : > { %4765 = vst [vmem:[%s8056_s16 + $0x38] sm:$0xff] %v4733_v58  ;;  %v4544_v14 = vadd.f32 %v5964_v29, %v8047_v49  ;;  %v4535_v48 = vpop.f32.mrb[153].mxu0  ;;  %v5316_v58 = vld [vmem:[%s6802_s20 + $0x50] sm:$0xff]  }
 0x45f   : > { %4763 = vst [vmem:[%s8056_s16 + $0x28] sm:$0xff] %v4731_v62  ;;  %v4536_v9 = vadd.f32 %v8047_v49, %v4535_v48  ;;  %v5965_v17 = vpop.f32.mrb[154].mxu0 }
 0x460   : > { %v4704_v1 = vadd.f32 %v5265_v27, %v4544_v14  ;;  %v4547_v59 = vadd.f32 %v5965_v17, %v8047_v49  ;;  %v4538_v38 = vpop.f32.mrb[155].mxu0 }
 0x461   : > { %v4702_v41 = vadd.f32 %v5261_v3, %v4536_v9  ;;  %v4539_v4 = vadd.f32 %v8047_v49, %v4538_v38  ;;  %v5289_v3 = vunpack.c.l.bf16 %v5317_v36  ;;  %v5286_v38 = vunpack.c.h.bf16 %v5316_v58 }
 0x462   : > { %v4736_v20 = vmax.f32 %v4704_v1, 0.0  ;;  %v4705_v57 = vadd.f32 %v5266_v61, %v4547_v59  ;;  %v5285_v61 = vunpack.c.l.bf16 %v5316_v58 }
 0x463   : > { %v4734_v45 = vmax.f32 %v4702_v41, 0.0  ;;  %v4703_v39 = vadd.f32 %v5262_v54, %v4539_v4  ;;  %v5290_v54 = vunpack.c.h.bf16 %v5317_v36 }
 0x464   : > { %4768 = vst [vmem:[%s8056_s16 + $0x50] sm:$0xff] %v4736_v20  ;;  %v4737_v11 = vmax.f32 %v4705_v57, 0.0 }
 0x465   : > { %4766 = vst [vmem:[%s8056_s16 + $0x40] sm:$0xff] %v4734_v45  ;;  %v4735_v0 = vmax.f32 %v4703_v39, 0.0  ;;  %v5968_v63 = vpop.f32.mrb[156].mxu0 }
 0x466   : > { %4769 = vst [vmem:[%s8056_s16 + $0x58] sm:$0xff] %v4737_v11  ;;  %v4560_v22 = vadd.f32 %v5968_v63, %v8047_v49  ;;  %v4551_v44 = vpop.f32.mrb[157].mxu0  ;;  %v5318_v11 = vld [vmem:[%s6802_s20 + $0x60] sm:$0xff]  }
 0x467   : > { %4767 = vst [vmem:[%s8056_s16 + $0x48] sm:$0xff] %v4735_v0  ;;  %v4552_v5 = vadd.f32 %v8047_v49, %v4551_v44  ;;  %v5969_v18 = vpop.f32.mrb[158].mxu0 }
 0x468   : > { %v4708_v46 = vadd.f32 %v5273_v30, %v4560_v22  ;;  %v4563_v43 = vadd.f32 %v5969_v18, %v8047_v49  ;;  %v4554_v53 = vpop.f32.mrb[159].mxu0 }
 0x469   : > { %v4706_v51 = vadd.f32 %v5269_v12, %v4552_v5  ;;  %v4555_v52 = vadd.f32 %v8047_v49, %v4554_v53  ;;  %v5297_v12 = vunpack.c.l.bf16 %v5319_v24  ;;  %v5294_v53 = vunpack.c.h.bf16 %v5318_v11 }
 0x46a   : > { %v4740_v28 = vmax.f32 %v4708_v46, 0.0  ;;  %v4709_v33 = vadd.f32 %v5274_v19, %v4563_v43  ;;  %v5293_v19 = vunpack.c.l.bf16 %v5318_v11 }
 0x46b   : > { %v4738_v13 = vmax.f32 %v4706_v51, 0.0  ;;  %v4707_v21 = vadd.f32 %v5270_v32, %v4555_v52  ;;  %v5298_v32 = vunpack.c.h.bf16 %v5319_v24 }
 0x46c   : > { %4772 = vst [vmem:[%s8056_s16 + $0x70] sm:$0xff] %v4740_v28  ;;  %v4741_v15 = vmax.f32 %v4709_v33, 0.0 }
 0x46d   : > { %4770 = vst [vmem:[%s8056_s16 + $0x60] sm:$0xff] %v4738_v13  ;;  %v4739_v37 = vmax.f32 %v4707_v21, 0.0  ;;  %v5972_v40 = vpop.f32.mrb[160].mxu0 }
 0x46e   : > { %4773 = vst [vmem:[%s8056_s16 + $0x78] sm:$0xff] %v4741_v15  ;;  %v4576_v2 = vadd.f32 %v5972_v40, %v8047_v49  ;;  %v4567_v8 = vpop.f32.mrb[161].mxu0  ;;  %v5320_v15 = vld [vmem:[%s6802_s20 + $0x70] sm:$0xff]  }
 0x46f   : > { %4771 = vst [vmem:[%s8056_s16 + $0x68] sm:$0xff] %v4739_v37  ;;  %v4568_v16 = vadd.f32 %v8047_v49, %v4567_v8  ;;  %v5973_v55 = vpop.f32.mrb[162].mxu0 }
 0x470   : > { %v4712_v56 = vadd.f32 %v5281_v26, %v4576_v2  ;;  %v4579_v31 = vadd.f32 %v5973_v55, %v8047_v49  ;;  %v4570_v6 = vpop.f32.mrb[163].mxu0 }
 0x471   : > { %v4710_v23 = vadd.f32 %v5277_v10, %v4568_v16  ;;  %v4571_v34 = vadd.f32 %v8047_v49, %v4570_v6  ;;  %v5305_v10 = vunpack.c.l.bf16 %v5321_v50  ;;  %v5302_v6 = vunpack.c.h.bf16 %v5320_v15 }
 0x472   : > { %v4744_v47 = vmax.f32 %v4712_v56, 0.0  ;;  %v4713_v60 = vadd.f32 %v5282_v35, %v4579_v31  ;;  %v5301_v35 = vunpack.c.l.bf16 %v5320_v15 }
 0x473   : > { %v4742_v27 = vmax.f32 %v4710_v23, 0.0  ;;  %v4711_v62 = vadd.f32 %v5278_v25, %v4571_v34  ;;  %v5306_v25 = vunpack.c.h.bf16 %v5321_v50 }
 0x474   : > { %4776 = vst [vmem:[%s8056_s16 + $0x90] sm:$0xff] %v4744_v47  ;;  %v4745_v29 = vmax.f32 %v4713_v60, 0.0 }
 0x475   : > { %4774 = vst [vmem:[%s8056_s16 + $0x80] sm:$0xff] %v4742_v27  ;;  %v4743_v14 = vmax.f32 %v4711_v62, 0.0  ;;  %v5976_v48 = vpop.f32.mrb[164].mxu0 }
 0x476   : > { %4777 = vst [vmem:[%s8056_s16 + $0x98] sm:$0xff] %v4745_v29  ;;  %v4592_v9 = vadd.f32 %v5976_v48, %v8047_v49  ;;  %v4583_v17 = vpop.f32.mrb[165].mxu0 }
 0x477   : > { %4775 = vst [vmem:[%s8056_s16 + $0x88] sm:$0xff] %v4743_v14  ;;  %v4584_v1 = vadd.f32 %v8047_v49, %v4583_v17  ;;  %v5977_v59 = vpop.f32.mrb[166].mxu0 }
 0x478   : > { %v4716_v41 = vadd.f32 %v5289_v3, %v4592_v9  ;;  %v4595_v4 = vadd.f32 %v5977_v59, %v8047_v49  ;;  %v4586_v7 = vpop.f32.mrb[167].mxu0 }
 0x479   : > { %v4714_v20 = vadd.f32 %v5285_v61, %v4584_v1  ;;  %v4587_v57 = vadd.f32 %v8047_v49, %v4586_v7 }
 0x47a   : > { %v4748_v45 = vmax.f32 %v4716_v41, 0.0  ;;  %v4717_v39 = vadd.f32 %v5290_v54, %v4595_v4 }
 0x47b   : > { %v4746_v30 = vmax.f32 %v4714_v20, 0.0  ;;  %v4715_v0 = vadd.f32 %v5286_v38, %v4587_v57 }
 0x47c   : > { %4780 = vst [vmem:[%s8056_s16 + $0xb0] sm:$0xff] %v4748_v45  ;;  %v4749_v63 = vmax.f32 %v4717_v39, 0.0 }
 0x47d   : > { %4778 = vst [vmem:[%s8056_s16 + $0xa0] sm:$0xff] %v4746_v30  ;;  %v4747_v22 = vmax.f32 %v4715_v0, 0.0  ;;  %v5980_v44 = vpop.f32.mrb[168].mxu0 }
 0x47e   : > { %4781 = vst [vmem:[%s8056_s16 + $0xb8] sm:$0xff] %v4749_v63  ;;  %v4608_v5 = vadd.f32 %v5980_v44, %v8047_v49  ;;  %v4599_v18 = vpop.f32.mrb[169].mxu0 }
 0x47f   : > { %4779 = vst [vmem:[%s8056_s16 + $0xa8] sm:$0xff] %v4747_v22  ;;  %v4600_v46 = vadd.f32 %v8047_v49, %v4599_v18  ;;  %v5981_v43 = vpop.f32.mrb[170].mxu0 }
 0x480   : > { %v4720_v51 = vadd.f32 %v5297_v12, %v4608_v5  ;;  %v4611_v52 = vadd.f32 %v5981_v43, %v8047_v49  ;;  %v4602_v42 = vpop.f32.mrb[171].mxu0 }
 0x481   : > { %v4718_v28 = vadd.f32 %v5293_v19, %v4600_v46  ;;  %v4603_v33 = vadd.f32 %v8047_v49, %v4602_v42 }
 0x482   : > { %v4752_v13 = vmax.f32 %v4720_v51, 0.0  ;;  %v4721_v21 = vadd.f32 %v5298_v32, %v4611_v52 }
 0x483   : > { %v4750_v26 = vmax.f32 %v4718_v28, 0.0  ;;  %v4719_v37 = vadd.f32 %v5294_v53, %v4603_v33 }
 0x484   : > { %4784 = vst [vmem:[%s8056_s16 + $0xd0] sm:$0xff] %v4752_v13  ;;  %v4753_v40 = vmax.f32 %v4721_v21, 0.0 }
 0x485   : > { %4782 = vst [vmem:[%s8056_s16 + $0xc0] sm:$0xff] %v4750_v26  ;;  %v4751_v2 = vmax.f32 %v4719_v37, 0.0  ;;  %v5984_v8 = vpop.f32.mrb[172].mxu0 }
 0x486   : > { %4785 = vst [vmem:[%s8056_s16 + $0xd8] sm:$0xff] %v4753_v40  ;;  %v4624_v16 = vadd.f32 %v5984_v8, %v8047_v49  ;;  %v4615_v55 = vpop.f32.mrb[173].mxu0 }
 0x487   : > { %4783 = vst [vmem:[%s8056_s16 + $0xc8] sm:$0xff] %v4751_v2  ;;  %v4616_v56 = vadd.f32 %v8047_v49, %v4615_v55  ;;  %v5985_v31 = vpop.f32.mrb[174].mxu0 }
 0x488   : > { %v4724_v23 = vadd.f32 %v5305_v10, %v4624_v16  ;;  %v4627_v34 = vadd.f32 %v5985_v31, %v8047_v49  ;;  %v4618_v36 = vpop.f32.mrb[175].mxu0 }
 0x489   : > { %v4722_v47 = vadd.f32 %v5301_v35, %v4616_v56  ;;  %v4619_v60 = vadd.f32 %v8047_v49, %v4618_v36 }
 0x48a   : > { %v4756_v58 = vmax.f32 %v4724_v23, 0.0  ;;  %v4725_v27 = vadd.f32 %v5306_v25, %v4627_v34 }
 0x48b   : > { %v4754_v62 = vmax.f32 %v4722_v47, 0.0  ;;  %v4723_v29 = vadd.f32 %v5302_v6, %v4619_v60 }
 0x48c   : > { %4788 = vst [vmem:[%s8056_s16 + $0xf0] sm:$0xff] %v4756_v58  ;;  %v4757_v3 = vmax.f32 %v4725_v27, 0.0 }
 0x48d   : > { %4786 = vst [vmem:[%s8056_s16 + $0xe0] sm:$0xff] %v4754_v62  ;;  %v4755_v49 = vmax.f32 %v4723_v29, 0.0 }
 0x48e   : > { %4789 = vst [vmem:[%s8056_s16 + $0xf8] sm:$0xff] %v4757_v3 }
 0x48f   : > { %4787 = vst [vmem:[%s8056_s16 + $0xe8] sm:$0xff] %v4755_v49 }
 0x490   : > { %6480 = shalt.err (!%p6477_p4)
}
 0x491   : > { %s6481_s14 = scalar_lea.hbm %s8132_s30, 4096  ;;  %s6485_s21 = scalar_lea.hbm %s8188_s7, 8192 }
 0x492   : > { %p6482_p9 = scmp.ne.s32.totalorder %s8132_s30, %s6481_s14  ;;  %p6486_p8 = scmp.lt.u32.totalorder %s8132_s30, %s8188_s7 }
 0x493   : > { %p6487_p13 = scmp.lt.u32.totalorder %s6485_s21, %s6481_s14  ;;  %p6489_p10 = scmp.lt.u32.totalorder %s6481_s14, %s8132_s30 }
 0x494   : > { %p6483_p0 = pnand %p6482_p9, %p6747_p5 }
 0x495   : > { %p6488_p6 = por %p6487_p13, %p6486_p8 }
 0x496   : > { %p6484_p11 = pneg %p6483_p0 }
 0x497   : > { %p6490_p3 = por %p6489_p10, %p6488_p6 }
 0x499   : > { %p6491_p7 = pnand %p6490_p3, %p6484_p11 }
 0x49b   : > { %6494 = shalt.err (!%p6491_p7)
}
 0x49c   : > { %s6551_s11 = smov 128   ;;  %s6552_s20 = smov 8  }
 0x49d   : > { %6016 = dma.vmem_to_hbm [thread:$0]  (%p6747_p5), %s8134_s23, 4096, %s8132_s30, %s4791_s28, %s6551_s11, %s6551_s11, %s6552_s20  }
 0x49e PF: > { %s8217_s9 = sld [smem:[#allocation16_spill]]  ;;  %s4819_s13 = sand.u32 1, %s6529_s24  }
 0x49f   : > { %p8219_p1 = scmp.ge.s32.totalorder %s6541_s27, 2  ;;  %s4820_s15 = scalar_lea.sflag [#allocation5], %s4819_s13 }
 0x4a4   : > { %p8218_p12 = scmp.ne.s32.totalorder %s8217_s9, 0 }
 0x4a6   : > { %p6033_p2 = pnand %p8219_p1, %p8218_p12 }
 0x4a8   : > { %6524 = dma.done.wait (!%p6033_p2), %s4820_s15, 4096  }
 0x4a9   : > { %6526 = vsyncadd (!%p6033_p2), %s4820_s15, 4294963200  ;;  %p22_p4 = scmp.ge.s32.totalorder %s6733_s22, 4   ;;  %s8220_s24 = smov %s6533_s25 }
 0x4aa   : > { %s8221_s25 = smov %s6537_s26  ;;  %s8222_s26 = smov %s6743_s18 }
 0x4ab   : > { %s8223_s27 = smov %s6733_s22  ;;  %24 = sbr.rel (!%p22_p4) target bundleno = 7 (0x7), region = 108 }
 0x4b2   :  { %4825 = vsyncpa [#allocation4], 1 }
 0x4b3   :  { %4827 = vsyncpa [#allocation4 + $0x1], 1 }
 0x4b4   :  { %4828 = vsyncpa [#allocation7], 1 }
 0x4b5   :  { %4829 = vsyncpa [#allocation10], 1 }
 0x4b6   :  { %4830 = vsyncpa [#allocation5], 1 }
 0x4b7   :  { %4832 = vsyncpa [#allocation5 + $0x1], 1 }

</bundles_post_ra>
